<compile_context>
chip_gen: v7x
topology: tpu7x:2x2x1
jax: 0.10.0
libtpu: 0.0.40
codegen_flags: <defaults>
</compile_context>

<pallas_src>
import functools

import jax
import jax.numpy as jnp
from jax import lax
from jax.experimental import pallas as pl
from jax.experimental.pallas import tpu as pltpu


PARAM_ORDER = (
    "fc1_w", "fc1_b", "fc2_w", "fc2_b",
    "enc_emb", "enc_w_ih", "enc_b_ih", "enc_w_hh", "enc_b_hh",
    "att_w1", "att_b1", "att_w2", "att_b2", "att_v", "att_bv",
    "dec_emb", "dec_w_ih_ctx", "dec_w_ih_emb", "dec_b_ih",
    "dec_w_hh", "dec_b_hh", "dec_fc_w", "dec_fc_b",
)


def _gru_step(gx, gh, h, H):
    """PyTorch nn.GRU gate equations; gx/gh are [B, 3H] (r, z, n lane blocks)."""
    r = jax.nn.sigmoid(gx[:, 0:H] + gh[:, 0:H])
    z = jax.nn.sigmoid(gx[:, H:2 * H] + gh[:, H:2 * H])
    n = jnp.tanh(gx[:, 2 * H:3 * H] + r * gh[:, 2 * H:3 * H])
    return (1.0 - z) * n + z * h


def _fused_forward_kernel(
    obs_ref,
    fc1_w, fc1_b, fc2_w, fc2_b,
    enc_emb, enc_w_ih, enc_b_ih, enc_w_hh, enc_b_hh,
    att_w1, att_b1, att_w2, att_b2, att_v, att_bv,
    dec_emb, dec_w_ih_ctx, dec_w_ih_emb, dec_b_ih, dec_w_hh, dec_b_hh,
    dec_fc_w, dec_fc_b,
    logits_ref, hn_ref,
    *, S, A, H, E,
):
    f32 = jnp.float32
    obs = obs_ref[...]                                   # [B, S]
    B = obs.shape[0]
    obs_i = obs.astype(jnp.int32)                        # torch `.long()` truncation

    def mm(x, w):
        return jnp.dot(x, w, preferred_element_type=f32)

    # ---- fc1 / fc2 head on raw obs
    obs_fc1 = mm(obs, fc1_w[...]) + fc1_b[...]           # [B, H]
    obs_fc2 = mm(obs_fc1, fc2_w[...]) + fc2_b[...]       # [B, A]

    # ---- Encoder: Embedding(S, E) -> GRU(E, H), zero-initialized hidden.
    # Embedding gather + input projection fused: gate_tbl[v] = emb[v] @ W_ih + b_ih
    enc_gate_tbl = mm(enc_emb[...], enc_w_ih[...]) + enc_b_ih[...]   # [S, 3H]
    w_hh_e = enc_w_hh[...]                               # [H, 3H]
    b_hh_e = enc_b_hh[...]                               # [1, 3H]
    iota_s = lax.broadcasted_iota(jnp.int32, (1, S), 1)

    h = jnp.zeros((B, H), f32)                           # initialize_hidden_state
    enc_outs = []
    for t in range(S):                                   # fully unrolled recurrence
        onehot = (obs_i[:, t:t + 1] == iota_s).astype(f32)           # [B, S]
        gx = mm(onehot, enc_gate_tbl)                                # [B, 3H]
        gh = mm(h, w_hh_e) + b_hh_e                                  # [B, 3H]
        h = _gru_step(gx, gh, h, H)
        enc_outs.append(h)
    dec_hidden = h                                       # [B, H]

    # ---- Bahdanau additive attention: score_t = V . tanh(W1 h_t^enc + W2 h^dec)
    p2 = mm(dec_hidden, att_w2[...]) + att_b2[...]       # [B, H]
    v = att_v[...]                                       # [1, H]
    scores = []
    for t in range(S):
        p1 = mm(enc_outs[t], att_w1[...]) + att_b1[...]
        e = jnp.tanh(p1 + p2)
        scores.append(jnp.sum(e * v, axis=-1, keepdims=True) + att_bv[...])  # [B, 1]
    m = scores[0]
    for t in range(1, S):
        m = jnp.maximum(m, scores[t])
    ws = [jnp.exp(s - m) for s in scores]
    denom = ws[0]
    for t in range(1, S):
        denom = denom + ws[t]
    inv = pl.reciprocal(denom, approx=True)              # softmax normalization (EUP)
    context = (ws[0] * inv) * enc_outs[0]
    for t in range(1, S):
        context = context + (ws[t] * inv) * enc_outs[t]  # [B, H]

    # ---- Decoder: Embedding(A, E) + context-concat GRU(H+E, H) -> Linear(H, A)
    dec_idx = obs_fc2.astype(jnp.int32)                  # [B, A] token ids
    ctx_gate = mm(context, dec_w_ih_ctx[...]) + dec_b_ih[...]        # [B, 3H] (constant per step)
    dec_gate_tbl = mm(dec_emb[...], dec_w_ih_emb[...])               # [A, 3H]
    w_hh_d = dec_w_hh[...]
    b_hh_d = dec_b_hh[...]
    iota_a = lax.broadcasted_iota(jnp.int32, (1, A), 1)

    h = dec_hidden
    for t in range(A):                                   # fully unrolled recurrence
        onehot = (dec_idx[:, t:t + 1] == iota_a).astype(f32)         # [B, A]
        gx = ctx_gate + mm(onehot, dec_gate_tbl)                     # [B, 3H]
        gh = mm(h, w_hh_d) + b_hh_d
        h = _gru_step(gx, gh, h, H)
    # last decoder output == final hidden state for a single-layer GRU

    hn_ref[...] = h
    logits_ref[...] = mm(h, dec_fc_w[...]) + dec_fc_b[...]           # [B, A]


def transformer_gru_forward(obs, params, *, state_dim, action_dim, hidden, emb_dim):
    S, A, H, E = state_dim, action_dim, hidden, emb_dim
    obs = obs.astype(jnp.float32).reshape(-1, S)
    B = obs.shape[0]

    kernel = functools.partial(_fused_forward_kernel, S=S, A=A, H=H, E=E)
    vmem = pl.BlockSpec(memory_space=pltpu.MemorySpace.VMEM)
    args = [obs] + [params[name] for name in PARAM_ORDER]

    logits, hn = pl.pallas_call(
        kernel,
        out_shape=(
            jax.ShapeDtypeStruct((B, A), jnp.float32),
            jax.ShapeDtypeStruct((B, H), jnp.float32),
        ),
        in_specs=[vmem] * len(args),
        out_specs=(vmem, vmem),
    )(*args)
    return logits, hn


def init_params(key, S, A, H, E):
    ks = jax.random.split(key, 21)

    def rnd(k, shape, scale=0.1):
        return jax.random.normal(k, shape, jnp.float32) * scale

    p = {}
    p["fc1_w"] = rnd(ks[0], (S, H), 0.02)
    p["fc1_b"] = jnp.zeros((1, H), jnp.float32)
    p["fc2_w"] = rnd(ks[1], (H, A), 0.01)
    # biases chosen so obs_fc2.long() is a valid decoder-embedding index in [0, A)
    p["fc2_b"] = jnp.linspace(0.5, A - 0.6, A).astype(jnp.float32).reshape(1, A)
    p["enc_emb"] = rnd(ks[2], (S, E))
    p["enc_w_ih"] = rnd(ks[3], (E, 3 * H))
    p["enc_b_ih"] = rnd(ks[4], (1, 3 * H))
    p["enc_w_hh"] = rnd(ks[5], (H, 3 * H))      # fused (r|z|n) recurrent weights
    p["enc_b_hh"] = rnd(ks[6], (1, 3 * H))
    p["att_w1"] = rnd(ks[7], (H, H))
    p["att_b1"] = rnd(ks[8], (1, H))
    p["att_w2"] = rnd(ks[9], (H, H))
    p["att_b2"] = rnd(ks[10], (1, H))
    p["att_v"] = rnd(ks[11], (1, H))
    p["att_bv"] = rnd(ks[12], (1, 1))
    p["dec_emb"] = rnd(ks[13], (A, E))
    # decoder input weight split into [context | embedding] row blocks
    p["dec_w_ih_ctx"] = rnd(ks[14], (H, 3 * H))
    p["dec_w_ih_emb"] = rnd(ks[15], (E, 3 * H))
    p["dec_b_ih"] = rnd(ks[16], (1, 3 * H))
    p["dec_w_hh"] = rnd(ks[17], (H, 3 * H))
    p["dec_b_hh"] = rnd(ks[18], (1, 3 * H))
    p["dec_fc_w"] = rnd(ks[19], (H, A))
    p["dec_fc_b"] = rnd(ks[20], (1, A))
    return p


if __name__ == "__main__":
    S, A, H, E, B = 8, 4, 32, 32, 4   # state dim / action dim / hidden / embed / batch
    key = jax.random.PRNGKey(0)
    k_obs, k_par = jax.random.split(key)
    params = init_params(k_par, S, A, H, E)
    # integer-valued observations so obs.long() indexes the encoder embedding validly
    obs = jax.random.randint(k_obs, (B, S), 0, S).astype(jnp.float32)

    fwd = jax.jit(functools.partial(transformer_gru_forward, state_dim=S,
                                    action_dim=A, hidden=H, emb_dim=E))
    logits, hn = fwd(obs, params)
    jax.block_until_ready((logits, hn))
    assert logits.shape == (B, A) and hn.shape == (B, H)
    assert bool(jnp.all(jnp.isfinite(logits))) and bool(jnp.all(jnp.isfinite(hn)))
    print("KERNEL_OK")
</pallas_src>

<mosaic_0001>
module attributes {stable_mosaic.version = 11 : i64} {
  func.func @_fused_forward_kernel(%arg0: memref<4x8xf32, #tpu.memory_space<vmem>>, %arg1: memref<8x32xf32, #tpu.memory_space<vmem>>, %arg2: memref<1x32xf32, #tpu.memory_space<vmem>>, %arg3: memref<32x4xf32, #tpu.memory_space<vmem>>, %arg4: memref<1x4xf32, #tpu.memory_space<vmem>>, %arg5: memref<8x32xf32, #tpu.memory_space<vmem>>, %arg6: memref<32x96xf32, #tpu.memory_space<vmem>>, %arg7: memref<1x96xf32, #tpu.memory_space<vmem>>, %arg8: memref<32x96xf32, #tpu.memory_space<vmem>>, %arg9: memref<1x96xf32, #tpu.memory_space<vmem>>, %arg10: memref<32x32xf32, #tpu.memory_space<vmem>>, %arg11: memref<1x32xf32, #tpu.memory_space<vmem>>, %arg12: memref<32x32xf32, #tpu.memory_space<vmem>>, %arg13: memref<1x32xf32, #tpu.memory_space<vmem>>, %arg14: memref<1x32xf32, #tpu.memory_space<vmem>>, %arg15: memref<1x1xf32, #tpu.memory_space<vmem>>, %arg16: memref<4x32xf32, #tpu.memory_space<vmem>>, %arg17: memref<32x96xf32, #tpu.memory_space<vmem>>, %arg18: memref<32x96xf32, #tpu.memory_space<vmem>>, %arg19: memref<1x96xf32, #tpu.memory_space<vmem>>, %arg20: memref<32x96xf32, #tpu.memory_space<vmem>>, %arg21: memref<1x96xf32, #tpu.memory_space<vmem>>, %arg22: memref<32x4xf32, #tpu.memory_space<vmem>>, %arg23: memref<1x4xf32, #tpu.memory_space<vmem>>, %arg24: memref<4x4xf32, #tpu.memory_space<vmem>>, %arg25: memref<4x32xf32, #tpu.memory_space<vmem>>) attributes {dimension_semantics = [], scalar_prefetch = 0 : i64, scratch_operands = 0 : i64, tpu.core_type = #tpu.core_type<tc>} {
    %c0 = arith.constant 0 : index
    %c0_0 = arith.constant 0 : index
    %0 = vector.load %arg0[%c0, %c0_0] : memref<4x8xf32, #tpu.memory_space<vmem>>, vector<4x8xf32>
    %1 = arith.fptosi %0 : vector<4x8xf32> to vector<4x8xi32>
    %c0_1 = arith.constant 0 : index
    %c0_2 = arith.constant 0 : index
    %2 = vector.load %arg1[%c0_1, %c0_2] : memref<8x32xf32, #tpu.memory_space<vmem>>, vector<8x32xf32>
    %cst = arith.constant dense<0.000000e+00> : vector<4x32xf32>
    %3 = tpu.matmul %0, %2, %cst {dimension_numbers = #tpu.dot_dimension_numbers<[1], [0], [0], [1], [0, 0, 1, 1], [], []>} : vector<4x8xf32>, vector<8x32xf32>, vector<4x32xf32> -> vector<4x32xf32>
    %c0_3 = arith.constant 0 : index
    %c0_4 = arith.constant 0 : index
    %4 = vector.load %arg2[%c0_3, %c0_4] : memref<1x32xf32, #tpu.memory_space<vmem>>, vector<1x32xf32>
    %5 = vector.broadcast %4 : vector<1x32xf32> to vector<4x32xf32>
    %6 = arith.addf %3, %5 : vector<4x32xf32>
    %c0_5 = arith.constant 0 : index
    %c0_6 = arith.constant 0 : index
    %7 = vector.load %arg3[%c0_5, %c0_6] : memref<32x4xf32, #tpu.memory_space<vmem>>, vector<32x4xf32>
    %cst_7 = arith.constant dense<0.000000e+00> : vector<4x4xf32>
    %8 = tpu.matmul %6, %7, %cst_7 {dimension_numbers = #tpu.dot_dimension_numbers<[1], [0], [0], [1], [0, 0, 1, 1], [], []>} : vector<4x32xf32>, vector<32x4xf32>, vector<4x4xf32> -> vector<4x4xf32>
    %c0_8 = arith.constant 0 : index
    %c0_9 = arith.constant 0 : index
    %9 = vector.load %arg4[%c0_8, %c0_9] : memref<1x4xf32, #tpu.memory_space<vmem>>, vector<1x4xf32>
    %10 = vector.broadcast %9 : vector<1x4xf32> to vector<4x4xf32>
    %11 = arith.addf %8, %10 : vector<4x4xf32>
    %c0_10 = arith.constant 0 : index
    %c0_11 = arith.constant 0 : index
    %12 = vector.load %arg5[%c0_10, %c0_11] : memref<8x32xf32, #tpu.memory_space<vmem>>, vector<8x32xf32>
    %c0_12 = arith.constant 0 : index
    %c0_13 = arith.constant 0 : index
    %13 = vector.load %arg6[%c0_12, %c0_13] : memref<32x96xf32, #tpu.memory_space<vmem>>, vector<32x96xf32>
    %cst_14 = arith.constant dense<0.000000e+00> : vector<8x96xf32>
    %14 = tpu.matmul %12, %13, %cst_14 {dimension_numbers = #tpu.dot_dimension_numbers<[1], [0], [0], [1], [0, 0, 1, 1], [], []>} : vector<8x32xf32>, vector<32x96xf32>, vector<8x96xf32> -> vector<8x96xf32>
    %c0_15 = arith.constant 0 : index
    %c0_16 = arith.constant 0 : index
    %15 = vector.load %arg7[%c0_15, %c0_16] : memref<1x96xf32, #tpu.memory_space<vmem>>, vector<1x96xf32>
    %16 = vector.broadcast %15 : vector<1x96xf32> to vector<8x96xf32>
    %17 = arith.addf %14, %16 : vector<8x96xf32>
    %c0_17 = arith.constant 0 : index
    %c0_18 = arith.constant 0 : index
    %18 = vector.load %arg8[%c0_17, %c0_18] : memref<32x96xf32, #tpu.memory_space<vmem>>, vector<32x96xf32>
    %c0_19 = arith.constant 0 : index
    %c0_20 = arith.constant 0 : index
    %19 = vector.load %arg9[%c0_19, %c0_20] : memref<1x96xf32, #tpu.memory_space<vmem>>, vector<1x96xf32>
    %20 = tpu.iota {dimensions = array<i32: 1>} : vector<1x8xi32>
    %cst_21 = arith.constant 0.000000e+00 : f32
    %21 = vector.broadcast %cst_21 : f32 to vector<4x32xf32>
    %22 = vector.extract_strided_slice %1 {offsets = [0, 0], sizes = [4, 1], strides = [1, 1]} : vector<4x8xi32> to vector<4x1xi32>
    %23 = vector.broadcast %22 : vector<4x1xi32> to vector<4x8xi32>
    %24 = vector.broadcast %20 : vector<1x8xi32> to vector<4x8xi32>
    %25 = arith.cmpi eq, %23, %24 : vector<4x8xi32>
    %26 = arith.extui %25 : vector<4x8xi1> to vector<4x8xi32>
    %27 = arith.sitofp %26 : vector<4x8xi32> to vector<4x8xf32>
    %cst_22 = arith.constant dense<0.000000e+00> : vector<4x96xf32>
    %28 = tpu.matmul %27, %17, %cst_22 {dimension_numbers = #tpu.dot_dimension_numbers<[1], [0], [0], [1], [0, 0, 1, 1], [], []>} : vector<4x8xf32>, vector<8x96xf32>, vector<4x96xf32> -> vector<4x96xf32>
    %cst_23 = arith.constant dense<0.000000e+00> : vector<4x96xf32>
    %29 = tpu.matmul %21, %18, %cst_23 {dimension_numbers = #tpu.dot_dimension_numbers<[1], [0], [0], [1], [0, 0, 1, 1], [], []>} : vector<4x32xf32>, vector<32x96xf32>, vector<4x96xf32> -> vector<4x96xf32>
    %30 = vector.broadcast %19 : vector<1x96xf32> to vector<4x96xf32>
    %31 = arith.addf %29, %30 : vector<4x96xf32>
    %32 = vector.extract_strided_slice %28 {offsets = [0, 0], sizes = [4, 32], strides = [1, 1]} : vector<4x96xf32> to vector<4x32xf32>
    %33 = vector.extract_strided_slice %31 {offsets = [0, 0], sizes = [4, 32], strides = [1, 1]} : vector<4x96xf32> to vector<4x32xf32>
    %34 = arith.addf %32, %33 : vector<4x32xf32>
    %35 = arith.negf %34 : vector<4x32xf32>
    %36 = math.exp %35 : vector<4x32xf32>
    %cst_24 = arith.constant 1.000000e+00 : f32
    %37 = vector.broadcast %cst_24 : f32 to vector<4x32xf32>
    %38 = arith.addf %37, %36 : vector<4x32xf32>
    %39 = arith.divf %37, %38 : vector<4x32xf32>
    %40 = vector.extract_strided_slice %28 {offsets = [0, 32], sizes = [4, 32], strides = [1, 1]} : vector<4x96xf32> to vector<4x32xf32>
    %41 = vector.extract_strided_slice %31 {offsets = [0, 32], sizes = [4, 32], strides = [1, 1]} : vector<4x96xf32> to vector<4x32xf32>
    %42 = arith.addf %40, %41 : vector<4x32xf32>
    %43 = arith.negf %42 : vector<4x32xf32>
    %44 = math.exp %43 : vector<4x32xf32>
    %cst_25 = arith.constant 1.000000e+00 : f32
    %45 = vector.broadcast %cst_25 : f32 to vector<4x32xf32>
    %46 = arith.addf %45, %44 : vector<4x32xf32>
    %47 = arith.divf %45, %46 : vector<4x32xf32>
    %48 = vector.extract_strided_slice %28 {offsets = [0, 64], sizes = [4, 32], strides = [1, 1]} : vector<4x96xf32> to vector<4x32xf32>
    %49 = vector.extract_strided_slice %31 {offsets = [0, 64], sizes = [4, 32], strides = [1, 1]} : vector<4x96xf32> to vector<4x32xf32>
    %50 = arith.mulf %39, %49 : vector<4x32xf32>
    %51 = arith.addf %48, %50 : vector<4x32xf32>
    %52 = math.tanh %51 : vector<4x32xf32>
    %cst_26 = arith.constant 1.000000e+00 : f32
    %53 = vector.broadcast %cst_26 : f32 to vector<4x32xf32>
    %54 = arith.subf %53, %47 : vector<4x32xf32>
    %55 = arith.mulf %54, %52 : vector<4x32xf32>
    %56 = arith.mulf %47, %21 : vector<4x32xf32>
    %57 = arith.addf %55, %56 : vector<4x32xf32>
    %58 = vector.extract_strided_slice %1 {offsets = [0, 1], sizes = [4, 1], strides = [1, 1]} : vector<4x8xi32> to vector<4x1xi32>
    %59 = vector.broadcast %58 : vector<4x1xi32> to vector<4x8xi32>
    %60 = vector.broadcast %20 : vector<1x8xi32> to vector<4x8xi32>
    %61 = arith.cmpi eq, %59, %60 : vector<4x8xi32>
    %62 = arith.extui %61 : vector<4x8xi1> to vector<4x8xi32>
    %63 = arith.sitofp %62 : vector<4x8xi32> to vector<4x8xf32>
    %cst_27 = arith.constant dense<0.000000e+00> : vector<4x96xf32>
    %64 = tpu.matmul %63, %17, %cst_27 {dimension_numbers = #tpu.dot_dimension_numbers<[1], [0], [0], [1], [0, 0, 1, 1], [], []>} : vector<4x8xf32>, vector<8x96xf32>, vector<4x96xf32> -> vector<4x96xf32>
    %cst_28 = arith.constant dense<0.000000e+00> : vector<4x96xf32>
    %65 = tpu.matmul %57, %18, %cst_28 {dimension_numbers = #tpu.dot_dimension_numbers<[1], [0], [0], [1], [0, 0, 1, 1], [], []>} : vector<4x32xf32>, vector<32x96xf32>, vector<4x96xf32> -> vector<4x96xf32>
    %66 = vector.broadcast %19 : vector<1x96xf32> to vector<4x96xf32>
    %67 = arith.addf %65, %66 : vector<4x96xf32>
    %68 = vector.extract_strided_slice %64 {offsets = [0, 0], sizes = [4, 32], strides = [1, 1]} : vector<4x96xf32> to vector<4x32xf32>
    %69 = vector.extract_strided_slice %67 {offsets = [0, 0], sizes = [4, 32], strides = [1, 1]} : vector<4x96xf32> to vector<4x32xf32>
    %70 = arith.addf %68, %69 : vector<4x32xf32>
    %71 = arith.negf %70 : vector<4x32xf32>
    %72 = math.exp %71 : vector<4x32xf32>
    %cst_29 = arith.constant 1.000000e+00 : f32
    %73 = vector.broadcast %cst_29 : f32 to vector<4x32xf32>
    %74 = arith.addf %73, %72 : vector<4x32xf32>
    %75 = arith.divf %73, %74 : vector<4x32xf32>
    %76 = vector.extract_strided_slice %64 {offsets = [0, 32], sizes = [4, 32], strides = [1, 1]} : vector<4x96xf32> to vector<4x32xf32>
    %77 = vector.extract_strided_slice %67 {offsets = [0, 32], sizes = [4, 32], strides = [1, 1]} : vector<4x96xf32> to vector<4x32xf32>
    %78 = arith.addf %76, %77 : vector<4x32xf32>
    %79 = arith.negf %78 : vector<4x32xf32>
    %80 = math.exp %79 : vector<4x32xf32>
    %cst_30 = arith.constant 1.000000e+00 : f32
    %81 = vector.broadcast %cst_30 : f32 to vector<4x32xf32>
    %82 = arith.addf %81, %80 : vector<4x32xf32>
    %83 = arith.divf %81, %82 : vector<4x32xf32>
    %84 = vector.extract_strided_slice %64 {offsets = [0, 64], sizes = [4, 32], strides = [1, 1]} : vector<4x96xf32> to vector<4x32xf32>
    %85 = vector.extract_strided_slice %67 {offsets = [0, 64], sizes = [4, 32], strides = [1, 1]} : vector<4x96xf32> to vector<4x32xf32>
    %86 = arith.mulf %75, %85 : vector<4x32xf32>
    %87 = arith.addf %84, %86 : vector<4x32xf32>
    %88 = math.tanh %87 : vector<4x32xf32>
    %cst_31 = arith.constant 1.000000e+00 : f32
    %89 = vector.broadcast %cst_31 : f32 to vector<4x32xf32>
    %90 = arith.subf %89, %83 : vector<4x32xf32>
    %91 = arith.mulf %90, %88 : vector<4x32xf32>
    %92 = arith.mulf %83, %57 : vector<4x32xf32>
    %93 = arith.addf %91, %92 : vector<4x32xf32>
    %94 = vector.extract_strided_slice %1 {offsets = [0, 2], sizes = [4, 1], strides = [1, 1]} : vector<4x8xi32> to vector<4x1xi32>
    %95 = vector.broadcast %94 : vector<4x1xi32> to vector<4x8xi32>
    %96 = vector.broadcast %20 : vector<1x8xi32> to vector<4x8xi32>
    %97 = arith.cmpi eq, %95, %96 : vector<4x8xi32>
    %98 = arith.extui %97 : vector<4x8xi1> to vector<4x8xi32>
    %99 = arith.sitofp %98 : vector<4x8xi32> to vector<4x8xf32>
    %cst_32 = arith.constant dense<0.000000e+00> : vector<4x96xf32>
    %100 = tpu.matmul %99, %17, %cst_32 {dimension_numbers = #tpu.dot_dimension_numbers<[1], [0], [0], [1], [0, 0, 1, 1], [], []>} : vector<4x8xf32>, vector<8x96xf32>, vector<4x96xf32> -> vector<4x96xf32>
    %cst_33 = arith.constant dense<0.000000e+00> : vector<4x96xf32>
    %101 = tpu.matmul %93, %18, %cst_33 {dimension_numbers = #tpu.dot_dimension_numbers<[1], [0], [0], [1], [0, 0, 1, 1], [], []>} : vector<4x32xf32>, vector<32x96xf32>, vector<4x96xf32> -> vector<4x96xf32>
    %102 = vector.broadcast %19 : vector<1x96xf32> to vector<4x96xf32>
    %103 = arith.addf %101, %102 : vector<4x96xf32>
    %104 = vector.extract_strided_slice %100 {offsets = [0, 0], sizes = [4, 32], strides = [1, 1]} : vector<4x96xf32> to vector<4x32xf32>
    %105 = vector.extract_strided_slice %103 {offsets = [0, 0], sizes = [4, 32], strides = [1, 1]} : vector<4x96xf32> to vector<4x32xf32>
    %106 = arith.addf %104, %105 : vector<4x32xf32>
    %107 = arith.negf %106 : vector<4x32xf32>
    %108 = math.exp %107 : vector<4x32xf32>
    %cst_34 = arith.constant 1.000000e+00 : f32
    %109 = vector.broadcast %cst_34 : f32 to vector<4x32xf32>
    %110 = arith.addf %109, %108 : vector<4x32xf32>
    %111 = arith.divf %109, %110 : vector<4x32xf32>
    %112 = vector.extract_strided_slice %100 {offsets = [0, 32], sizes = [4, 32], strides = [1, 1]} : vector<4x96xf32> to vector<4x32xf32>
    %113 = vector.extract_strided_slice %103 {offsets = [0, 32], sizes = [4, 32], strides = [1, 1]} : vector<4x96xf32> to vector<4x32xf32>
    %114 = arith.addf %112, %113 : vector<4x32xf32>
    %115 = arith.negf %114 : vector<4x32xf32>
    %116 = math.exp %115 : vector<4x32xf32>
    %cst_35 = arith.constant 1.000000e+00 : f32
    %117 = vector.broadcast %cst_35 : f32 to vector<4x32xf32>
    %118 = arith.addf %117, %116 : vector<4x32xf32>
    %119 = arith.divf %117, %118 : vector<4x32xf32>
    %120 = vector.extract_strided_slice %100 {offsets = [0, 64], sizes = [4, 32], strides = [1, 1]} : vector<4x96xf32> to vector<4x32xf32>
    %121 = vector.extract_strided_slice %103 {offsets = [0, 64], sizes = [4, 32], strides = [1, 1]} : vector<4x96xf32> to vector<4x32xf32>
    %122 = arith.mulf %111, %121 : vector<4x32xf32>
    %123 = arith.addf %120, %122 : vector<4x32xf32>
    %124 = math.tanh %123 : vector<4x32xf32>
    %cst_36 = arith.constant 1.000000e+00 : f32
    %125 = vector.broadcast %cst_36 : f32 to vector<4x32xf32>
    %126 = arith.subf %125, %119 : vector<4x32xf32>
    %127 = arith.mulf %126, %124 : vector<4x32xf32>
    %128 = arith.mulf %119, %93 : vector<4x32xf32>
    %129 = arith.addf %127, %128 : vector<4x32xf32>
    %130 = vector.extract_strided_slice %1 {offsets = [0, 3], sizes = [4, 1], strides = [1, 1]} : vector<4x8xi32> to vector<4x1xi32>
    %131 = vector.broadcast %130 : vector<4x1xi32> to vector<4x8xi32>
    %132 = vector.broadcast %20 : vector<1x8xi32> to vector<4x8xi32>
    %133 = arith.cmpi eq, %131, %132 : vector<4x8xi32>
    %134 = arith.extui %133 : vector<4x8xi1> to vector<4x8xi32>
    %135 = arith.sitofp %134 : vector<4x8xi32> to vector<4x8xf32>
    %cst_37 = arith.constant dense<0.000000e+00> : vector<4x96xf32>
    %136 = tpu.matmul %135, %17, %cst_37 {dimension_numbers = #tpu.dot_dimension_numbers<[1], [0], [0], [1], [0, 0, 1, 1], [], []>} : vector<4x8xf32>, vector<8x96xf32>, vector<4x96xf32> -> vector<4x96xf32>
    %cst_38 = arith.constant dense<0.000000e+00> : vector<4x96xf32>
    %137 = tpu.matmul %129, %18, %cst_38 {dimension_numbers = #tpu.dot_dimension_numbers<[1], [0], [0], [1], [0, 0, 1, 1], [], []>} : vector<4x32xf32>, vector<32x96xf32>, vector<4x96xf32> -> vector<4x96xf32>
    %138 = vector.broadcast %19 : vector<1x96xf32> to vector<4x96xf32>
    %139 = arith.addf %137, %138 : vector<4x96xf32>
    %140 = vector.extract_strided_slice %136 {offsets = [0, 0], sizes = [4, 32], strides = [1, 1]} : vector<4x96xf32> to vector<4x32xf32>
    %141 = vector.extract_strided_slice %139 {offsets = [0, 0], sizes = [4, 32], strides = [1, 1]} : vector<4x96xf32> to vector<4x32xf32>
    %142 = arith.addf %140, %141 : vector<4x32xf32>
    %143 = arith.negf %142 : vector<4x32xf32>
    %144 = math.exp %143 : vector<4x32xf32>
    %cst_39 = arith.constant 1.000000e+00 : f32
    %145 = vector.broadcast %cst_39 : f32 to vector<4x32xf32>
    %146 = arith.addf %145, %144 : vector<4x32xf32>
    %147 = arith.divf %145, %146 : vector<4x32xf32>
    %148 = vector.extract_strided_slice %136 {offsets = [0, 32], sizes = [4, 32], strides = [1, 1]} : vector<4x96xf32> to vector<4x32xf32>
    %149 = vector.extract_strided_slice %139 {offsets = [0, 32], sizes = [4, 32], strides = [1, 1]} : vector<4x96xf32> to vector<4x32xf32>
    %150 = arith.addf %148, %149 : vector<4x32xf32>
    %151 = arith.negf %150 : vector<4x32xf32>
    %152 = math.exp %151 : vector<4x32xf32>
    %cst_40 = arith.constant 1.000000e+00 : f32
    %153 = vector.broadcast %cst_40 : f32 to vector<4x32xf32>
    %154 = arith.addf %153, %152 : vector<4x32xf32>
    %155 = arith.divf %153, %154 : vector<4x32xf32>
    %156 = vector.extract_strided_slice %136 {offsets = [0, 64], sizes = [4, 32], strides = [1, 1]} : vector<4x96xf32> to vector<4x32xf32>
    %157 = vector.extract_strided_slice %139 {offsets = [0, 64], sizes = [4, 32], strides = [1, 1]} : vector<4x96xf32> to vector<4x32xf32>
    %158 = arith.mulf %147, %157 : vector<4x32xf32>
    %159 = arith.addf %156, %158 : vector<4x32xf32>
    %160 = math.tanh %159 : vector<4x32xf32>
    %cst_41 = arith.constant 1.000000e+00 : f32
    %161 = vector.broadcast %cst_41 : f32 to vector<4x32xf32>
    %162 = arith.subf %161, %155 : vector<4x32xf32>
    %163 = arith.mulf %162, %160 : vector<4x32xf32>
    %164 = arith.mulf %155, %129 : vector<4x32xf32>
    %165 = arith.addf %163, %164 : vector<4x32xf32>
    %166 = vector.extract_strided_slice %1 {offsets = [0, 4], sizes = [4, 1], strides = [1, 1]} : vector<4x8xi32> to vector<4x1xi32>
    %167 = vector.broadcast %166 : vector<4x1xi32> to vector<4x8xi32>
    %168 = vector.broadcast %20 : vector<1x8xi32> to vector<4x8xi32>
    %169 = arith.cmpi eq, %167, %168 : vector<4x8xi32>
    %170 = arith.extui %169 : vector<4x8xi1> to vector<4x8xi32>
    %171 = arith.sitofp %170 : vector<4x8xi32> to vector<4x8xf32>
    %cst_42 = arith.constant dense<0.000000e+00> : vector<4x96xf32>
    %172 = tpu.matmul %171, %17, %cst_42 {dimension_numbers = #tpu.dot_dimension_numbers<[1], [0], [0], [1], [0, 0, 1, 1], [], []>} : vector<4x8xf32>, vector<8x96xf32>, vector<4x96xf32> -> vector<4x96xf32>
    %cst_43 = arith.constant dense<0.000000e+00> : vector<4x96xf32>
    %173 = tpu.matmul %165, %18, %cst_43 {dimension_numbers = #tpu.dot_dimension_numbers<[1], [0], [0], [1], [0, 0, 1, 1], [], []>} : vector<4x32xf32>, vector<32x96xf32>, vector<4x96xf32> -> vector<4x96xf32>
    %174 = vector.broadcast %19 : vector<1x96xf32> to vector<4x96xf32>
    %175 = arith.addf %173, %174 : vector<4x96xf32>
    %176 = vector.extract_strided_slice %172 {offsets = [0, 0], sizes = [4, 32], strides = [1, 1]} : vector<4x96xf32> to vector<4x32xf32>
    %177 = vector.extract_strided_slice %175 {offsets = [0, 0], sizes = [4, 32], strides = [1, 1]} : vector<4x96xf32> to vector<4x32xf32>
    %178 = arith.addf %176, %177 : vector<4x32xf32>
    %179 = arith.negf %178 : vector<4x32xf32>
    %180 = math.exp %179 : vector<4x32xf32>
    %cst_44 = arith.constant 1.000000e+00 : f32
    %181 = vector.broadcast %cst_44 : f32 to vector<4x32xf32>
    %182 = arith.addf %181, %180 : vector<4x32xf32>
    %183 = arith.divf %181, %182 : vector<4x32xf32>
    %184 = vector.extract_strided_slice %172 {offsets = [0, 32], sizes = [4, 32], strides = [1, 1]} : vector<4x96xf32> to vector<4x32xf32>
    %185 = vector.extract_strided_slice %175 {offsets = [0, 32], sizes = [4, 32], strides = [1, 1]} : vector<4x96xf32> to vector<4x32xf32>
    %186 = arith.addf %184, %185 : vector<4x32xf32>
    %187 = arith.negf %186 : vector<4x32xf32>
    %188 = math.exp %187 : vector<4x32xf32>
    %cst_45 = arith.constant 1.000000e+00 : f32
    %189 = vector.broadcast %cst_45 : f32 to vector<4x32xf32>
    %190 = arith.addf %189, %188 : vector<4x32xf32>
    %191 = arith.divf %189, %190 : vector<4x32xf32>
    %192 = vector.extract_strided_slice %172 {offsets = [0, 64], sizes = [4, 32], strides = [1, 1]} : vector<4x96xf32> to vector<4x32xf32>
    %193 = vector.extract_strided_slice %175 {offsets = [0, 64], sizes = [4, 32], strides = [1, 1]} : vector<4x96xf32> to vector<4x32xf32>
    %194 = arith.mulf %183, %193 : vector<4x32xf32>
    %195 = arith.addf %192, %194 : vector<4x32xf32>
    %196 = math.tanh %195 : vector<4x32xf32>
    %cst_46 = arith.constant 1.000000e+00 : f32
    %197 = vector.broadcast %cst_46 : f32 to vector<4x32xf32>
    %198 = arith.subf %197, %191 : vector<4x32xf32>
    %199 = arith.mulf %198, %196 : vector<4x32xf32>
    %200 = arith.mulf %191, %165 : vector<4x32xf32>
    %201 = arith.addf %199, %200 : vector<4x32xf32>
    %202 = vector.extract_strided_slice %1 {offsets = [0, 5], sizes = [4, 1], strides = [1, 1]} : vector<4x8xi32> to vector<4x1xi32>
    %203 = vector.broadcast %202 : vector<4x1xi32> to vector<4x8xi32>
    %204 = vector.broadcast %20 : vector<1x8xi32> to vector<4x8xi32>
    %205 = arith.cmpi eq, %203, %204 : vector<4x8xi32>
    %206 = arith.extui %205 : vector<4x8xi1> to vector<4x8xi32>
    %207 = arith.sitofp %206 : vector<4x8xi32> to vector<4x8xf32>
    %cst_47 = arith.constant dense<0.000000e+00> : vector<4x96xf32>
    %208 = tpu.matmul %207, %17, %cst_47 {dimension_numbers = #tpu.dot_dimension_numbers<[1], [0], [0], [1], [0, 0, 1, 1], [], []>} : vector<4x8xf32>, vector<8x96xf32>, vector<4x96xf32> -> vector<4x96xf32>
    %cst_48 = arith.constant dense<0.000000e+00> : vector<4x96xf32>
    %209 = tpu.matmul %201, %18, %cst_48 {dimension_numbers = #tpu.dot_dimension_numbers<[1], [0], [0], [1], [0, 0, 1, 1], [], []>} : vector<4x32xf32>, vector<32x96xf32>, vector<4x96xf32> -> vector<4x96xf32>
    %210 = vector.broadcast %19 : vector<1x96xf32> to vector<4x96xf32>
    %211 = arith.addf %209, %210 : vector<4x96xf32>
    %212 = vector.extract_strided_slice %208 {offsets = [0, 0], sizes = [4, 32], strides = [1, 1]} : vector<4x96xf32> to vector<4x32xf32>
    %213 = vector.extract_strided_slice %211 {offsets = [0, 0], sizes = [4, 32], strides = [1, 1]} : vector<4x96xf32> to vector<4x32xf32>
    %214 = arith.addf %212, %213 : vector<4x32xf32>
    %215 = arith.negf %214 : vector<4x32xf32>
    %216 = math.exp %215 : vector<4x32xf32>
    %cst_49 = arith.constant 1.000000e+00 : f32
    %217 = vector.broadcast %cst_49 : f32 to vector<4x32xf32>
    %218 = arith.addf %217, %216 : vector<4x32xf32>
    %219 = arith.divf %217, %218 : vector<4x32xf32>
    %220 = vector.extract_strided_slice %208 {offsets = [0, 32], sizes = [4, 32], strides = [1, 1]} : vector<4x96xf32> to vector<4x32xf32>
    %221 = vector.extract_strided_slice %211 {offsets = [0, 32], sizes = [4, 32], strides = [1, 1]} : vector<4x96xf32> to vector<4x32xf32>
    %222 = arith.addf %220, %221 : vector<4x32xf32>
    %223 = arith.negf %222 : vector<4x32xf32>
    %224 = math.exp %223 : vector<4x32xf32>
    %cst_50 = arith.constant 1.000000e+00 : f32
    %225 = vector.broadcast %cst_50 : f32 to vector<4x32xf32>
    %226 = arith.addf %225, %224 : vector<4x32xf32>
    %227 = arith.divf %225, %226 : vector<4x32xf32>
    %228 = vector.extract_strided_slice %208 {offsets = [0, 64], sizes = [4, 32], strides = [1, 1]} : vector<4x96xf32> to vector<4x32xf32>
    %229 = vector.extract_strided_slice %211 {offsets = [0, 64], sizes = [4, 32], strides = [1, 1]} : vector<4x96xf32> to vector<4x32xf32>
    %230 = arith.mulf %219, %229 : vector<4x32xf32>
    %231 = arith.addf %228, %230 : vector<4x32xf32>
    %232 = math.tanh %231 : vector<4x32xf32>
    %cst_51 = arith.constant 1.000000e+00 : f32
    %233 = vector.broadcast %cst_51 : f32 to vector<4x32xf32>
    %234 = arith.subf %233, %227 : vector<4x32xf32>
    %235 = arith.mulf %234, %232 : vector<4x32xf32>
    %236 = arith.mulf %227, %201 : vector<4x32xf32>
    %237 = arith.addf %235, %236 : vector<4x32xf32>
    %238 = vector.extract_strided_slice %1 {offsets = [0, 6], sizes = [4, 1], strides = [1, 1]} : vector<4x8xi32> to vector<4x1xi32>
    %239 = vector.broadcast %238 : vector<4x1xi32> to vector<4x8xi32>
    %240 = vector.broadcast %20 : vector<1x8xi32> to vector<4x8xi32>
    %241 = arith.cmpi eq, %239, %240 : vector<4x8xi32>
    %242 = arith.extui %241 : vector<4x8xi1> to vector<4x8xi32>
    %243 = arith.sitofp %242 : vector<4x8xi32> to vector<4x8xf32>
    %cst_52 = arith.constant dense<0.000000e+00> : vector<4x96xf32>
    %244 = tpu.matmul %243, %17, %cst_52 {dimension_numbers = #tpu.dot_dimension_numbers<[1], [0], [0], [1], [0, 0, 1, 1], [], []>} : vector<4x8xf32>, vector<8x96xf32>, vector<4x96xf32> -> vector<4x96xf32>
    %cst_53 = arith.constant dense<0.000000e+00> : vector<4x96xf32>
    %245 = tpu.matmul %237, %18, %cst_53 {dimension_numbers = #tpu.dot_dimension_numbers<[1], [0], [0], [1], [0, 0, 1, 1], [], []>} : vector<4x32xf32>, vector<32x96xf32>, vector<4x96xf32> -> vector<4x96xf32>
    %246 = vector.broadcast %19 : vector<1x96xf32> to vector<4x96xf32>
    %247 = arith.addf %245, %246 : vector<4x96xf32>
    %248 = vector.extract_strided_slice %244 {offsets = [0, 0], sizes = [4, 32], strides = [1, 1]} : vector<4x96xf32> to vector<4x32xf32>
    %249 = vector.extract_strided_slice %247 {offsets = [0, 0], sizes = [4, 32], strides = [1, 1]} : vector<4x96xf32> to vector<4x32xf32>
    %250 = arith.addf %248, %249 : vector<4x32xf32>
    %251 = arith.negf %250 : vector<4x32xf32>
    %252 = math.exp %251 : vector<4x32xf32>
    %cst_54 = arith.constant 1.000000e+00 : f32
    %253 = vector.broadcast %cst_54 : f32 to vector<4x32xf32>
    %254 = arith.addf %253, %252 : vector<4x32xf32>
    %255 = arith.divf %253, %254 : vector<4x32xf32>
    %256 = vector.extract_strided_slice %244 {offsets = [0, 32], sizes = [4, 32], strides = [1, 1]} : vector<4x96xf32> to vector<4x32xf32>
    %257 = vector.extract_strided_slice %247 {offsets = [0, 32], sizes = [4, 32], strides = [1, 1]} : vector<4x96xf32> to vector<4x32xf32>
    %258 = arith.addf %256, %257 : vector<4x32xf32>
    %259 = arith.negf %258 : vector<4x32xf32>
    %260 = math.exp %259 : vector<4x32xf32>
    %cst_55 = arith.constant 1.000000e+00 : f32
    %261 = vector.broadcast %cst_55 : f32 to vector<4x32xf32>
    %262 = arith.addf %261, %260 : vector<4x32xf32>
    %263 = arith.divf %261, %262 : vector<4x32xf32>
    %264 = vector.extract_strided_slice %244 {offsets = [0, 64], sizes = [4, 32], strides = [1, 1]} : vector<4x96xf32> to vector<4x32xf32>
    %265 = vector.extract_strided_slice %247 {offsets = [0, 64], sizes = [4, 32], strides = [1, 1]} : vector<4x96xf32> to vector<4x32xf32>
    %266 = arith.mulf %255, %265 : vector<4x32xf32>
    %267 = arith.addf %264, %266 : vector<4x32xf32>
    %268 = math.tanh %267 : vector<4x32xf32>
    %cst_56 = arith.constant 1.000000e+00 : f32
    %269 = vector.broadcast %cst_56 : f32 to vector<4x32xf32>
    %270 = arith.subf %269, %263 : vector<4x32xf32>
    %271 = arith.mulf %270, %268 : vector<4x32xf32>
    %272 = arith.mulf %263, %237 : vector<4x32xf32>
    %273 = arith.addf %271, %272 : vector<4x32xf32>
    %274 = vector.extract_strided_slice %1 {offsets = [0, 7], sizes = [4, 1], strides = [1, 1]} : vector<4x8xi32> to vector<4x1xi32>
    %275 = vector.broadcast %274 : vector<4x1xi32> to vector<4x8xi32>
    %276 = vector.broadcast %20 : vector<1x8xi32> to vector<4x8xi32>
    %277 = arith.cmpi eq, %275, %276 : vector<4x8xi32>
    %278 = arith.extui %277 : vector<4x8xi1> to vector<4x8xi32>
    %279 = arith.sitofp %278 : vector<4x8xi32> to vector<4x8xf32>
    %cst_57 = arith.constant dense<0.000000e+00> : vector<4x96xf32>
    %280 = tpu.matmul %279, %17, %cst_57 {dimension_numbers = #tpu.dot_dimension_numbers<[1], [0], [0], [1], [0, 0, 1, 1], [], []>} : vector<4x8xf32>, vector<8x96xf32>, vector<4x96xf32> -> vector<4x96xf32>
    %cst_58 = arith.constant dense<0.000000e+00> : vector<4x96xf32>
    %281 = tpu.matmul %273, %18, %cst_58 {dimension_numbers = #tpu.dot_dimension_numbers<[1], [0], [0], [1], [0, 0, 1, 1], [], []>} : vector<4x32xf32>, vector<32x96xf32>, vector<4x96xf32> -> vector<4x96xf32>
    %282 = vector.broadcast %19 : vector<1x96xf32> to vector<4x96xf32>
    %283 = arith.addf %281, %282 : vector<4x96xf32>
    %284 = vector.extract_strided_slice %280 {offsets = [0, 0], sizes = [4, 32], strides = [1, 1]} : vector<4x96xf32> to vector<4x32xf32>
    %285 = vector.extract_strided_slice %283 {offsets = [0, 0], sizes = [4, 32], strides = [1, 1]} : vector<4x96xf32> to vector<4x32xf32>
    %286 = arith.addf %284, %285 : vector<4x32xf32>
    %287 = arith.negf %286 : vector<4x32xf32>
    %288 = math.exp %287 : vector<4x32xf32>
    %cst_59 = arith.constant 1.000000e+00 : f32
    %289 = vector.broadcast %cst_59 : f32 to vector<4x32xf32>
    %290 = arith.addf %289, %288 : vector<4x32xf32>
    %291 = arith.divf %289, %290 : vector<4x32xf32>
    %292 = vector.extract_strided_slice %280 {offsets = [0, 32], sizes = [4, 32], strides = [1, 1]} : vector<4x96xf32> to vector<4x32xf32>
    %293 = vector.extract_strided_slice %283 {offsets = [0, 32], sizes = [4, 32], strides = [1, 1]} : vector<4x96xf32> to vector<4x32xf32>
    %294 = arith.addf %292, %293 : vector<4x32xf32>
    %295 = arith.negf %294 : vector<4x32xf32>
    %296 = math.exp %295 : vector<4x32xf32>
    %cst_60 = arith.constant 1.000000e+00 : f32
    %297 = vector.broadcast %cst_60 : f32 to vector<4x32xf32>
    %298 = arith.addf %297, %296 : vector<4x32xf32>
    %299 = arith.divf %297, %298 : vector<4x32xf32>
    %300 = vector.extract_strided_slice %280 {offsets = [0, 64], sizes = [4, 32], strides = [1, 1]} : vector<4x96xf32> to vector<4x32xf32>
    %301 = vector.extract_strided_slice %283 {offsets = [0, 64], sizes = [4, 32], strides = [1, 1]} : vector<4x96xf32> to vector<4x32xf32>
    %302 = arith.mulf %291, %301 : vector<4x32xf32>
    %303 = arith.addf %300, %302 : vector<4x32xf32>
    %304 = math.tanh %303 : vector<4x32xf32>
    %cst_61 = arith.constant 1.000000e+00 : f32
    %305 = vector.broadcast %cst_61 : f32 to vector<4x32xf32>
    %306 = arith.subf %305, %299 : vector<4x32xf32>
    %307 = arith.mulf %306, %304 : vector<4x32xf32>
    %308 = arith.mulf %299, %273 : vector<4x32xf32>
    %309 = arith.addf %307, %308 : vector<4x32xf32>
    %c0_62 = arith.constant 0 : index
    %c0_63 = arith.constant 0 : index
    %310 = vector.load %arg12[%c0_62, %c0_63] : memref<32x32xf32, #tpu.memory_space<vmem>>, vector<32x32xf32>
    %cst_64 = arith.constant dense<0.000000e+00> : vector<4x32xf32>
    %311 = tpu.matmul %309, %310, %cst_64 {dimension_numbers = #tpu.dot_dimension_numbers<[1], [0], [0], [1], [0, 0, 1, 1], [], []>} : vector<4x32xf32>, vector<32x32xf32>, vector<4x32xf32> -> vector<4x32xf32>
    %c0_65 = arith.constant 0 : index
    %c0_66 = arith.constant 0 : index
    %312 = vector.load %arg13[%c0_65, %c0_66] : memref<1x32xf32, #tpu.memory_space<vmem>>, vector<1x32xf32>
    %313 = vector.broadcast %312 : vector<1x32xf32> to vector<4x32xf32>
    %314 = arith.addf %311, %313 : vector<4x32xf32>
    %c0_67 = arith.constant 0 : index
    %c0_68 = arith.constant 0 : index
    %315 = vector.load %arg14[%c0_67, %c0_68] : memref<1x32xf32, #tpu.memory_space<vmem>>, vector<1x32xf32>
    %c0_69 = arith.constant 0 : index
    %c0_70 = arith.constant 0 : index
    %316 = vector.load %arg10[%c0_69, %c0_70] : memref<32x32xf32, #tpu.memory_space<vmem>>, vector<32x32xf32>
    %cst_71 = arith.constant dense<0.000000e+00> : vector<4x32xf32>
    %317 = tpu.matmul %57, %316, %cst_71 {dimension_numbers = #tpu.dot_dimension_numbers<[1], [0], [0], [1], [0, 0, 1, 1], [], []>} : vector<4x32xf32>, vector<32x32xf32>, vector<4x32xf32> -> vector<4x32xf32>
    %c0_72 = arith.constant 0 : index
    %c0_73 = arith.constant 0 : index
    %318 = vector.load %arg11[%c0_72, %c0_73] : memref<1x32xf32, #tpu.memory_space<vmem>>, vector<1x32xf32>
    %319 = vector.broadcast %318 : vector<1x32xf32> to vector<4x32xf32>
    %320 = arith.addf %317, %319 : vector<4x32xf32>
    %321 = arith.addf %320, %314 : vector<4x32xf32>
    %322 = math.tanh %321 : vector<4x32xf32>
    %323 = vector.broadcast %315 : vector<1x32xf32> to vector<4x32xf32>
    %324 = arith.mulf %322, %323 : vector<4x32xf32>
    %cst_74 = arith.constant dense<0.000000e+00> : vector<4xf32>
    %325 = vector.multi_reduction <add>, %324, %cst_74 [1] : vector<4x32xf32> to vector<4xf32>
    %326 = vector.shape_cast %325 : vector<4xf32> to vector<4x1xf32>
    %c0_75 = arith.constant 0 : index
    %c0_76 = arith.constant 0 : index
    %327 = vector.load %arg15[%c0_75, %c0_76] : memref<1x1xf32, #tpu.memory_space<vmem>>, vector<1x1xf32>
    %328 = vector.broadcast %327 : vector<1x1xf32> to vector<4x1xf32>
    %329 = arith.addf %326, %328 : vector<4x1xf32>
    %c0_77 = arith.constant 0 : index
    %c0_78 = arith.constant 0 : index
    %330 = vector.load %arg10[%c0_77, %c0_78] : memref<32x32xf32, #tpu.memory_space<vmem>>, vector<32x32xf32>
    %cst_79 = arith.constant dense<0.000000e+00> : vector<4x32xf32>
    %331 = tpu.matmul %93, %330, %cst_79 {dimension_numbers = #tpu.dot_dimension_numbers<[1], [0], [0], [1], [0, 0, 1, 1], [], []>} : vector<4x32xf32>, vector<32x32xf32>, vector<4x32xf32> -> vector<4x32xf32>
    %c0_80 = arith.constant 0 : index
    %c0_81 = arith.constant 0 : index
    %332 = vector.load %arg11[%c0_80, %c0_81] : memref<1x32xf32, #tpu.memory_space<vmem>>, vector<1x32xf32>
    %333 = vector.broadcast %332 : vector<1x32xf32> to vector<4x32xf32>
    %334 = arith.addf %331, %333 : vector<4x32xf32>
    %335 = arith.addf %334, %314 : vector<4x32xf32>
    %336 = math.tanh %335 : vector<4x32xf32>
    %337 = vector.broadcast %315 : vector<1x32xf32> to vector<4x32xf32>
    %338 = arith.mulf %336, %337 : vector<4x32xf32>
    %cst_82 = arith.constant dense<0.000000e+00> : vector<4xf32>
    %339 = vector.multi_reduction <add>, %338, %cst_82 [1] : vector<4x32xf32> to vector<4xf32>
    %340 = vector.shape_cast %339 : vector<4xf32> to vector<4x1xf32>
    %c0_83 = arith.constant 0 : index
    %c0_84 = arith.constant 0 : index
    %341 = vector.load %arg15[%c0_83, %c0_84] : memref<1x1xf32, #tpu.memory_space<vmem>>, vector<1x1xf32>
    %342 = vector.broadcast %341 : vector<1x1xf32> to vector<4x1xf32>
    %343 = arith.addf %340, %342 : vector<4x1xf32>
    %c0_85 = arith.constant 0 : index
    %c0_86 = arith.constant 0 : index
    %344 = vector.load %arg10[%c0_85, %c0_86] : memref<32x32xf32, #tpu.memory_space<vmem>>, vector<32x32xf32>
    %cst_87 = arith.constant dense<0.000000e+00> : vector<4x32xf32>
    %345 = tpu.matmul %129, %344, %cst_87 {dimension_numbers = #tpu.dot_dimension_numbers<[1], [0], [0], [1], [0, 0, 1, 1], [], []>} : vector<4x32xf32>, vector<32x32xf32>, vector<4x32xf32> -> vector<4x32xf32>
    %c0_88 = arith.constant 0 : index
    %c0_89 = arith.constant 0 : index
    %346 = vector.load %arg11[%c0_88, %c0_89] : memref<1x32xf32, #tpu.memory_space<vmem>>, vector<1x32xf32>
    %347 = vector.broadcast %346 : vector<1x32xf32> to vector<4x32xf32>
    %348 = arith.addf %345, %347 : vector<4x32xf32>
    %349 = arith.addf %348, %314 : vector<4x32xf32>
    %350 = math.tanh %349 : vector<4x32xf32>
    %351 = vector.broadcast %315 : vector<1x32xf32> to vector<4x32xf32>
    %352 = arith.mulf %350, %351 : vector<4x32xf32>
    %cst_90 = arith.constant dense<0.000000e+00> : vector<4xf32>
    %353 = vector.multi_reduction <add>, %352, %cst_90 [1] : vector<4x32xf32> to vector<4xf32>
    %354 = vector.shape_cast %353 : vector<4xf32> to vector<4x1xf32>
    %c0_91 = arith.constant 0 : index
    %c0_92 = arith.constant 0 : index
    %355 = vector.load %arg15[%c0_91, %c0_92] : memref<1x1xf32, #tpu.memory_space<vmem>>, vector<1x1xf32>
    %356 = vector.broadcast %355 : vector<1x1xf32> to vector<4x1xf32>
    %357 = arith.addf %354, %356 : vector<4x1xf32>
    %c0_93 = arith.constant 0 : index
    %c0_94 = arith.constant 0 : index
    %358 = vector.load %arg10[%c0_93, %c0_94] : memref<32x32xf32, #tpu.memory_space<vmem>>, vector<32x32xf32>
    %cst_95 = arith.constant dense<0.000000e+00> : vector<4x32xf32>
    %359 = tpu.matmul %165, %358, %cst_95 {dimension_numbers = #tpu.dot_dimension_numbers<[1], [0], [0], [1], [0, 0, 1, 1], [], []>} : vector<4x32xf32>, vector<32x32xf32>, vector<4x32xf32> -> vector<4x32xf32>
    %c0_96 = arith.constant 0 : index
    %c0_97 = arith.constant 0 : index
    %360 = vector.load %arg11[%c0_96, %c0_97] : memref<1x32xf32, #tpu.memory_space<vmem>>, vector<1x32xf32>
    %361 = vector.broadcast %360 : vector<1x32xf32> to vector<4x32xf32>
    %362 = arith.addf %359, %361 : vector<4x32xf32>
    %363 = arith.addf %362, %314 : vector<4x32xf32>
    %364 = math.tanh %363 : vector<4x32xf32>
    %365 = vector.broadcast %315 : vector<1x32xf32> to vector<4x32xf32>
    %366 = arith.mulf %364, %365 : vector<4x32xf32>
    %cst_98 = arith.constant dense<0.000000e+00> : vector<4xf32>
    %367 = vector.multi_reduction <add>, %366, %cst_98 [1] : vector<4x32xf32> to vector<4xf32>
    %368 = vector.shape_cast %367 : vector<4xf32> to vector<4x1xf32>
    %c0_99 = arith.constant 0 : index
    %c0_100 = arith.constant 0 : index
    %369 = vector.load %arg15[%c0_99, %c0_100] : memref<1x1xf32, #tpu.memory_space<vmem>>, vector<1x1xf32>
    %370 = vector.broadcast %369 : vector<1x1xf32> to vector<4x1xf32>
    %371 = arith.addf %368, %370 : vector<4x1xf32>
    %c0_101 = arith.constant 0 : index
    %c0_102 = arith.constant 0 : index
    %372 = vector.load %arg10[%c0_101, %c0_102] : memref<32x32xf32, #tpu.memory_space<vmem>>, vector<32x32xf32>
    %cst_103 = arith.constant dense<0.000000e+00> : vector<4x32xf32>
    %373 = tpu.matmul %201, %372, %cst_103 {dimension_numbers = #tpu.dot_dimension_numbers<[1], [0], [0], [1], [0, 0, 1, 1], [], []>} : vector<4x32xf32>, vector<32x32xf32>, vector<4x32xf32> -> vector<4x32xf32>
    %c0_104 = arith.constant 0 : index
    %c0_105 = arith.constant 0 : index
    %374 = vector.load %arg11[%c0_104, %c0_105] : memref<1x32xf32, #tpu.memory_space<vmem>>, vector<1x32xf32>
    %375 = vector.broadcast %374 : vector<1x32xf32> to vector<4x32xf32>
    %376 = arith.addf %373, %375 : vector<4x32xf32>
    %377 = arith.addf %376, %314 : vector<4x32xf32>
    %378 = math.tanh %377 : vector<4x32xf32>
    %379 = vector.broadcast %315 : vector<1x32xf32> to vector<4x32xf32>
    %380 = arith.mulf %378, %379 : vector<4x32xf32>
    %cst_106 = arith.constant dense<0.000000e+00> : vector<4xf32>
    %381 = vector.multi_reduction <add>, %380, %cst_106 [1] : vector<4x32xf32> to vector<4xf32>
    %382 = vector.shape_cast %381 : vector<4xf32> to vector<4x1xf32>
    %c0_107 = arith.constant 0 : index
    %c0_108 = arith.constant 0 : index
    %383 = vector.load %arg15[%c0_107, %c0_108] : memref<1x1xf32, #tpu.memory_space<vmem>>, vector<1x1xf32>
    %384 = vector.broadcast %383 : vector<1x1xf32> to vector<4x1xf32>
    %385 = arith.addf %382, %384 : vector<4x1xf32>
    %c0_109 = arith.constant 0 : index
    %c0_110 = arith.constant 0 : index
    %386 = vector.load %arg10[%c0_109, %c0_110] : memref<32x32xf32, #tpu.memory_space<vmem>>, vector<32x32xf32>
    %cst_111 = arith.constant dense<0.000000e+00> : vector<4x32xf32>
    %387 = tpu.matmul %237, %386, %cst_111 {dimension_numbers = #tpu.dot_dimension_numbers<[1], [0], [0], [1], [0, 0, 1, 1], [], []>} : vector<4x32xf32>, vector<32x32xf32>, vector<4x32xf32> -> vector<4x32xf32>
    %c0_112 = arith.constant 0 : index
    %c0_113 = arith.constant 0 : index
    %388 = vector.load %arg11[%c0_112, %c0_113] : memref<1x32xf32, #tpu.memory_space<vmem>>, vector<1x32xf32>
    %389 = vector.broadcast %388 : vector<1x32xf32> to vector<4x32xf32>
    %390 = arith.addf %387, %389 : vector<4x32xf32>
    %391 = arith.addf %390, %314 : vector<4x32xf32>
    %392 = math.tanh %391 : vector<4x32xf32>
    %393 = vector.broadcast %315 : vector<1x32xf32> to vector<4x32xf32>
    %394 = arith.mulf %392, %393 : vector<4x32xf32>
    %cst_114 = arith.constant dense<0.000000e+00> : vector<4xf32>
    %395 = vector.multi_reduction <add>, %394, %cst_114 [1] : vector<4x32xf32> to vector<4xf32>
    %396 = vector.shape_cast %395 : vector<4xf32> to vector<4x1xf32>
    %c0_115 = arith.constant 0 : index
    %c0_116 = arith.constant 0 : index
    %397 = vector.load %arg15[%c0_115, %c0_116] : memref<1x1xf32, #tpu.memory_space<vmem>>, vector<1x1xf32>
    %398 = vector.broadcast %397 : vector<1x1xf32> to vector<4x1xf32>
    %399 = arith.addf %396, %398 : vector<4x1xf32>
    %c0_117 = arith.constant 0 : index
    %c0_118 = arith.constant 0 : index
    %400 = vector.load %arg10[%c0_117, %c0_118] : memref<32x32xf32, #tpu.memory_space<vmem>>, vector<32x32xf32>
    %cst_119 = arith.constant dense<0.000000e+00> : vector<4x32xf32>
    %401 = tpu.matmul %273, %400, %cst_119 {dimension_numbers = #tpu.dot_dimension_numbers<[1], [0], [0], [1], [0, 0, 1, 1], [], []>} : vector<4x32xf32>, vector<32x32xf32>, vector<4x32xf32> -> vector<4x32xf32>
    %c0_120 = arith.constant 0 : index
    %c0_121 = arith.constant 0 : index
    %402 = vector.load %arg11[%c0_120, %c0_121] : memref<1x32xf32, #tpu.memory_space<vmem>>, vector<1x32xf32>
    %403 = vector.broadcast %402 : vector<1x32xf32> to vector<4x32xf32>
    %404 = arith.addf %401, %403 : vector<4x32xf32>
    %405 = arith.addf %404, %314 : vector<4x32xf32>
    %406 = math.tanh %405 : vector<4x32xf32>
    %407 = vector.broadcast %315 : vector<1x32xf32> to vector<4x32xf32>
    %408 = arith.mulf %406, %407 : vector<4x32xf32>
    %cst_122 = arith.constant dense<0.000000e+00> : vector<4xf32>
    %409 = vector.multi_reduction <add>, %408, %cst_122 [1] : vector<4x32xf32> to vector<4xf32>
    %410 = vector.shape_cast %409 : vector<4xf32> to vector<4x1xf32>
    %c0_123 = arith.constant 0 : index
    %c0_124 = arith.constant 0 : index
    %411 = vector.load %arg15[%c0_123, %c0_124] : memref<1x1xf32, #tpu.memory_space<vmem>>, vector<1x1xf32>
    %412 = vector.broadcast %411 : vector<1x1xf32> to vector<4x1xf32>
    %413 = arith.addf %410, %412 : vector<4x1xf32>
    %c0_125 = arith.constant 0 : index
    %c0_126 = arith.constant 0 : index
    %414 = vector.load %arg10[%c0_125, %c0_126] : memref<32x32xf32, #tpu.memory_space<vmem>>, vector<32x32xf32>
    %cst_127 = arith.constant dense<0.000000e+00> : vector<4x32xf32>
    %415 = tpu.matmul %309, %414, %cst_127 {dimension_numbers = #tpu.dot_dimension_numbers<[1], [0], [0], [1], [0, 0, 1, 1], [], []>} : vector<4x32xf32>, vector<32x32xf32>, vector<4x32xf32> -> vector<4x32xf32>
    %c0_128 = arith.constant 0 : index
    %c0_129 = arith.constant 0 : index
    %416 = vector.load %arg11[%c0_128, %c0_129] : memref<1x32xf32, #tpu.memory_space<vmem>>, vector<1x32xf32>
    %417 = vector.broadcast %416 : vector<1x32xf32> to vector<4x32xf32>
    %418 = arith.addf %415, %417 : vector<4x32xf32>
    %419 = arith.addf %418, %314 : vector<4x32xf32>
    %420 = math.tanh %419 : vector<4x32xf32>
    %421 = vector.broadcast %315 : vector<1x32xf32> to vector<4x32xf32>
    %422 = arith.mulf %420, %421 : vector<4x32xf32>
    %cst_130 = arith.constant dense<0.000000e+00> : vector<4xf32>
    %423 = vector.multi_reduction <add>, %422, %cst_130 [1] : vector<4x32xf32> to vector<4xf32>
    %424 = vector.shape_cast %423 : vector<4xf32> to vector<4x1xf32>
    %c0_131 = arith.constant 0 : index
    %c0_132 = arith.constant 0 : index
    %425 = vector.load %arg15[%c0_131, %c0_132] : memref<1x1xf32, #tpu.memory_space<vmem>>, vector<1x1xf32>
    %426 = vector.broadcast %425 : vector<1x1xf32> to vector<4x1xf32>
    %427 = arith.addf %424, %426 : vector<4x1xf32>
    %428 = arith.maximumf %329, %343 : vector<4x1xf32>
    %429 = arith.maximumf %428, %357 : vector<4x1xf32>
    %430 = arith.maximumf %429, %371 : vector<4x1xf32>
    %431 = arith.maximumf %430, %385 : vector<4x1xf32>
    %432 = arith.maximumf %431, %399 : vector<4x1xf32>
    %433 = arith.maximumf %432, %413 : vector<4x1xf32>
    %434 = arith.maximumf %433, %427 : vector<4x1xf32>
    %435 = arith.subf %329, %434 : vector<4x1xf32>
    %436 = math.exp %435 : vector<4x1xf32>
    %437 = arith.subf %343, %434 : vector<4x1xf32>
    %438 = math.exp %437 : vector<4x1xf32>
    %439 = arith.subf %357, %434 : vector<4x1xf32>
    %440 = math.exp %439 : vector<4x1xf32>
    %441 = arith.subf %371, %434 : vector<4x1xf32>
    %442 = math.exp %441 : vector<4x1xf32>
    %443 = arith.subf %385, %434 : vector<4x1xf32>
    %444 = math.exp %443 : vector<4x1xf32>
    %445 = arith.subf %399, %434 : vector<4x1xf32>
    %446 = math.exp %445 : vector<4x1xf32>
    %447 = arith.subf %413, %434 : vector<4x1xf32>
    %448 = math.exp %447 : vector<4x1xf32>
    %449 = arith.subf %427, %434 : vector<4x1xf32>
    %450 = math.exp %449 : vector<4x1xf32>
    %451 = arith.addf %436, %438 : vector<4x1xf32>
    %452 = arith.addf %451, %440 : vector<4x1xf32>
    %453 = arith.addf %452, %442 : vector<4x1xf32>
    %454 = arith.addf %453, %444 : vector<4x1xf32>
    %455 = arith.addf %454, %446 : vector<4x1xf32>
    %456 = arith.addf %455, %448 : vector<4x1xf32>
    %457 = arith.addf %456, %450 : vector<4x1xf32>
    %458 = tpu.reciprocal %457 {approx = true} : vector<4x1xf32> -> vector<4x1xf32>
    %459 = arith.mulf %436, %458 : vector<4x1xf32>
    %460 = vector.broadcast %459 : vector<4x1xf32> to vector<4x32xf32>
    %461 = arith.mulf %460, %57 : vector<4x32xf32>
    %462 = arith.mulf %438, %458 : vector<4x1xf32>
    %463 = vector.broadcast %462 : vector<4x1xf32> to vector<4x32xf32>
    %464 = arith.mulf %463, %93 : vector<4x32xf32>
    %465 = arith.addf %461, %464 : vector<4x32xf32>
    %466 = arith.mulf %440, %458 : vector<4x1xf32>
    %467 = vector.broadcast %466 : vector<4x1xf32> to vector<4x32xf32>
    %468 = arith.mulf %467, %129 : vector<4x32xf32>
    %469 = arith.addf %465, %468 : vector<4x32xf32>
    %470 = arith.mulf %442, %458 : vector<4x1xf32>
    %471 = vector.broadcast %470 : vector<4x1xf32> to vector<4x32xf32>
    %472 = arith.mulf %471, %165 : vector<4x32xf32>
    %473 = arith.addf %469, %472 : vector<4x32xf32>
    %474 = arith.mulf %444, %458 : vector<4x1xf32>
    %475 = vector.broadcast %474 : vector<4x1xf32> to vector<4x32xf32>
    %476 = arith.mulf %475, %201 : vector<4x32xf32>
    %477 = arith.addf %473, %476 : vector<4x32xf32>
    %478 = arith.mulf %446, %458 : vector<4x1xf32>
    %479 = vector.broadcast %478 : vector<4x1xf32> to vector<4x32xf32>
    %480 = arith.mulf %479, %237 : vector<4x32xf32>
    %481 = arith.addf %477, %480 : vector<4x32xf32>
    %482 = arith.mulf %448, %458 : vector<4x1xf32>
    %483 = vector.broadcast %482 : vector<4x1xf32> to vector<4x32xf32>
    %484 = arith.mulf %483, %273 : vector<4x32xf32>
    %485 = arith.addf %481, %484 : vector<4x32xf32>
    %486 = arith.mulf %450, %458 : vector<4x1xf32>
    %487 = vector.broadcast %486 : vector<4x1xf32> to vector<4x32xf32>
    %488 = arith.mulf %487, %309 : vector<4x32xf32>
    %489 = arith.addf %485, %488 : vector<4x32xf32>
    %490 = arith.fptosi %11 : vector<4x4xf32> to vector<4x4xi32>
    %c0_133 = arith.constant 0 : index
    %c0_134 = arith.constant 0 : index
    %491 = vector.load %arg17[%c0_133, %c0_134] : memref<32x96xf32, #tpu.memory_space<vmem>>, vector<32x96xf32>
    %cst_135 = arith.constant dense<0.000000e+00> : vector<4x96xf32>
    %492 = tpu.matmul %489, %491, %cst_135 {dimension_numbers = #tpu.dot_dimension_numbers<[1], [0], [0], [1], [0, 0, 1, 1], [], []>} : vector<4x32xf32>, vector<32x96xf32>, vector<4x96xf32> -> vector<4x96xf32>
    %c0_136 = arith.constant 0 : index
    %c0_137 = arith.constant 0 : index
    %493 = vector.load %arg19[%c0_136, %c0_137] : memref<1x96xf32, #tpu.memory_space<vmem>>, vector<1x96xf32>
    %494 = vector.broadcast %493 : vector<1x96xf32> to vector<4x96xf32>
    %495 = arith.addf %492, %494 : vector<4x96xf32>
    %c0_138 = arith.constant 0 : index
    %c0_139 = arith.constant 0 : index
    %496 = vector.load %arg16[%c0_138, %c0_139] : memref<4x32xf32, #tpu.memory_space<vmem>>, vector<4x32xf32>
    %c0_140 = arith.constant 0 : index
    %c0_141 = arith.constant 0 : index
    %497 = vector.load %arg18[%c0_140, %c0_141] : memref<32x96xf32, #tpu.memory_space<vmem>>, vector<32x96xf32>
    %cst_142 = arith.constant dense<0.000000e+00> : vector<4x96xf32>
    %498 = tpu.matmul %496, %497, %cst_142 {dimension_numbers = #tpu.dot_dimension_numbers<[1], [0], [0], [1], [0, 0, 1, 1], [], []>} : vector<4x32xf32>, vector<32x96xf32>, vector<4x96xf32> -> vector<4x96xf32>
    %c0_143 = arith.constant 0 : index
    %c0_144 = arith.constant 0 : index
    %499 = vector.load %arg20[%c0_143, %c0_144] : memref<32x96xf32, #tpu.memory_space<vmem>>, vector<32x96xf32>
    %c0_145 = arith.constant 0 : index
    %c0_146 = arith.constant 0 : index
    %500 = vector.load %arg21[%c0_145, %c0_146] : memref<1x96xf32, #tpu.memory_space<vmem>>, vector<1x96xf32>
    %501 = tpu.iota {dimensions = array<i32: 1>} : vector<1x4xi32>
    %502 = vector.extract_strided_slice %490 {offsets = [0, 0], sizes = [4, 1], strides = [1, 1]} : vector<4x4xi32> to vector<4x1xi32>
    %503 = vector.broadcast %502 : vector<4x1xi32> to vector<4x4xi32>
    %504 = vector.broadcast %501 : vector<1x4xi32> to vector<4x4xi32>
    %505 = arith.cmpi eq, %503, %504 : vector<4x4xi32>
    %506 = arith.extui %505 : vector<4x4xi1> to vector<4x4xi32>
    %507 = arith.sitofp %506 : vector<4x4xi32> to vector<4x4xf32>
    %cst_147 = arith.constant dense<0.000000e+00> : vector<4x96xf32>
    %508 = tpu.matmul %507, %498, %cst_147 {dimension_numbers = #tpu.dot_dimension_numbers<[1], [0], [0], [1], [0, 0, 1, 1], [], []>} : vector<4x4xf32>, vector<4x96xf32>, vector<4x96xf32> -> vector<4x96xf32>
    %509 = arith.addf %495, %508 : vector<4x96xf32>
    %cst_148 = arith.constant dense<0.000000e+00> : vector<4x96xf32>
    %510 = tpu.matmul %309, %499, %cst_148 {dimension_numbers = #tpu.dot_dimension_numbers<[1], [0], [0], [1], [0, 0, 1, 1], [], []>} : vector<4x32xf32>, vector<32x96xf32>, vector<4x96xf32> -> vector<4x96xf32>
    %511 = vector.broadcast %500 : vector<1x96xf32> to vector<4x96xf32>
    %512 = arith.addf %510, %511 : vector<4x96xf32>
    %513 = vector.extract_strided_slice %509 {offsets = [0, 0], sizes = [4, 32], strides = [1, 1]} : vector<4x96xf32> to vector<4x32xf32>
    %514 = vector.extract_strided_slice %512 {offsets = [0, 0], sizes = [4, 32], strides = [1, 1]} : vector<4x96xf32> to vector<4x32xf32>
    %515 = arith.addf %513, %514 : vector<4x32xf32>
    %516 = arith.negf %515 : vector<4x32xf32>
    %517 = math.exp %516 : vector<4x32xf32>
    %cst_149 = arith.constant 1.000000e+00 : f32
    %518 = vector.broadcast %cst_149 : f32 to vector<4x32xf32>
    %519 = arith.addf %518, %517 : vector<4x32xf32>
    %520 = arith.divf %518, %519 : vector<4x32xf32>
    %521 = vector.extract_strided_slice %509 {offsets = [0, 32], sizes = [4, 32], strides = [1, 1]} : vector<4x96xf32> to vector<4x32xf32>
    %522 = vector.extract_strided_slice %512 {offsets = [0, 32], sizes = [4, 32], strides = [1, 1]} : vector<4x96xf32> to vector<4x32xf32>
    %523 = arith.addf %521, %522 : vector<4x32xf32>
    %524 = arith.negf %523 : vector<4x32xf32>
    %525 = math.exp %524 : vector<4x32xf32>
    %cst_150 = arith.constant 1.000000e+00 : f32
    %526 = vector.broadcast %cst_150 : f32 to vector<4x32xf32>
    %527 = arith.addf %526, %525 : vector<4x32xf32>
    %528 = arith.divf %526, %527 : vector<4x32xf32>
    %529 = vector.extract_strided_slice %509 {offsets = [0, 64], sizes = [4, 32], strides = [1, 1]} : vector<4x96xf32> to vector<4x32xf32>
    %530 = vector.extract_strided_slice %512 {offsets = [0, 64], sizes = [4, 32], strides = [1, 1]} : vector<4x96xf32> to vector<4x32xf32>
    %531 = arith.mulf %520, %530 : vector<4x32xf32>
    %532 = arith.addf %529, %531 : vector<4x32xf32>
    %533 = math.tanh %532 : vector<4x32xf32>
    %cst_151 = arith.constant 1.000000e+00 : f32
    %534 = vector.broadcast %cst_151 : f32 to vector<4x32xf32>
    %535 = arith.subf %534, %528 : vector<4x32xf32>
    %536 = arith.mulf %535, %533 : vector<4x32xf32>
    %537 = arith.mulf %528, %309 : vector<4x32xf32>
    %538 = arith.addf %536, %537 : vector<4x32xf32>
    %539 = vector.extract_strided_slice %490 {offsets = [0, 1], sizes = [4, 1], strides = [1, 1]} : vector<4x4xi32> to vector<4x1xi32>
    %540 = vector.broadcast %539 : vector<4x1xi32> to vector<4x4xi32>
    %541 = vector.broadcast %501 : vector<1x4xi32> to vector<4x4xi32>
    %542 = arith.cmpi eq, %540, %541 : vector<4x4xi32>
    %543 = arith.extui %542 : vector<4x4xi1> to vector<4x4xi32>
    %544 = arith.sitofp %543 : vector<4x4xi32> to vector<4x4xf32>
    %cst_152 = arith.constant dense<0.000000e+00> : vector<4x96xf32>
    %545 = tpu.matmul %544, %498, %cst_152 {dimension_numbers = #tpu.dot_dimension_numbers<[1], [0], [0], [1], [0, 0, 1, 1], [], []>} : vector<4x4xf32>, vector<4x96xf32>, vector<4x96xf32> -> vector<4x96xf32>
    %546 = arith.addf %495, %545 : vector<4x96xf32>
    %cst_153 = arith.constant dense<0.000000e+00> : vector<4x96xf32>
    %547 = tpu.matmul %538, %499, %cst_153 {dimension_numbers = #tpu.dot_dimension_numbers<[1], [0], [0], [1], [0, 0, 1, 1], [], []>} : vector<4x32xf32>, vector<32x96xf32>, vector<4x96xf32> -> vector<4x96xf32>
    %548 = vector.broadcast %500 : vector<1x96xf32> to vector<4x96xf32>
    %549 = arith.addf %547, %548 : vector<4x96xf32>
    %550 = vector.extract_strided_slice %546 {offsets = [0, 0], sizes = [4, 32], strides = [1, 1]} : vector<4x96xf32> to vector<4x32xf32>
    %551 = vector.extract_strided_slice %549 {offsets = [0, 0], sizes = [4, 32], strides = [1, 1]} : vector<4x96xf32> to vector<4x32xf32>
    %552 = arith.addf %550, %551 : vector<4x32xf32>
    %553 = arith.negf %552 : vector<4x32xf32>
    %554 = math.exp %553 : vector<4x32xf32>
    %cst_154 = arith.constant 1.000000e+00 : f32
    %555 = vector.broadcast %cst_154 : f32 to vector<4x32xf32>
    %556 = arith.addf %555, %554 : vector<4x32xf32>
    %557 = arith.divf %555, %556 : vector<4x32xf32>
    %558 = vector.extract_strided_slice %546 {offsets = [0, 32], sizes = [4, 32], strides = [1, 1]} : vector<4x96xf32> to vector<4x32xf32>
    %559 = vector.extract_strided_slice %549 {offsets = [0, 32], sizes = [4, 32], strides = [1, 1]} : vector<4x96xf32> to vector<4x32xf32>
    %560 = arith.addf %558, %559 : vector<4x32xf32>
    %561 = arith.negf %560 : vector<4x32xf32>
    %562 = math.exp %561 : vector<4x32xf32>
    %cst_155 = arith.constant 1.000000e+00 : f32
    %563 = vector.broadcast %cst_155 : f32 to vector<4x32xf32>
    %564 = arith.addf %563, %562 : vector<4x32xf32>
    %565 = arith.divf %563, %564 : vector<4x32xf32>
    %566 = vector.extract_strided_slice %546 {offsets = [0, 64], sizes = [4, 32], strides = [1, 1]} : vector<4x96xf32> to vector<4x32xf32>
    %567 = vector.extract_strided_slice %549 {offsets = [0, 64], sizes = [4, 32], strides = [1, 1]} : vector<4x96xf32> to vector<4x32xf32>
    %568 = arith.mulf %557, %567 : vector<4x32xf32>
    %569 = arith.addf %566, %568 : vector<4x32xf32>
    %570 = math.tanh %569 : vector<4x32xf32>
    %cst_156 = arith.constant 1.000000e+00 : f32
    %571 = vector.broadcast %cst_156 : f32 to vector<4x32xf32>
    %572 = arith.subf %571, %565 : vector<4x32xf32>
    %573 = arith.mulf %572, %570 : vector<4x32xf32>
    %574 = arith.mulf %565, %538 : vector<4x32xf32>
    %575 = arith.addf %573, %574 : vector<4x32xf32>
    %576 = vector.extract_strided_slice %490 {offsets = [0, 2], sizes = [4, 1], strides = [1, 1]} : vector<4x4xi32> to vector<4x1xi32>
    %577 = vector.broadcast %576 : vector<4x1xi32> to vector<4x4xi32>
    %578 = vector.broadcast %501 : vector<1x4xi32> to vector<4x4xi32>
    %579 = arith.cmpi eq, %577, %578 : vector<4x4xi32>
    %580 = arith.extui %579 : vector<4x4xi1> to vector<4x4xi32>
    %581 = arith.sitofp %580 : vector<4x4xi32> to vector<4x4xf32>
    %cst_157 = arith.constant dense<0.000000e+00> : vector<4x96xf32>
    %582 = tpu.matmul %581, %498, %cst_157 {dimension_numbers = #tpu.dot_dimension_numbers<[1], [0], [0], [1], [0, 0, 1, 1], [], []>} : vector<4x4xf32>, vector<4x96xf32>, vector<4x96xf32> -> vector<4x96xf32>
    %583 = arith.addf %495, %582 : vector<4x96xf32>
    %cst_158 = arith.constant dense<0.000000e+00> : vector<4x96xf32>
    %584 = tpu.matmul %575, %499, %cst_158 {dimension_numbers = #tpu.dot_dimension_numbers<[1], [0], [0], [1], [0, 0, 1, 1], [], []>} : vector<4x32xf32>, vector<32x96xf32>, vector<4x96xf32> -> vector<4x96xf32>
    %585 = vector.broadcast %500 : vector<1x96xf32> to vector<4x96xf32>
    %586 = arith.addf %584, %585 : vector<4x96xf32>
    %587 = vector.extract_strided_slice %583 {offsets = [0, 0], sizes = [4, 32], strides = [1, 1]} : vector<4x96xf32> to vector<4x32xf32>
    %588 = vector.extract_strided_slice %586 {offsets = [0, 0], sizes = [4, 32], strides = [1, 1]} : vector<4x96xf32> to vector<4x32xf32>
    %589 = arith.addf %587, %588 : vector<4x32xf32>
    %590 = arith.negf %589 : vector<4x32xf32>
    %591 = math.exp %590 : vector<4x32xf32>
    %cst_159 = arith.constant 1.000000e+00 : f32
    %592 = vector.broadcast %cst_159 : f32 to vector<4x32xf32>
    %593 = arith.addf %592, %591 : vector<4x32xf32>
    %594 = arith.divf %592, %593 : vector<4x32xf32>
    %595 = vector.extract_strided_slice %583 {offsets = [0, 32], sizes = [4, 32], strides = [1, 1]} : vector<4x96xf32> to vector<4x32xf32>
    %596 = vector.extract_strided_slice %586 {offsets = [0, 32], sizes = [4, 32], strides = [1, 1]} : vector<4x96xf32> to vector<4x32xf32>
    %597 = arith.addf %595, %596 : vector<4x32xf32>
    %598 = arith.negf %597 : vector<4x32xf32>
    %599 = math.exp %598 : vector<4x32xf32>
    %cst_160 = arith.constant 1.000000e+00 : f32
    %600 = vector.broadcast %cst_160 : f32 to vector<4x32xf32>
    %601 = arith.addf %600, %599 : vector<4x32xf32>
    %602 = arith.divf %600, %601 : vector<4x32xf32>
    %603 = vector.extract_strided_slice %583 {offsets = [0, 64], sizes = [4, 32], strides = [1, 1]} : vector<4x96xf32> to vector<4x32xf32>
    %604 = vector.extract_strided_slice %586 {offsets = [0, 64], sizes = [4, 32], strides = [1, 1]} : vector<4x96xf32> to vector<4x32xf32>
    %605 = arith.mulf %594, %604 : vector<4x32xf32>
    %606 = arith.addf %603, %605 : vector<4x32xf32>
    %607 = math.tanh %606 : vector<4x32xf32>
    %cst_161 = arith.constant 1.000000e+00 : f32
    %608 = vector.broadcast %cst_161 : f32 to vector<4x32xf32>
    %609 = arith.subf %608, %602 : vector<4x32xf32>
    %610 = arith.mulf %609, %607 : vector<4x32xf32>
    %611 = arith.mulf %602, %575 : vector<4x32xf32>
    %612 = arith.addf %610, %611 : vector<4x32xf32>
    %613 = vector.extract_strided_slice %490 {offsets = [0, 3], sizes = [4, 1], strides = [1, 1]} : vector<4x4xi32> to vector<4x1xi32>
    %614 = vector.broadcast %613 : vector<4x1xi32> to vector<4x4xi32>
    %615 = vector.broadcast %501 : vector<1x4xi32> to vector<4x4xi32>
    %616 = arith.cmpi eq, %614, %615 : vector<4x4xi32>
    %617 = arith.extui %616 : vector<4x4xi1> to vector<4x4xi32>
    %618 = arith.sitofp %617 : vector<4x4xi32> to vector<4x4xf32>
    %cst_162 = arith.constant dense<0.000000e+00> : vector<4x96xf32>
    %619 = tpu.matmul %618, %498, %cst_162 {dimension_numbers = #tpu.dot_dimension_numbers<[1], [0], [0], [1], [0, 0, 1, 1], [], []>} : vector<4x4xf32>, vector<4x96xf32>, vector<4x96xf32> -> vector<4x96xf32>
    %620 = arith.addf %495, %619 : vector<4x96xf32>
    %cst_163 = arith.constant dense<0.000000e+00> : vector<4x96xf32>
    %621 = tpu.matmul %612, %499, %cst_163 {dimension_numbers = #tpu.dot_dimension_numbers<[1], [0], [0], [1], [0, 0, 1, 1], [], []>} : vector<4x32xf32>, vector<32x96xf32>, vector<4x96xf32> -> vector<4x96xf32>
    %622 = vector.broadcast %500 : vector<1x96xf32> to vector<4x96xf32>
    %623 = arith.addf %621, %622 : vector<4x96xf32>
    %624 = vector.extract_strided_slice %620 {offsets = [0, 0], sizes = [4, 32], strides = [1, 1]} : vector<4x96xf32> to vector<4x32xf32>
    %625 = vector.extract_strided_slice %623 {offsets = [0, 0], sizes = [4, 32], strides = [1, 1]} : vector<4x96xf32> to vector<4x32xf32>
    %626 = arith.addf %624, %625 : vector<4x32xf32>
    %627 = arith.negf %626 : vector<4x32xf32>
    %628 = math.exp %627 : vector<4x32xf32>
    %cst_164 = arith.constant 1.000000e+00 : f32
    %629 = vector.broadcast %cst_164 : f32 to vector<4x32xf32>
    %630 = arith.addf %629, %628 : vector<4x32xf32>
    %631 = arith.divf %629, %630 : vector<4x32xf32>
    %632 = vector.extract_strided_slice %620 {offsets = [0, 32], sizes = [4, 32], strides = [1, 1]} : vector<4x96xf32> to vector<4x32xf32>
    %633 = vector.extract_strided_slice %623 {offsets = [0, 32], sizes = [4, 32], strides = [1, 1]} : vector<4x96xf32> to vector<4x32xf32>
    %634 = arith.addf %632, %633 : vector<4x32xf32>
    %635 = arith.negf %634 : vector<4x32xf32>
    %636 = math.exp %635 : vector<4x32xf32>
    %cst_165 = arith.constant 1.000000e+00 : f32
    %637 = vector.broadcast %cst_165 : f32 to vector<4x32xf32>
    %638 = arith.addf %637, %636 : vector<4x32xf32>
    %639 = arith.divf %637, %638 : vector<4x32xf32>
    %640 = vector.extract_strided_slice %620 {offsets = [0, 64], sizes = [4, 32], strides = [1, 1]} : vector<4x96xf32> to vector<4x32xf32>
    %641 = vector.extract_strided_slice %623 {offsets = [0, 64], sizes = [4, 32], strides = [1, 1]} : vector<4x96xf32> to vector<4x32xf32>
    %642 = arith.mulf %631, %641 : vector<4x32xf32>
    %643 = arith.addf %640, %642 : vector<4x32xf32>
    %644 = math.tanh %643 : vector<4x32xf32>
    %cst_166 = arith.constant 1.000000e+00 : f32
    %645 = vector.broadcast %cst_166 : f32 to vector<4x32xf32>
    %646 = arith.subf %645, %639 : vector<4x32xf32>
    %647 = arith.mulf %646, %644 : vector<4x32xf32>
    %648 = arith.mulf %639, %612 : vector<4x32xf32>
    %649 = arith.addf %647, %648 : vector<4x32xf32>
    %c0_167 = arith.constant 0 : index
    %c0_168 = arith.constant 0 : index
    %650 = vector.load %arg25[%c0_167, %c0_168] : memref<4x32xf32, #tpu.memory_space<vmem>>, vector<4x32xf32>
    tpu.vector_store %arg25[%c0_167, %c0_168], %649 {strides = array<i32>} : memref<4x32xf32, #tpu.memory_space<vmem>>, vector<4x32xf32>,
    %c0_169 = arith.constant 0 : index
    %c0_170 = arith.constant 0 : index
    %651 = vector.load %arg22[%c0_169, %c0_170] : memref<32x4xf32, #tpu.memory_space<vmem>>, vector<32x4xf32>
    %cst_171 = arith.constant dense<0.000000e+00> : vector<4x4xf32>
    %652 = tpu.matmul %649, %651, %cst_171 {dimension_numbers = #tpu.dot_dimension_numbers<[1], [0], [0], [1], [0, 0, 1, 1], [], []>} : vector<4x32xf32>, vector<32x4xf32>, vector<4x4xf32> -> vector<4x4xf32>
    %c0_172 = arith.constant 0 : index
    %c0_173 = arith.constant 0 : index
    %653 = vector.load %arg23[%c0_172, %c0_173] : memref<1x4xf32, #tpu.memory_space<vmem>>, vector<1x4xf32>
    %654 = vector.broadcast %653 : vector<1x4xf32> to vector<4x4xf32>
    %655 = arith.addf %652, %654 : vector<4x4xf32>
    %c0_174 = arith.constant 0 : index
    %c0_175 = arith.constant 0 : index
    %656 = vector.load %arg24[%c0_174, %c0_175] : memref<4x4xf32, #tpu.memory_space<vmem>>, vector<4x4xf32>
    tpu.vector_store %arg24[%c0_174, %c0_175], %655 {strides = array<i32>} : memref<4x4xf32, #tpu.memory_space<vmem>>, vector<4x4xf32>,
    return
  }
}

</mosaic_0001>

<bundles_post_ra>
// kernel: transformer_gru_forward.1
= control target key start
LH: loop header
LB: loop body
LE: loop exit
PB: predicated region body
PF: predicated region fallthrough
CT: control target
= control target key end

     0   :  { %s5895_s0 = inlined_call_operand.hbm [shape: f32[4,8], index: 0, kind: input, shape index: {}]   ;;  %s5896_s1 = inlined_call_operand.vmem [shape: f32[8,32], index: 1, kind: input, shape index: {}]   ;;  %s5897_s2 = inlined_call_operand.vmem [shape: f32[1,32], index: 2, kind: input, shape index: {}]   ;;  %s5898_s3 = inlined_call_operand.vmem [shape: f32[32,4], index: 3, kind: input, shape index: {}]   ;;  %s5899_s4 = inlined_call_operand.vmem [shape: f32[1,4], index: 4, kind: input, shape index: {}]   ;;  %s5900_s5 = inlined_call_operand.vmem [shape: f32[8,32], index: 5, kind: input, shape index: {}]   ;;  %s5901_s6 = inlined_call_operand.vmem [shape: f32[32,96], index: 6, kind: input, shape index: {}]   ;;  %s5902_s7 = inlined_call_operand.vmem [shape: f32[1,96], index: 7, kind: input, shape index: {}]   ;;  %s5903_s8 = inlined_call_operand.vmem [shape: f32[32,96], index: 8, kind: input, shape index: {}]   ;;  %s5904_s9 = inlined_call_operand.vmem [shape: f32[1,96], index: 9, kind: input, shape index: {}]   ;;  %s5905_s10 = inlined_call_operand.hbm [shape: f32[32,32], index: 10, kind: input, shape index: {}]   ;;  %s5906_s11 = inlined_call_operand.hbm [shape: f32[1,32], index: 11, kind: input, shape index: {}]   ;;  %s5907_s12 = inlined_call_operand.hbm [shape: f32[32,32], index: 12, kind: input, shape index: {}]   ;;  %s5908_s13 = inlined_call_operand.hbm [shape: f32[1,32], index: 13, kind: input, shape index: {}]   ;;  %s5909_s14 = inlined_call_operand.hbm [shape: f32[1,32], index: 14, kind: input, shape index: {}]   ;;  %s5910_s15 = inlined_call_operand.<no memory space> [shape: f32[1,1], index: 15, kind: input, shape index: {}]   ;;  %s5911_s16 = inlined_call_operand.hbm [shape: f32[4,32], index: 16, kind: input, shape index: {}]   ;;  %s5912_s17 = inlined_call_operand.vmem [shape: f32[32,96], index: 17, kind: input, shape index: {}]   ;;  %s5913_s18 = inlined_call_operand.hbm [shape: f32[32,96], index: 18, kind: input, shape index: {}]   ;;  %s5914_s19 = inlined_call_operand.hbm [shape: f32[1,96], index: 19, kind: input, shape index: {}]   ;;  %s5915_s20 = inlined_call_operand.hbm [shape: f32[32,96], index: 20, kind: input, shape index: {}]   ;;  %s5916_s21 = inlined_call_operand.hbm [shape: f32[1,96], index: 21, kind: input, shape index: {}]   ;;  %s5917_s22 = inlined_call_operand.vmem [shape: f32[32,4], index: 22, kind: input, shape index: {}]   ;;  %s5918_s23 = inlined_call_operand.hbm [shape: f32[1,4], index: 23, kind: input, shape index: {}]   ;;  %s5919_s24 = inlined_call_operand.hbm [shape: f32[4,4], index: 24, kind: output, shape index: {0}]   ;;  %s5920_s25 = inlined_call_operand.hbm [shape: f32[4,32], index: 25, kind: output, shape index: {1}]  }
   0x1   :  { %5925 = sst [smem:[#allocation35_spill]] %s5895_s0  ;;  %v31_v0 = vstv %s5910_s15 }
   0x2   :  { %5926 = sst [smem:[#allocation36_spill]] %s5896_s1  ;;  %32 = vst [vmem:[#allocation2] sm:$0x1] %v31_v0 }
   0x3   :  { %5927 = sst [smem:[#allocation37_spill]] %s5897_s2 }
   0x4   :  { %5928 = sst [smem:[#allocation38_spill]] %s5898_s3 }
   0x5   :  { %5929 = sst [smem:[#allocation39_spill]] %s5899_s4 }
   0x6   :  { %5930 = sst [smem:[#allocation40_spill]] %s5900_s5 }
   0x7   :  { %5931 = sst [smem:[#allocation41_spill]] %s5901_s6 }
   0x8   :  { %5932 = sst [smem:[#allocation42_spill]] %s5902_s7 }
   0x9   :  { %5933 = sst [smem:[#allocation43_spill]] %s5903_s8 }
   0xa   :  { %5934 = sst [smem:[#allocation44_spill]] %s5904_s9 }
   0xb   :  { %33 = vsyncpa [#allocation4], 0 }
   0xc   :  { %34 = vsyncpa [#allocation7], 0 }
   0xd   :  { %35 = vsyncpa [#allocation10], 0 }
   0xe   :  { %36 = vsyncpa [#allocation13], 0 }
   0xf   :  { %37 = vsyncpa [#allocation16], 0 }
  0x10   :  { %38 = vsyncpa [#allocation19], 0 }
  0x11   :  { %39 = vsyncpa [#allocation22], 0 }
  0x12   :  { %40 = vsyncpa [#allocation5], 0 }
  0x13   :  { %41 = vsyncpa [#allocation25], 0  ;;  %s5008_s6 = smov [#allocation6]   ;;  %s4682_s26 = scalar_lea.hbm %s5905_s10, 512 }
  0x14   :  { %s75_s30 = sshll.u32 %s5008_s6, 4  ;;  %p4683_p0 = scmp.ne.s32.totalorder %s5905_s10, %s4682_s26  ;;  %s76_s30 = int_to_ptr.vmem [resolvable:$true] %s75_s30 }
  0x15   :  { %p4686_p1 = scmp.lt.u32.totalorder %s4682_s26, %s5905_s10 }
  0x17   :  { %p4688_p2 = pnand %p4686_p1, %p4683_p0 }
  0x19   :  { %4691 = shalt.err (!%p4688_p2)
}
  0x1a   :  { %s4692_s4 = scalar_lea.vmem %s76_s30, 512  ;;  %p4697_p4 = scmp.lt.s32.totalorder %s76_s30, %s76_s30 }
  0x1b   :  { %p4693_p3 = scmp.ne.s32.totalorder %s76_s30, %s4692_s4  ;;  %p4698_p5 = scmp.lt.s32.totalorder %s4692_s4, %s4692_s4 }
  0x1d   :  { %p4699_p6 = por %p4698_p5, %p4697_p4 }
  0x1f   :  { %p4700_p7 = pnand %p4699_p6, %p4693_p3 }
  0x21   :  { %4703 = shalt.err (!%p4700_p7)
}
  0x22   :  { %s5009_s28 = smov 128   ;;  %s5010_s9 = smov 8  }
  0x23   :  { %81 = dma.hbm_to_vmem [thread:$0]  %s5905_s10, 512, %s76_s30, [#allocation7], %s5009_s28, %s5009_s28, %s5010_s9  }
  0x24   :  { %s5011_s29 = smov [#allocation9]   ;;  %s5012_s6 = smov [#allocation12]  }
  0x25   :  { %s97_s2 = sshll.u32 %s5011_s29, 4  ;;  %s120_s7 = sshll.u32 %s5012_s6, 4  ;;  %s98_s2 = int_to_ptr.vmem [resolvable:$true] %s97_s2  ;;  %s121_s7 = int_to_ptr.vmem [resolvable:$true] %s120_s7 }
  0x26   :  { %s4704_s1 = scalar_lea.hbm %s5907_s12, 512 }
  0x27   :  { %p4705_p8 = scmp.ne.s32.totalorder %s5907_s12, %s4704_s1  ;;  %p4708_p9 = scmp.lt.u32.totalorder %s4704_s1, %s5907_s12 }
  0x29   :  { %p4710_p10 = pnand %p4708_p9, %p4705_p8 }
  0x2b   :  { %4713 = shalt.err (!%p4710_p10)
}
  0x2c   :  { %s4714_s10 = scalar_lea.vmem %s98_s2, 512  ;;  %p4719_p12 = scmp.lt.s32.totalorder %s98_s2, %s98_s2 }
  0x2d   :  { %p4715_p11 = scmp.ne.s32.totalorder %s98_s2, %s4714_s10  ;;  %p4720_p13 = scmp.lt.s32.totalorder %s4714_s10, %s4714_s10 }
  0x2f   :  { %p4721_p0 = por %p4720_p13, %p4719_p12 }
  0x31   :  { %p4722_p1 = pnand %p4721_p0, %p4715_p11 }
  0x33   :  { %4725 = shalt.err (!%p4722_p1)
}
  0x34   :  { %103 = dma.hbm_to_vmem [thread:$0]  %s5907_s12, 512, %s98_s2, [#allocation10], %s5009_s28, %s5009_s28, %s5010_s9  }
  0x35   :  { %s4726_s6 = scalar_lea.hbm %s5909_s14, 16 }
  0x36   :  { %p4727_p2 = scmp.ne.s32.totalorder %s5909_s14, %s4726_s6  ;;  %p4730_p3 = scmp.lt.u32.totalorder %s4726_s6, %s5909_s14 }
  0x38   :  { %p4732_p4 = pnand %p4730_p3, %p4727_p2 }
  0x3a   :  { %4735 = shalt.err (!%p4732_p4)
}
  0x3b   :  { %s4736_s15 = scalar_lea.vmem %s121_s7, 16  ;;  %s4740_s27 = scalar_lea.vmem %s121_s7, 32 }
  0x3c   :  { %p4737_p5 = scmp.ne.s32.totalorder %s121_s7, %s4736_s15  ;;  %p4741_p6 = scmp.lt.s32.totalorder %s121_s7, %s121_s7 }
  0x3d   :  { %p4742_p7 = scmp.lt.s32.totalorder %s4740_s27, %s4736_s15 }
  0x3f   :  { %p4743_p8 = por %p4742_p7, %p4741_p6 }
  0x41   :  { %p4744_p9 = pnand %p4743_p8, %p4737_p5 }
  0x43   :  { %4747 = shalt.err (!%p4744_p9)
}
  0x44   :  { %123 = dma.hbm_to_vmem [thread:$0]  %s5909_s14, 16, %s121_s7, [#allocation13]  }
  0x45   :  { %s5013_s4 = smov [#allocation15]   ;;  %s5014_s30 = smov [#allocation18]  }
  0x46   :  { %s143_s10 = sshll.u32 %s5013_s4, 4  ;;  %s165_s5 = sshll.u32 %s5014_s30, 4  ;;  %s144_s10 = int_to_ptr.vmem [resolvable:$true] %s143_s10  ;;  %s166_s5 = int_to_ptr.vmem [resolvable:$true] %s165_s5 }
  0x47   :  { %s4748_s6 = scalar_lea.hbm %s5913_s18, 512 }
  0x48   :  { %p4749_p10 = scmp.ne.s32.totalorder %s5913_s18, %s4748_s6  ;;  %p4752_p11 = scmp.lt.u32.totalorder %s4748_s6, %s5913_s18 }
  0x4a   :  { %p4754_p12 = pnand %p4752_p11, %p4749_p10 }
  0x4c   :  { %4757 = shalt.err (!%p4754_p12)
}
  0x4d   :  { %s4758_s14 = scalar_lea.vmem %s144_s10, 512  ;;  %p4763_p0 = scmp.lt.s32.totalorder %s144_s10, %s144_s10 }
  0x4e   :  { %p4759_p13 = scmp.ne.s32.totalorder %s144_s10, %s4758_s14  ;;  %p4764_p1 = scmp.lt.s32.totalorder %s4758_s14, %s4758_s14 }
  0x50   :  { %p4765_p2 = por %p4764_p1, %p4763_p0 }
  0x52   :  { %p4766_p3 = pnand %p4765_p2, %p4759_p13 }
  0x54   :  { %4769 = shalt.err (!%p4766_p3)
}
  0x55   :  { %149 = dma.hbm_to_vmem [thread:$0]  %s5913_s18, 512, %s144_s10, [#allocation16], %s5009_s28, %s5009_s28, %s5010_s9  }
  0x56   :  { %s4770_s2 = scalar_lea.hbm %s5915_s20, 512 }
  0x57   :  { %p4771_p4 = scmp.ne.s32.totalorder %s5915_s20, %s4770_s2  ;;  %p4774_p5 = scmp.lt.u32.totalorder %s4770_s2, %s5915_s20 }
  0x59   :  { %p4776_p6 = pnand %p4774_p5, %p4771_p4 }
  0x5b   :  { %4779 = shalt.err (!%p4776_p6)
}
  0x5c   :  { %s4780_s6 = scalar_lea.vmem %s166_s5, 512  ;;  %p4785_p8 = scmp.lt.s32.totalorder %s166_s5, %s166_s5 }
  0x5d   :  { %p4781_p7 = scmp.ne.s32.totalorder %s166_s5, %s4780_s6  ;;  %p4786_p9 = scmp.lt.s32.totalorder %s4780_s6, %s4780_s6 }
  0x5f   :  { %p4787_p10 = por %p4786_p9, %p4785_p8 }
  0x61   :  { %p4788_p11 = pnand %p4787_p10, %p4781_p7 }
  0x63   :  { %4791 = shalt.err (!%p4788_p11)
}
  0x64   :  { %171 = dma.hbm_to_vmem [thread:$0]  %s5915_s20, 512, %s166_s5, [#allocation19], %s5009_s28, %s5009_s28, %s5010_s9  }
  0x65   :  { %s5015_s3 = smov [#allocation3]   ;;  %s5016_s1 = smov [#allocation8]  }
  0x66   :  { %s48_s26 = sshll.u32 %s5015_s3, 4  ;;  %s88_s8 = sshll.u32 %s5016_s1, 4  ;;  %s49_s26 = int_to_ptr.vmem [resolvable:$true] %s48_s26  ;;  %s89_s8 = int_to_ptr.vmem [resolvable:$true] %s88_s8 }
  0x67   :  { %s5935_s15 = sld [smem:[#allocation35_spill]] }
  0x6d   :  { %s4792_s27 = scalar_lea.hbm %s5935_s15, 64 }
  0x6e   :  { %p4793_p12 = scmp.ne.s32.totalorder %s5935_s15, %s4792_s27  ;;  %p4796_p13 = scmp.lt.u32.totalorder %s4792_s27, %s5935_s15 }
  0x70   :  { %p4798_p0 = pnand %p4796_p13, %p4793_p12 }
  0x72   :  { %4801 = shalt.err (!%p4798_p0)
}
  0x73   :  { %s4802_s20 = scalar_lea.vmem %s49_s26, 64  ;;  %p4807_p2 = scmp.lt.s32.totalorder %s49_s26, %s49_s26 }
  0x74   :  { %p4803_p1 = scmp.ne.s32.totalorder %s49_s26, %s4802_s20  ;;  %p4808_p3 = scmp.lt.s32.totalorder %s4802_s20, %s4802_s20 }
  0x76   :  { %p4809_p4 = por %p4808_p3, %p4807_p2 }
  0x78   :  { %p4810_p5 = pnand %p4809_p4, %p4803_p1 }
  0x7a   :  { %4813 = shalt.err (!%p4810_p5)
}
  0x7b   :  { %51 = dma.hbm_to_vmem [thread:$0]  %s5935_s15, 64, %s49_s26, [#allocation4]  }
  0x7c   :  { %s4814_s29 = scalar_lea.hbm %s5906_s11, 16 }
  0x7d   :  { %p4815_p6 = scmp.ne.s32.totalorder %s5906_s11, %s4814_s29  ;;  %p4818_p7 = scmp.lt.u32.totalorder %s4814_s29, %s5906_s11 }
  0x7f   :  { %p4820_p8 = pnand %p4818_p7, %p4815_p6 }
  0x81   :  { %4823 = shalt.err (!%p4820_p8)
}
  0x82   :  { %s4824_s1 = scalar_lea.vmem %s89_s8, 16  ;;  %s4828_s14 = scalar_lea.vmem %s89_s8, 32 }
  0x83   :  { %p4825_p9 = scmp.ne.s32.totalorder %s89_s8, %s4824_s1  ;;  %p4829_p10 = scmp.lt.s32.totalorder %s89_s8, %s89_s8 }
  0x84   :  { %p4830_p11 = scmp.lt.s32.totalorder %s4828_s14, %s4824_s1 }
  0x86   :  { %p4831_p12 = por %p4830_p11, %p4829_p10 }
  0x88   :  { %p4832_p13 = pnand %p4831_p12, %p4825_p9 }
  0x8a   :  { %4835 = shalt.err (!%p4832_p13)
}
  0x8b   :  { %91 = dma.hbm_to_vmem [thread:$0]  %s5906_s11, 16, %s89_s8, [#allocation7]  }
  0x8c   :  { %s5017_s15 = smov [#allocation11]   ;;  %s5018_s12 = smov [#allocation14]  }
  0x8d   :  { %s110_s27 = sshll.u32 %s5017_s15, 4  ;;  %s132_s2 = sshll.u32 %s5018_s12, 4  ;;  %s111_s27 = int_to_ptr.vmem [resolvable:$true] %s110_s27  ;;  %s133_s2 = int_to_ptr.vmem [resolvable:$true] %s132_s2 }
  0x8e   :  { %s4836_s20 = scalar_lea.hbm %s5908_s13, 16 }
  0x8f   :  { %p4837_p0 = scmp.ne.s32.totalorder %s5908_s13, %s4836_s20  ;;  %p4840_p1 = scmp.lt.u32.totalorder %s4836_s20, %s5908_s13 }
  0x91   :  { %p4842_p2 = pnand %p4840_p1, %p4837_p0 }
  0x93   :  { %4845 = shalt.err (!%p4842_p2)
}
  0x94   :  { %s4846_s11 = scalar_lea.vmem %s111_s27, 16  ;;  %s4850_s8 = scalar_lea.vmem %s111_s27, 32 }
  0x95   :  { %p4847_p3 = scmp.ne.s32.totalorder %s111_s27, %s4846_s11  ;;  %p4851_p4 = scmp.lt.s32.totalorder %s111_s27, %s111_s27 }
  0x96   :  { %p4852_p5 = scmp.lt.s32.totalorder %s4850_s8, %s4846_s11 }
  0x98   :  { %p4853_p6 = por %p4852_p5, %p4851_p4 }
  0x9a   :  { %p4854_p7 = pnand %p4853_p6, %p4847_p3 }
  0x9c   :  { %4857 = shalt.err (!%p4854_p7)
}
  0x9d   :  { %113 = dma.hbm_to_vmem [thread:$0]  %s5908_s13, 16, %s111_s27, [#allocation10]  }
  0x9e   :  { %s4858_s3 = scalar_lea.hbm %s5911_s16, 64 }
  0x9f   :  { %p4859_p8 = scmp.ne.s32.totalorder %s5911_s16, %s4858_s3  ;;  %p4862_p9 = scmp.lt.u32.totalorder %s4858_s3, %s5911_s16 }
  0xa1   :  { %p4864_p10 = pnand %p4862_p9, %p4859_p8 }
  0xa3   :  { %4867 = shalt.err (!%p4864_p10)
}
  0xa4   :  { %s4868_s15 = scalar_lea.vmem %s133_s2, 64  ;;  %p4873_p12 = scmp.lt.s32.totalorder %s133_s2, %s133_s2 }
  0xa5   :  { %p4869_p11 = scmp.ne.s32.totalorder %s133_s2, %s4868_s15  ;;  %p4874_p13 = scmp.lt.s32.totalorder %s4868_s15, %s4868_s15 }
  0xa7   :  { %p4875_p0 = por %p4874_p13, %p4873_p12 }
  0xa9   :  { %p4876_p1 = pnand %p4875_p0, %p4869_p11 }
  0xab   :  { %4879 = shalt.err (!%p4876_p1)
}
  0xac   :  { %135 = dma.hbm_to_vmem [thread:$0]  %s5911_s16, 64, %s133_s2, [#allocation13]  }
  0xad   :  { %s5019_s12 = smov [#allocation17]   ;;  %s5020_s30 = smov [#allocation20]  }
  0xae   :  { %s156_s4 = sshll.u32 %s5019_s12, 4  ;;  %s178_s20 = sshll.u32 %s5020_s30, 4  ;;  %s157_s4 = int_to_ptr.vmem [resolvable:$true] %s156_s4  ;;  %s179_s20 = int_to_ptr.vmem [resolvable:$true] %s178_s20 }
  0xaf   :  { %s4880_s5 = scalar_lea.hbm %s5914_s19, 16 }
  0xb0   :  { %p4881_p2 = scmp.ne.s32.totalorder %s5914_s19, %s4880_s5  ;;  %p4884_p3 = scmp.lt.u32.totalorder %s4880_s5, %s5914_s19 }
  0xb2   :  { %p4886_p4 = pnand %p4884_p3, %p4881_p2 }
  0xb4   :  { %4889 = shalt.err (!%p4886_p4)
}
  0xb5   :  { %s4890_s16 = scalar_lea.vmem %s157_s4, 16  ;;  %s4894_s2 = scalar_lea.vmem %s157_s4, 32 }
  0xb6   :  { %p4891_p5 = scmp.ne.s32.totalorder %s157_s4, %s4890_s16  ;;  %p4895_p6 = scmp.lt.s32.totalorder %s157_s4, %s157_s4 }
  0xb7   :  { %p4896_p7 = scmp.lt.s32.totalorder %s4894_s2, %s4890_s16 }
  0xb9   :  { %p4897_p8 = por %p4896_p7, %p4895_p6 }
  0xbb   :  { %p4898_p9 = pnand %p4897_p8, %p4891_p5 }
  0xbd   :  { %4901 = shalt.err (!%p4898_p9)
}
  0xbe   :  { %159 = dma.hbm_to_vmem [thread:$0]  %s5914_s19, 16, %s157_s4, [#allocation16]  }
  0xbf   :  { %s4902_s1 = scalar_lea.hbm %s5916_s21, 16 }
  0xc0   :  { %p4903_p10 = scmp.ne.s32.totalorder %s5916_s21, %s4902_s1  ;;  %p4906_p11 = scmp.lt.u32.totalorder %s4902_s1, %s5916_s21 }
  0xc2   :  { %p4908_p12 = pnand %p4906_p11, %p4903_p10 }
  0xc4   :  { %4911 = shalt.err (!%p4908_p12)
}
  0xc5   :  { %s4912_s13 = scalar_lea.vmem %s179_s20, 16  ;;  %s4916_s27 = scalar_lea.vmem %s179_s20, 32 }
  0xc6   :  { %p4913_p13 = scmp.ne.s32.totalorder %s179_s20, %s4912_s13  ;;  %p4917_p0 = scmp.lt.s32.totalorder %s179_s20, %s179_s20 }
  0xc7   :  { %p4918_p1 = scmp.lt.s32.totalorder %s4916_s27, %s4912_s13 }
  0xc9   :  { %p4919_p2 = por %p4918_p1, %p4917_p0 }
  0xcb   :  { %p4920_p3 = pnand %p4919_p2, %p4913_p13 }
  0xcd   :  { %4923 = shalt.err (!%p4920_p3)
}
  0xce   :  { %181 = dma.hbm_to_vmem [thread:$0]  %s5916_s21, 16, %s179_s20, [#allocation19]  }
  0xcf   :  { %s5021_s4 = smov [#allocation21]   ;;  %s4924_s5 = scalar_lea.hbm %s5918_s23, 16 }
  0xd0   :  { %s190_s30 = sshll.u32 %s5021_s4, 4  ;;  %p4925_p4 = scmp.ne.s32.totalorder %s5918_s23, %s4924_s5  ;;  %s191_s30 = int_to_ptr.vmem [resolvable:$true] %s190_s30 }
  0xd1   :  { %p4928_p5 = scmp.lt.u32.totalorder %s4924_s5, %s5918_s23 }
  0xd3   :  { %p4930_p6 = pnand %p4928_p5, %p4925_p4 }
  0xd5   :  { %4933 = shalt.err (!%p4930_p6)
}
  0xd6   :  { %s4934_s16 = scalar_lea.vmem %s191_s30, 16  ;;  %s4938_s21 = scalar_lea.vmem %s191_s30, 32 }
  0xd7   :  { %p4935_p7 = scmp.ne.s32.totalorder %s191_s30, %s4934_s16  ;;  %p4939_p8 = scmp.lt.s32.totalorder %s191_s30, %s191_s30 }
  0xd8   :  { %p4940_p9 = scmp.lt.s32.totalorder %s4938_s21, %s4934_s16 }
  0xda   :  { %p4941_p10 = por %p4940_p9, %p4939_p8 }
  0xdc   :  { %p4942_p11 = pnand %p4941_p10, %p4935_p7 }
  0xde   :  { %4945 = shalt.err (!%p4942_p11)
}
  0xdf   :  { %193 = dma.hbm_to_vmem [thread:$0]  %s5918_s23, 16, %s191_s30, [#allocation22]  }
  0xe0   :  { %4990 = dma.done.wait [#allocation4], 64  }
  0xe1   :  { %4991 = vsyncadd [#allocation4], 4294967232 }
  0xe2   :  { %4992 = dma.done.wait [#allocation7], 528  }
  0xe3   :  { %4993 = vsyncadd [#allocation7], 4294966768 }
  0xe4   :  { %4994 = dma.done.wait [#allocation10], 528  }
  0xe5   :  { %4995 = vsyncadd [#allocation10], 4294966768 }
  0xe6   :  { %4996 = dma.done.wait [#allocation13], 80  }
  0xe7   :  { %4997 = vsyncadd [#allocation13], 4294967216 }
  0xe8   :  { %4998 = dma.done.wait [#allocation16], 528  }
  0xe9   :  { %4999 = vsyncadd [#allocation16], 4294966768 }
  0xea   :  { %5000 = dma.done.wait [#allocation19], 528  }
  0xeb   :  { %5001 = vsyncadd [#allocation19], 4294966768 }
  0xec   :  { %5002 = dma.done.wait [#allocation22], 16  }
  0xed   :  { %5003 = vsyncadd [#allocation22], 4294967280  ;;  %v5022_v1 = vmov 0.0   ;;  %vm5023_vm0 = vmmov 0   ;;  %v5024_v2 = vmov 0   ;;  %v5025_v3 = vmov 0.0|0.0  }
  0xee   :  { %4023 = vmatprep.subr.mxu0 %v5022_v1  ;;  %4025 = vmatprep.mubr.msk.f32.mxu0 %vm5023_vm0, %v5022_v1  ;;  %vm240_vm1 = vcmask 64512   ;;  %s5936_s18 = sld [smem:[#allocation36_spill]]  ;;  %v230_v5 = vld [vmem:[#allocation3] sm:$0xf]  ;;  %s5937_s1 = sld [smem:[#allocation41_spill]]  ;;  %vm325_vm2 = vcmask 261120   ;;  %v489_v28 = vlaneseq }
  0xef   :  { %4563 = vset.pattern.permute.xlu0 %v5024_v2  ;;  %4374 = vmatprep.subr.bf16.mxu1 %v5025_v3  ;;  %v4530_v7 = vtrunc.f32 %v230_v5  ;;  %s5938_s4 = sld [smem:[#allocation38_spill]]  ;;  %s5939_s0 = sld [smem:[#allocation43_spill]]  ;;  %v5027_v54 = vmov 1   ;;  %vm2112_vm11 = vcmask 257024   ;;  %vm2945_vm12 = vcmask 1043456  }
  0xf0   :  { %4036 = vmatprep.mubr.msk.f32.mxu1 %vm5023_vm0, %v5022_v1  ;;  %4572 = vset.pattern.permute.xlu1 %v5024_v2  ;;  %s5940_s21 = sld [smem:[#allocation40_spill]]  ;;  %s5941_s7 = sld [smem:[#allocation37_spill]]  ;;  %v5405_v32 = vand.u32 127, %v489_v28  ;;  %vm2941_vm14 = vcmask 31744  }
  0xf1   :  { %v5351_v12 = vcvt.f32.s32 %v4530_v7  ;;  %s5942_s27 = sld [smem:[#allocation42_spill]]  ;;  %s5026_s30 = smov 64  }
  0xf2   :  { %s5028_s28 = smov 96  }
  0xf3   :  { %492 = vperm.xlu0 %4563, %v5351_v12  }
  0xf4   :  { %v232_v4 = vld [vmem:[%s5936_s18] sm:$0xff]  ;;  %v401_v8 = vld [vmem:[%s5937_s1 + $0x8] sm:$0xff]  ;;  %v402_v9 = vld [vmem:[%s5937_s1 + $0x10] sm:$0xff] }
  0xf5   :  { %v400_v6 = vld [vmem:[%s5937_s1] sm:$0xff]  ;;  %4024 = vmatpush3.msra.mxu0 %v232_v4  ;;  %v403_v10 = vld [vmem:[%s5937_s1 + $0x18] sm:$0xff]  ;;  %v315_v15 = vld [vmem:[%s5938_s4 + $0x8] sm:$0xff] }
  0xf6   :  { %4026 = vmatmul.mubr.msk.f32.vlgmr.msra.gmra.mrb[0].mxu0 %vm240_vm1, %v230_v5  ;;  %4380 = vmatprep.subr.bf16.mxu0 %v5025_v3  ;;  %v4381_v11 = vpack.c.bf16 %v401_v8, %v400_v6  ;;  %v314_v13 = vld [vmem:[%s5938_s4] sm:$0xff]  ;;  %v4384_v14 = vpack.c.bf16 %v403_v10, %v402_v9  ;;  %v485_v17 = vld [vmem:[%s5939_s0 + $0x8] sm:$0xff]  ;;  %v486_v21 = vld [vmem:[%s5939_s0 + $0x10] sm:$0xff] }
  0xf7   :  { %4047 = vmatprep.mubr.msk.f32.mxu0 %vm5023_vm0, %v5022_v1  ;;  %v484_v16 = vld [vmem:[%s5939_s0] sm:$0xff]  ;;  %v4375_v18 = vpack.c.bf16 %v315_v15, %v314_v13  ;;  %v487_v22 = vld [vmem:[%s5939_s0 + $0x18] sm:$0xff]  ;;  %v316_v24 = vld [vmem:[%s5938_s4 + $0x10] sm:$0xff]  ;;  %4564 = vset.pattern.permute.xlu0 %v5027_v54  ;;  %s5944_s0 = sld [smem:[#allocation39_spill]] }
  0xf8   :  { %4382 = vmatpush3.bf16.msra.mxu0 %v4381_v11  ;;  %v399_v19 = vld [vmem:[%s5940_s21] sm:$0xff]  ;;  %v5372_v20 = vpack.c.bf16 %v485_v17, %v484_v16  ;;  %v5384_v23 = vpack.c.bf16 %v487_v22, %v486_v21  ;;  %v317_v25 = vld [vmem:[%s5938_s4 + $0x18] sm:$0xff]  ;;  %s5943_s4 = sld [smem:[#allocation44_spill]] }
  0xf9   :  { %4383 = vmatprep.subr.bf16.mxu0 %v5025_v3  ;;  %4376 = vmatpush3.bf16.msra.mxu1 %v4375_v18  ;;  %v4378_v26 = vpack.c.bf16 %v317_v25, %v316_v24  ;;  %v3790_v27 = vld [vmem:[%s5941_s7] ss:$0 sm:$0xff]  ;;  %v5029_v18 = vmov 2  }
  0xfa   :  { %4377 = vmatprep.subr.bf16.mxu1 %v5025_v3  ;;  %v3794_v34 = vld [vmem:[%s5942_s27] ss:$0 sm:$0xff] }
  0xfc   :  { %4385 = vmatpush3.bf16.msra.mxu0 %v4384_v14 }
  0xfd   :  { %4386 = vmatprep.subr.bf16.mxu0 %v5025_v3  ;;  %4379 = vmatpush3.bf16.msra.mxu1 %v4378_v26 }
  0xfe   :  { %4050 = vmatprep.subr.mxu1 %v5022_v1  ;;  %v5426_v39 = vld [vmem:[%s5943_s4] ss:$0 sm:$0xff] }
  0xff   :  { %4048 = vmatmul.mubr.msk.f32.vlgmr.msra.gmra.mrb[2].mxu0 %vm325_vm2, %v399_v19 }
 0x100   :  { %4388 = vmatpush3.bf16.msra.mxu0 %v5372_v20  ;;  %4063 = vmatprep.mubr.msk.f32.mxu0 %vm5023_vm0, %v5022_v1 }
 0x101   :  { %4389 = vmatprep.subr.bf16.mxu0 %v5025_v3 }
 0x104   :  { %4391 = vmatpush3.bf16.msra.mxu0 %v5384_v23 }
 0x105   :  { %4082 = vmatprep.subr.mxu0 %v5022_v1 }
 0x107   :  { %4064 = vmatmul.mubr.f32.vlgmr.msra.gmra.mrb[4].mxu0 %v5022_v1 }
 0x108   :  { %4084 = vmatprep.mubr.msk.f32.mxu0 %vm5023_vm0, %v5022_v1 }
 0x172   :  { %v493_v33 = vpop.permute.xlu0 %492 }
 0x173   :  { %vm494_vm3 = vcmp.eq.s32.totalorder %v493_v33, %v5405_v32 }
 0x174   :  { %v3796_v38 = vsel %vm494_vm3, 1.0, %v5022_v1 }
 0x1c9   :  { %v310_v29 = vpop.f32.mrb[0].mxu0 }
 0x1ca   :  { %v311_v30 = vadd.f32 %v3790_v27, %v310_v29  ;;  %v4027_v31 = vpop.f32.mrb[1].mxu0 }
 0x1cc   :  { %4037 = vmatmul.mubr.msk.f32.vlgmr.msra.gmra.mrb[0].mxu1 %vm325_vm2, %v311_v30 }
 0x1cd   :  { %4052 = vmatprep.mubr.msk.f32.mxu1 %vm5023_vm0, %v5022_v1 }
 0x1d2   :  { %v480_v35 = vpop.f32.mrb[2].mxu0 }
 0x1d3   :  { %v5413_v36 = vadd.f32 %v3794_v34, %v480_v35  ;;  %v4049_v37 = vpop.f32.mrb[3].mxu0 }
 0x1d5   :  { %4051 = vmatpush3.msra.mxu1 %v5413_v36  ;;  %4083 = vmatpush3.msra.mxu0 %v5413_v36 }
 0x1d6   :  { %4053 = vmatmul.mubr.msk.f32.vlgmr.msra.gmra.mrb[2].mxu1 %vm240_vm1, %v3796_v38  ;;  %4066 = vmatprep.subr.mxu1 %v5022_v1 }
 0x1d7   :  { %4067 = vmatpush3.msra.mxu1 %v5413_v36  ;;  %4068 = vmatprep.mubr.msk.f32.mxu1 %vm5023_vm0, %v5022_v1 }
 0x1d8   :  { %4392 = vmatprep.subr.bf16.mxu1 %v5025_v3  ;;  %4398 = vmatprep.subr.bf16.mxu0 %v5025_v3 }
 0x1da   :  { %v645_v40 = vpop.f32.mrb[4].mxu0 }
 0x1db   :  { %v646_v41 = vadd.f32 %v5426_v39, %v645_v40  ;;  %v4065_v42 = vpop.f32.mrb[5].mxu0 }
 0x1dd   :  { %657 = vrot.lane.b32.xlu0 %v646_v41, %s5026_s30 }
 0x1e1   :  { %676 = vperm.xlu0 %4564, %v5351_v12  }
 0x1e5   :  { %4565 = vset.pattern.permute.xlu0 %v5029_v18 }
 0x24f   :  { %v658_v51 = vpop.permute.xlu0 %657 }
 0x260   :  { %v677_v58 = vpop.permute.xlu0 %676 }
 0x261   :  { %vm678_vm4 = vcmp.eq.s32.totalorder %v677_v58, %v5405_v32 }
 0x262   :  { %v3800_v59 = vsel %vm678_vm4, 1.0, %v5022_v1 }
 0x263   :  { %4069 = vmatmul.mubr.msk.f32.vlgmr.msra.gmra.mrb[4].mxu1 %vm240_vm1, %v3800_v59 }
 0x264   :  { %4394 = vmatpush3.bf16.msra.mxu1 %v5372_v20  ;;  %4079 = vmatprep.mubr.msk.f32.mxu1 %vm5023_vm0, %v5022_v1 }
 0x265   :  { %4395 = vmatprep.subr.bf16.mxu1 %v5025_v3 }
 0x268   :  { %4397 = vmatpush3.bf16.msra.mxu1 %v5384_v23 }
 0x269   :  { %4098 = vmatprep.subr.mxu1 %v5022_v1 }
 0x29f   :  { %v5432_v43 = vpop.f32.mrb[0].mxu1 }
 0x2a0   :  { %v4038_v44 = vpop.f32.mrb[1].mxu1 }
 0x2a9   :  { %v566_v45 = vpop.f32.mrb[2].mxu1 }
 0x2aa   :  { %v649_v46 = vadd.f32 %v646_v41, %v566_v45  ;;  %v4054_v47 = vpop.f32.mrb[3].mxu1 }
 0x2ac   :  { %v3799_v48 = vmul.f32 -1.442695, %v649_v46 }
 0x2ae   :  { %4576 = vpow2.f32 %v3799_v48  ;;  %v5030_v48 = vmov 3  }
 0x2b8   :  { %v4577_v49 = vpop.eup %4576 }
 0x2b9   :  { %v653_v50 = vadd.f32 1.0, %v4577_v49 }
 0x2bb   :  { %4578 = vrcp.f32 %v653_v50 }
 0x2c5   :  { %v4579_v52 = vpop.eup %4578 }
 0x2c6   :  { %v660_v53 = vmul.f32 %v4579_v52, %v658_v51  ;;  %v667_v60 = vsub.f32 1.0, %v4579_v52  ;;  %v673_v62 = vmul.f32 0.0, %v4579_v52 }
 0x2c8   :  { %662 = vrot.lane.b32.xlu1 %v660_v53, %s5026_s30 }
 0x336   :  { %v750_v4 = vpop.f32.mrb[4].mxu1 }
 0x337   :  { %v4070_v5 = vpop.f32.mrb[5].mxu1 }
 0x33a   :  { %v663_v55 = vpop.permute.xlu1 %662 }
 0x33b   :  { %v665_v56 = vadd.f32 %v663_v55, %v566_v45 }
 0x33d   :  { %4580 = vtanh.f32 %v665_v56 }
 0x347   :  { %v4581_v57 = vpop.eup %4580 }
 0x348   :  { %669 = vrot.lane.b32.xlu1 %v4581_v57, %s5028_s28 }
 0x3ba   :  { %v670_v61 = vpop.permute.xlu1 %669 }
 0x3bb   :  { %v672_v63 = vmul.f32 %v670_v61, %v667_v60 }
 0x3bd   :  { %v5447_v0 = vadd.f32 %v673_v62, %v672_v63 }
 0x3bf   :  { %755 = vrot.lane.b32.xlu1 %v5447_v0, %s5028_s28 }
 0x431   :  { %v5451_v6 = vpop.permute.xlu1 %755 }
 0x432   :  { %4080 = vmatmul.mubr.msk.f32.vlgmr.msra.gmra.mrb[6].mxu1 %vm325_vm2, %v5451_v6 }
 0x433   :  { %4099 = vmatpush3.msra.mxu1 %v5413_v36  ;;  %4100 = vmatprep.mubr.msk.f32.mxu1 %vm5023_vm0, %v5022_v1 }
 0x434   :  { %4404 = vmatprep.subr.bf16.mxu1 %v5025_v3 }
 0x505   :  { %v825_v7 = vpop.f32.mrb[6].mxu1 }
 0x506   :  { %v826_v8 = vadd.f32 %v5426_v39, %v825_v7  ;;  %v4081_v9 = vpop.f32.mrb[7].mxu1 }
 0x508   :  { %v829_v10 = vadd.f32 %v826_v8, %v750_v4  ;;  %837 = vrot.lane.b32.xlu1 %v826_v8, %s5026_s30 }
 0x50a   :  { %v3803_v11 = vmul.f32 -1.442695, %v829_v10 }
 0x50c   :  { %4582 = vpow2.f32 %v3803_v11 }
 0x516   :  { %v4583_v13 = vpop.eup %4582 }
 0x517   :  { %v833_v14 = vadd.f32 1.0, %v4583_v13 }
 0x519   :  { %4584 = vrcp.f32 %v833_v14 }
 0x523   :  { %v4585_v15 = vpop.eup %4584 }
 0x524   :  { %v847_v26 = vsub.f32 1.0, %v4585_v15  ;;  %v853_v28 = vmul.f32 %v4585_v15, %v5447_v0 }
 0x57a   :  { %v838_v16 = vpop.permute.xlu1 %837 }
 0x57b   :  { %v840_v17 = vmul.f32 %v4585_v15, %v838_v16  ;;  %v5031_v15 = vmov 4  }
 0x57d   :  { %842 = vrot.lane.b32.xlu0 %v840_v17, %s5026_s30 }
 0x581   :  { %856 = vperm.xlu0 %4565, %v5351_v12  }
 0x585   :  { %4566 = vset.pattern.permute.xlu0 %v5030_v48 }
 0x5ef   :  { %v843_v19 = vpop.permute.xlu0 %842 }
 0x5f0   :  { %v845_v21 = vadd.f32 %v843_v19, %v750_v4 }
 0x5f2   :  { %4586 = vtanh.f32 %v845_v21 }
 0x5fc   :  { %v4587_v22 = vpop.eup %4586 }
 0x5fd   :  { %849 = vrot.lane.b32.xlu1 %v4587_v22, %s5028_s28 }
 0x600   :  { %v857_v24 = vpop.permute.xlu0 %856 }
 0x601   :  { %vm858_vm5 = vcmp.eq.s32.totalorder %v857_v24, %v5405_v32 }
 0x602   :  { %v3804_v25 = vsel %vm858_vm5, 1.0, %v5022_v1 }
 0x603   :  { %4085 = vmatmul.mubr.msk.f32.vlgmr.msra.gmra.mrb[6].mxu0 %vm240_vm1, %v3804_v25 }
 0x604   :  { %4400 = vmatpush3.bf16.msra.mxu0 %v5372_v20  ;;  %4095 = vmatprep.mubr.msk.f32.mxu0 %vm5023_vm0, %v5022_v1 }
 0x605   :  { %4401 = vmatprep.subr.bf16.mxu0 %v5025_v3 }
 0x608   :  { %4403 = vmatpush3.bf16.msra.mxu0 %v5384_v23 }
 0x609   :  { %4114 = vmatprep.subr.mxu0 %v5022_v1 }
 0x66f   :  { %v850_v27 = vpop.permute.xlu1 %849 }
 0x670   :  { %v852_v29 = vmul.f32 %v850_v27, %v847_v26 }
 0x672   :  { %v5475_v30 = vadd.f32 %v853_v28, %v852_v29 }
 0x674   :  { %935 = vrot.lane.b32.xlu1 %v5475_v30, %s5028_s28 }
 0x6d6   :  { %v930_v31 = vpop.f32.mrb[6].mxu0 }
 0x6d7   :  { %v4086_v33 = vpop.f32.mrb[7].mxu0 }
 0x6e6   :  { %v5479_v34 = vpop.permute.xlu1 %935 }
 0x6e7   :  { %4096 = vmatmul.mubr.msk.f32.vlgmr.msra.gmra.mrb[8].mxu0 %vm325_vm2, %v5479_v34 }
 0x6e8   :  { %4115 = vmatpush3.msra.mxu0 %v5413_v36  ;;  %4116 = vmatprep.mubr.msk.f32.mxu0 %vm5023_vm0, %v5022_v1 }
 0x6e9   :  { %4410 = vmatprep.subr.bf16.mxu0 %v5025_v3 }
 0x7ba   :  { %v1005_v35 = vpop.f32.mrb[8].mxu0 }
 0x7bb   :  { %v1006_v37 = vadd.f32 %v5426_v39, %v1005_v35  ;;  %v4097_v38 = vpop.f32.mrb[9].mxu0 }
 0x7bd   :  { %v1009_v40 = vadd.f32 %v1006_v37, %v930_v31  ;;  %1017 = vrot.lane.b32.xlu1 %v1006_v37, %s5026_s30 }
 0x7bf   :  { %v3807_v41 = vmul.f32 -1.442695, %v1009_v40 }
 0x7c1   :  { %4588 = vpow2.f32 %v3807_v41 }
 0x7cb   :  { %v4589_v42 = vpop.eup %4588 }
 0x7cc   :  { %v1013_v44 = vadd.f32 1.0, %v4589_v42 }
 0x7ce   :  { %4590 = vrcp.f32 %v1013_v44 }
 0x7d8   :  { %v4591_v45 = vpop.eup %4590 }
 0x7d9   :  { %v1027_v55 = vsub.f32 1.0, %v4591_v45  ;;  %v1033_v57 = vmul.f32 %v4591_v45, %v5475_v30 }
 0x82f   :  { %v1018_v46 = vpop.permute.xlu1 %1017 }
 0x830   :  { %v1020_v47 = vmul.f32 %v4591_v45, %v1018_v46 }
 0x832   :  { %1022 = vrot.lane.b32.xlu0 %v1020_v47, %s5026_s30 }
 0x836   :  { %1036 = vperm.xlu0 %4566, %v5351_v12  }
 0x83a   :  { %4567 = vset.pattern.permute.xlu0 %v5031_v15 }
 0x8a4   :  { %v1023_v49 = vpop.permute.xlu0 %1022 }
 0x8a5   :  { %v1025_v50 = vadd.f32 %v1023_v49, %v930_v31  ;;  %v5032_v49 = vmov 5  }
 0x8a7   :  { %4592 = vtanh.f32 %v1025_v50 }
 0x8b1   :  { %v4593_v51 = vpop.eup %4592 }
 0x8b2   :  { %1029 = vrot.lane.b32.xlu1 %v4593_v51, %s5028_s28 }
 0x8b5   :  { %v1037_v52 = vpop.permute.xlu0 %1036 }
 0x8b6   :  { %vm1038_vm6 = vcmp.eq.s32.totalorder %v1037_v52, %v5405_v32 }
 0x8b7   :  { %v3808_v53 = vsel %vm1038_vm6, 1.0, %v5022_v1 }
 0x8b8   :  { %4101 = vmatmul.mubr.msk.f32.vlgmr.msra.gmra.mrb[8].mxu1 %vm240_vm1, %v3808_v53 }
 0x8b9   :  { %4406 = vmatpush3.bf16.msra.mxu1 %v5372_v20  ;;  %4111 = vmatprep.mubr.msk.f32.mxu1 %vm5023_vm0, %v5022_v1 }
 0x8ba   :  { %4407 = vmatprep.subr.bf16.mxu1 %v5025_v3 }
 0x8bd   :  { %4409 = vmatpush3.bf16.msra.mxu1 %v5384_v23 }
 0x8be   :  { %4130 = vmatprep.subr.mxu1 %v5022_v1 }
 0x924   :  { %v1030_v56 = vpop.permute.xlu1 %1029 }
 0x925   :  { %v1032_v58 = vmul.f32 %v1030_v56, %v1027_v55 }
 0x927   :  { %v5503_v59 = vadd.f32 %v1033_v57, %v1032_v58 }
 0x929   :  { %1115 = vrot.lane.b32.xlu1 %v5503_v59, %s5028_s28 }
 0x98b   :  { %v1110_v60 = vpop.f32.mrb[8].mxu1 }
 0x98c   :  { %v4102_v61 = vpop.f32.mrb[9].mxu1 }
 0x99b   :  { %v5507_v62 = vpop.permute.xlu1 %1115 }
 0x99c   :  { %4112 = vmatmul.mubr.msk.f32.vlgmr.msra.gmra.mrb[10].mxu1 %vm325_vm2, %v5507_v62 }
 0x99d   :  { %4131 = vmatpush3.msra.mxu1 %v5413_v36  ;;  %4132 = vmatprep.mubr.msk.f32.mxu1 %vm5023_vm0, %v5022_v1 }
 0x99e   :  { %4416 = vmatprep.subr.bf16.mxu1 %v5025_v3 }
 0xa6f   :  { %v1185_v63 = vpop.f32.mrb[10].mxu1 }
 0xa70   :  { %v1186_v4 = vadd.f32 %v5426_v39, %v1185_v63  ;;  %v4113_v5 = vpop.f32.mrb[11].mxu1 }
 0xa72   :  { %v1189_v7 = vadd.f32 %v1186_v4, %v1110_v60  ;;  %1197 = vrot.lane.b32.xlu1 %v1186_v4, %s5026_s30 }
 0xa74   :  { %v3811_v8 = vmul.f32 -1.442695, %v1189_v7 }
 0xa76   :  { %4594 = vpow2.f32 %v3811_v8 }
 0xa80   :  { %v4595_v9 = vpop.eup %4594 }
 0xa81   :  { %v1193_v10 = vadd.f32 1.0, %v4595_v9 }
 0xa83   :  { %4596 = vrcp.f32 %v1193_v10 }
 0xa8d   :  { %v4597_v11 = vpop.eup %4596 }
 0xa8e   :  { %v1207_v24 = vsub.f32 1.0, %v4597_v11  ;;  %v1213_v26 = vmul.f32 %v4597_v11, %v5503_v59 }
 0xae4   :  { %v1198_v13 = vpop.permute.xlu1 %1197 }
 0xae5   :  { %v1200_v14 = vmul.f32 %v4597_v11, %v1198_v13 }
 0xae7   :  { %1202 = vrot.lane.b32.xlu0 %v1200_v14, %s5026_s30 }
 0xaeb   :  { %1216 = vperm.xlu0 %4567, %v5351_v12  }
 0xaef   :  { %4568 = vset.pattern.permute.xlu0 %v5032_v49 }
 0xb59   :  { %v1203_v16 = vpop.permute.xlu0 %1202 }
 0xb5a   :  { %v1205_v17 = vadd.f32 %v1203_v16, %v1110_v60 }
 0xb5c   :  { %4598 = vtanh.f32 %v1205_v17  ;;  %v5033_v17 = vmov 6  }
 0xb66   :  { %v4599_v19 = vpop.eup %4598 }
 0xb67   :  { %1209 = vrot.lane.b32.xlu1 %v4599_v19, %s5028_s28 }
 0xb6a   :  { %v1217_v21 = vpop.permute.xlu0 %1216 }
 0xb6b   :  { %vm1218_vm7 = vcmp.eq.s32.totalorder %v1217_v21, %v5405_v32 }
 0xb6c   :  { %v3812_v22 = vsel %vm1218_vm7, 1.0, %v5022_v1 }
 0xb6d   :  { %4117 = vmatmul.mubr.msk.f32.vlgmr.msra.gmra.mrb[10].mxu0 %vm240_vm1, %v3812_v22 }
 0xb6e   :  { %4412 = vmatpush3.bf16.msra.mxu0 %v5372_v20  ;;  %4127 = vmatprep.mubr.msk.f32.mxu0 %vm5023_vm0, %v5022_v1 }
 0xb6f   :  { %4413 = vmatprep.subr.bf16.mxu0 %v5025_v3 }
 0xb72   :  { %4415 = vmatpush3.bf16.msra.mxu0 %v5384_v23 }
 0xb73   :  { %4146 = vmatprep.subr.mxu0 %v5022_v1 }
 0xbd9   :  { %v1210_v25 = vpop.permute.xlu1 %1209 }
 0xbda   :  { %v1212_v27 = vmul.f32 %v1210_v25, %v1207_v24 }
 0xbdc   :  { %v5530_v28 = vadd.f32 %v1213_v26, %v1212_v27 }
 0xbde   :  { %1295 = vrot.lane.b32.xlu1 %v5530_v28, %s5028_s28 }
 0xc40   :  { %v1290_v29 = vpop.f32.mrb[10].mxu0 }
 0xc41   :  { %v4118_v31 = vpop.f32.mrb[11].mxu0 }
 0xc50   :  { %v5534_v33 = vpop.permute.xlu1 %1295 }
 0xc51   :  { %4128 = vmatmul.mubr.msk.f32.vlgmr.msra.gmra.mrb[12].mxu0 %vm325_vm2, %v5534_v33 }
 0xc52   :  { %4147 = vmatpush3.msra.mxu0 %v5413_v36  ;;  %4148 = vmatprep.mubr.msk.f32.mxu0 %vm5023_vm0, %v5022_v1 }
 0xc53   :  { %4422 = vmatprep.subr.bf16.mxu0 %v5025_v3 }
 0xd24   :  { %v1365_v35 = vpop.f32.mrb[12].mxu0 }
 0xd25   :  { %v1366_v37 = vadd.f32 %v5426_v39, %v1365_v35  ;;  %v4129_v38 = vpop.f32.mrb[13].mxu0 }
 0xd27   :  { %v1369_v40 = vadd.f32 %v1366_v37, %v1290_v29  ;;  %1377 = vrot.lane.b32.xlu1 %v1366_v37, %s5026_s30 }
 0xd29   :  { %v3815_v41 = vmul.f32 -1.442695, %v1369_v40 }
 0xd2b   :  { %4600 = vpow2.f32 %v3815_v41 }
 0xd35   :  { %v4601_v42 = vpop.eup %4600 }
 0xd36   :  { %v1373_v44 = vadd.f32 1.0, %v4601_v42 }
 0xd38   :  { %4602 = vrcp.f32 %v1373_v44 }
 0xd42   :  { %v4603_v45 = vpop.eup %4602 }
 0xd43   :  { %v1387_v56 = vsub.f32 1.0, %v4603_v45  ;;  %v1393_v58 = vmul.f32 %v4603_v45, %v5530_v28 }
 0xd99   :  { %v1378_v46 = vpop.permute.xlu1 %1377 }
 0xd9a   :  { %v1380_v47 = vmul.f32 %v4603_v45, %v1378_v46 }
 0xd9c   :  { %1382 = vrot.lane.b32.xlu0 %v1380_v47, %s5026_s30 }
 0xda0   :  { %1396 = vperm.xlu0 %4568, %v5351_v12  }
 0xda4   :  { %4569 = vset.pattern.permute.xlu0 %v5033_v17 }
 0xe0e   :  { %v1383_v50 = vpop.permute.xlu0 %1382 }
 0xe0f   :  { %v1385_v51 = vadd.f32 %v1383_v50, %v1290_v29 }
 0xe11   :  { %4604 = vtanh.f32 %v1385_v51 }
 0xe1b   :  { %v4605_v52 = vpop.eup %4604 }
 0xe1c   :  { %1389 = vrot.lane.b32.xlu1 %v4605_v52, %s5028_s28 }
 0xe1f   :  { %v1397_v53 = vpop.permute.xlu0 %1396 }
 0xe20   :  { %vm1398_vm8 = vcmp.eq.s32.totalorder %v1397_v53, %v5405_v32  ;;  %v5034_v53 = vmov 7  }
 0xe21   :  { %v3816_v55 = vsel %vm1398_vm8, 1.0, %v5022_v1 }
 0xe22   :  { %4133 = vmatmul.mubr.msk.f32.vlgmr.msra.gmra.mrb[12].mxu1 %vm240_vm1, %v3816_v55 }
 0xe23   :  { %4418 = vmatpush3.bf16.msra.mxu1 %v5372_v20  ;;  %4143 = vmatprep.mubr.msk.f32.mxu1 %vm5023_vm0, %v5022_v1 }
 0xe24   :  { %4419 = vmatprep.subr.bf16.mxu1 %v5025_v3 }
 0xe27   :  { %4421 = vmatpush3.bf16.msra.mxu1 %v5384_v23 }
 0xe28   :  { %4162 = vmatprep.subr.mxu1 %v5022_v1 }
 0xe8e   :  { %v1390_v57 = vpop.permute.xlu1 %1389 }
 0xe8f   :  { %v1392_v60 = vmul.f32 %v1390_v57, %v1387_v56 }
 0xe91   :  { %v5557_v61 = vadd.f32 %v1393_v58, %v1392_v60 }
 0xe93   :  { %1475 = vrot.lane.b32.xlu1 %v5557_v61, %s5028_s28 }
 0xef5   :  { %v1470_v63 = vpop.f32.mrb[12].mxu1 }
 0xef6   :  { %v4134_v4 = vpop.f32.mrb[13].mxu1 }
 0xf05   :  { %v5561_v5 = vpop.permute.xlu1 %1475 }
 0xf06   :  { %4144 = vmatmul.mubr.msk.f32.vlgmr.msra.gmra.mrb[14].mxu1 %vm325_vm2, %v5561_v5 }
 0xf07   :  { %4163 = vmatpush3.msra.mxu1 %v5413_v36  ;;  %4164 = vmatprep.mubr.msk.f32.mxu1 %vm5023_vm0, %v5022_v1 }
 0xf08   :  { %4428 = vmatprep.subr.bf16.mxu1 %v5025_v3 }
 0xfd9   :  { %v1545_v7 = vpop.f32.mrb[14].mxu1 }
 0xfda   :  { %v1546_v8 = vadd.f32 %v5426_v39, %v1545_v7  ;;  %v4145_v9 = vpop.f32.mrb[15].mxu1 }
 0xfdb   :  { %v2022_v9 = vld [vmem:[#allocation6] sm:$0xff] }
 0xfdc   :  { %v1549_v10 = vadd.f32 %v1546_v8, %v1470_v63  ;;  %1557 = vrot.lane.b32.xlu1 %v1546_v8, %s5026_s30 }
 0xfde   :  { %v3819_v11 = vmul.f32 -1.442695, %v1549_v10  ;;  %v2023_v10 = vld [vmem:[#allocation6 + $0x8] sm:$0xff] }
 0xfe0   :  { %4606 = vpow2.f32 %v3819_v11  ;;  %v5614_v11 = vpack.c.bf16 %v2023_v10, %v2022_v9  ;;  %v2932_v9 = vld [vmem:[#allocation18 + $0x10] sm:$0xff]  ;;  %v2933_v10 = vld [vmem:[#allocation18 + $0x18] sm:$0xff] }
 0xfea   :  { %v4607_v13 = vpop.eup %4606 }
 0xfeb   :  { %v1553_v14 = vadd.f32 1.0, %v4607_v13  ;;  %v2024_v13 = vld [vmem:[#allocation6 + $0x10] sm:$0xff] }
 0xfed   :  { %4608 = vrcp.f32 %v1553_v14 }
 0xff7   :  { %v4609_v15 = vpop.eup %4608 }
 0xff8   :  { %v1567_v26 = vsub.f32 1.0, %v4609_v15  ;;  %v1573_v29 = vmul.f32 %v4609_v15, %v5557_v61 }
0x104e   :  { %v1558_v16 = vpop.permute.xlu1 %1557 }
0x104f   :  { %v1560_v36 = vmul.f32 %v4609_v15, %v1558_v16 }
0x1051   :  { %1562 = vrot.lane.b32.xlu0 %v1560_v36, %s5026_s30 }
0x1055   :  { %1576 = vperm.xlu0 %4569, %v5351_v12  }
0x1059   :  { %4570 = vset.pattern.permute.xlu0 %v5034_v53 }
0x10c3   :  { %v1563_v19 = vpop.permute.xlu0 %1562 }
0x10c4   :  { %v1565_v21 = vadd.f32 %v1563_v19, %v1470_v63 }
0x10c6   :  { %4610 = vtanh.f32 %v1565_v21 }
0x10d0   :  { %v4611_v22 = vpop.eup %4610 }
0x10d1   :  { %1569 = vrot.lane.b32.xlu1 %v4611_v22, %s5028_s28 }
0x10d4   :  { %v1577_v24 = vpop.permute.xlu0 %1576 }
0x10d5   :  { %vm1578_vm9 = vcmp.eq.s32.totalorder %v1577_v24, %v5405_v32 }
0x10d6   :  { %v3820_v25 = vsel %vm1578_vm9, 1.0, %v5022_v1 }
0x10d7   :  { %4149 = vmatmul.mubr.msk.f32.vlgmr.msra.gmra.mrb[14].mxu0 %vm240_vm1, %v3820_v25 }
0x10d8   :  { %4424 = vmatpush3.bf16.msra.mxu0 %v5372_v20  ;;  %4159 = vmatprep.mubr.msk.f32.mxu0 %vm5023_vm0, %v5022_v1 }
0x10d9   :  { %4425 = vmatprep.subr.bf16.mxu0 %v5025_v3 }
0x10dc   :  { %4427 = vmatpush3.bf16.msra.mxu0 %v5384_v23 }
0x10dd   :  { %4434 = vmatprep.subr.bf16.mxu0 %v5025_v3 }
0x1143   :  { %v1570_v27 = vpop.permute.xlu1 %1569 }
0x1144   :  { %v1572_v31 = vmul.f32 %v1570_v27, %v1567_v26 }
0x1146   :  { %v5584_v35 = vadd.f32 %v1573_v29, %v1572_v31 }
0x1148   :  { %1655 = vrot.lane.b32.xlu1 %v5584_v35, %s5028_s28 }
0x11aa   :  { %v1650_v37 = vpop.f32.mrb[14].mxu0 }
0x11ab   :  { %v4150_v38 = vpop.f32.mrb[15].mxu0 }
0x11ba   :  { %v5588_v40 = vpop.permute.xlu1 %1655 }
0x11bb   :  { %4160 = vmatmul.mubr.msk.f32.vlgmr.msra.gmra.mrb[16].mxu0 %vm325_vm2, %v5588_v40 }
0x11bc   :  { %4186 = vmatprep.mubr.msk.f32.mxu0 %vm5023_vm0, %v5022_v1 }
0x128e   :  { %v1725_v41 = vpop.f32.mrb[16].mxu0 }
0x128f   :  { %v1726_v42 = vadd.f32 %v5426_v39, %v1725_v41  ;;  %v4161_v44 = vpop.f32.mrb[17].mxu0 }
0x1290   :  { %v1935_v44 = vld [vmem:[#allocation9] sm:$0xff] }
0x1291   :  { %v1729_v45 = vadd.f32 %v1726_v42, %v1650_v37  ;;  %1737 = vrot.lane.b32.xlu1 %v1726_v42, %s5026_s30 }
0x1293   :  { %v3823_v46 = vmul.f32 -1.442695, %v1729_v45  ;;  %v1936_v45 = vld [vmem:[#allocation9 + $0x8] sm:$0xff] }
0x1295   :  { %4612 = vpow2.f32 %v3823_v46  ;;  %v1937_v46 = vld [vmem:[#allocation9 + $0x10] sm:$0xff] }
0x129f   :  { %v4613_v47 = vpop.eup %4612 }
0x12a0   :  { %v1733_v49 = vadd.f32 1.0, %v4613_v47  ;;  %v4435_v47 = vpack.c.bf16 %v1936_v45, %v1935_v44 }
0x12a2   :  { %4614 = vrcp.f32 %v1733_v49  ;;  %v1938_v49 = vld [vmem:[#allocation9 + $0x18] sm:$0xff]  ;;  %4436 = vmatpush3.bf16.msra.mxu0 %v4435_v47 }
0x12a3   :  { %4437 = vmatprep.subr.bf16.mxu0 %v5025_v3 }
0x12ac   :  { %v4615_v50 = vpop.eup %4614 }
0x12ad   :  { %v1753_v63 = vmul.f32 %v4615_v50, %v5584_v35 }
0x1303   :  { %v1738_v51 = vpop.permute.xlu1 %1737 }
0x1304   :  { %v1740_v52 = vmul.f32 %v4615_v50, %v1738_v51 }
0x1306   :  { %1742 = vrot.lane.b32.xlu0 %v1740_v52, %s5026_s30 }
0x130a   :  { %1756 = vperm.xlu0 %4570, %v5351_v12  }
0x130e   :  { %4571 = vset.pattern.permute.xlu0 %v5024_v2  ;;  %v1747_v2 = vsub.f32 1.0, %v4615_v50  ;;  %v4438_v50 = vpack.c.bf16 %v1938_v49, %v1937_v46 }
0x1310   :  { %4439 = vmatpush3.bf16.msra.mxu0 %v4438_v50 }
0x1311   :  { %4446 = vmatprep.subr.bf16.mxu0 %v5025_v3 }
0x1378   :  { %v1743_v55 = vpop.permute.xlu0 %1742 }
0x1379   :  { %v1745_v56 = vadd.f32 %v1743_v55, %v1650_v37 }
0x137b   :  { %4616 = vtanh.f32 %v1745_v56 }
0x1385   :  { %v4617_v57 = vpop.eup %4616 }
0x1386   :  { %1749 = vrot.lane.b32.xlu1 %v4617_v57, %s5028_s28 }
0x1389   :  { %v1757_v58 = vpop.permute.xlu0 %1756 }
0x138a   :  { %vm1758_vm10 = vcmp.eq.s32.totalorder %v1757_v58, %v5405_v32 }
0x138b   :  { %v3824_v60 = vsel %vm1758_vm10, 1.0, %v5022_v1 }
0x138c   :  { %4165 = vmatmul.mubr.msk.f32.vlgmr.msra.gmra.mrb[16].mxu1 %vm240_vm1, %v3824_v60 }
0x138d   :  { %4430 = vmatpush3.bf16.msra.mxu1 %v5372_v20  ;;  %4175 = vmatprep.mubr.msk.f32.mxu1 %vm5023_vm0, %v5022_v1 }
0x138e   :  { %4431 = vmatprep.subr.bf16.mxu1 %v5025_v3 }
0x1391   :  { %4433 = vmatpush3.bf16.msra.mxu1 %v5384_v23  ;;  %v2025_v23 = vld [vmem:[#allocation6 + $0x18] sm:$0xff] }
0x1392   :  { %4440 = vmatprep.subr.bf16.mxu1 %v5025_v3  ;;  %v5618_v15 = vpack.c.bf16 %v2025_v23, %v2024_v13  ;;  %v3830_v13 = vld [vmem:[#allocation8] ss:$0 sm:$0xff]  ;;  %v3828_v23 = vld [vmem:[#allocation11] ss:$0 sm:$0xff] }
0x13f8   :  { %v1750_v12 = vpop.permute.xlu1 %1749 }
0x13f9   :  { %v1752_v4 = vmul.f32 %v1750_v12, %v1747_v2  ;;  %v2855_v2 = vld [vmem:[#allocation15 + $0x10] sm:$0xff]  ;;  %v2856_v12 = vld [vmem:[#allocation15 + $0x18] sm:$0xff] }
0x13fb   :  { %v5610_v7 = vadd.f32 %v1753_v63, %v1752_v4  ;;  %v2930_v63 = vld [vmem:[#allocation18] sm:$0xff]  ;;  %v2931_v4 = vld [vmem:[#allocation18 + $0x8] sm:$0xff] }
0x13fd   :  { %1835 = vrot.lane.b32.xlu1 %v5610_v7, %s5028_s28 }
0x145f   :  { %v1830_v20 = vpop.f32.mrb[16].mxu1 }
0x1460   :  { %v4166_v8 = vpop.f32.mrb[17].mxu1 }
0x1461   :  { %v5706_v8 = vpack.c.bf16 %v2931_v4, %v2930_v63 }
0x146f   :  { %v1836_v14 = vpop.permute.xlu1 %1835 }
0x1470   :  { %4176 = vmatmul.mubr.msk.f32.vlgmr.msra.gmra.mrb[18].mxu1 %vm325_vm2, %v1836_v14 }
0x1471   :  { %4442 = vmatpush3.bf16.msra.mxu1 %v5614_v11  ;;  %4197 = vmatprep.mubr.msk.f32.mxu1 %vm5023_vm0, %v5022_v1 }
0x1472   :  { %4443 = vmatprep.subr.bf16.mxu1 %v5025_v3 }
0x1475   :  { %4445 = vmatpush3.bf16.msra.mxu1 %v5618_v15 }
0x1476   :  { %4452 = vmatprep.subr.bf16.mxu1 %v5025_v3 }
0x1478   :  { %4198 = vmatmul.mubr.msk.f32.vlgmr.msra.gmra.mrb[20].mxu1 %vm325_vm2, %v5451_v6 }
0x1479   :  { %4454 = vmatpush3.bf16.msra.mxu1 %v5614_v11  ;;  %4219 = vmatprep.mubr.msk.f32.mxu1 %vm5023_vm0, %v5022_v1 }
0x147a   :  { %4455 = vmatprep.subr.bf16.mxu1 %v5025_v3 }
0x147d   :  { %4457 = vmatpush3.bf16.msra.mxu1 %v5618_v15 }
0x147e   :  { %4464 = vmatprep.subr.bf16.mxu1 %v5025_v3 }
0x1480   :  { %4220 = vmatmul.mubr.msk.f32.vlgmr.msra.gmra.mrb[22].mxu1 %vm325_vm2, %v5507_v62 }
0x1481   :  { %4466 = vmatpush3.bf16.msra.mxu1 %v5614_v11  ;;  %4241 = vmatprep.mubr.msk.f32.mxu1 %vm5023_vm0, %v5022_v1 }
0x1482   :  { %4467 = vmatprep.subr.bf16.mxu1 %v5025_v3 }
0x1485   :  { %4469 = vmatpush3.bf16.msra.mxu1 %v5618_v15 }
0x1486   :  { %4476 = vmatprep.subr.bf16.mxu1 %v5025_v3 }
0x1488   :  { %4242 = vmatmul.mubr.msk.f32.vlgmr.msra.gmra.mrb[24].mxu1 %vm325_vm2, %v5561_v5 }
0x1489   :  { %4478 = vmatpush3.bf16.msra.mxu1 %v5614_v11  ;;  %4263 = vmatprep.mubr.msk.f32.mxu1 %vm5023_vm0, %v5022_v1 }
0x148a   :  { %4479 = vmatprep.subr.bf16.mxu1 %v5025_v3 }
0x148d   :  { %4481 = vmatpush3.bf16.msra.mxu1 %v5618_v15 }
0x148e   :  { %4488 = vmatprep.subr.bf16.mxu1 %v5025_v3 }
0x1490   :  { %4264 = vmatmul.mubr.msk.f32.vlgmr.msra.gmra.mrb[26].mxu1 %vm325_vm2, %v1836_v14 }
0x1491   :  { %4285 = vmatprep.mubr.msk.f32.mxu1 %vm5023_vm0, %v5022_v1 }
0x1543   :  { %v1905_v6 = vpop.f32.mrb[18].mxu1 }
0x1544   :  { %v1906_v62 = vadd.f32 %v5426_v39, %v1905_v6  ;;  %v4177_v5 = vpop.f32.mrb[19].mxu1 }
0x1546   :  { %v1909_v16 = vadd.f32 %v1906_v62, %v1830_v20  ;;  %1917 = vrot.lane.b32.xlu1 %v1906_v62, %s5026_s30 }
0x1548   :  { %v3827_v27 = vmul.f32 -1.442695, %v1909_v16 }
0x154a   :  { %4618 = vpow2.f32 %v3827_v27 }
0x154b   :  { %v5654_v36 = vpop.f32.mrb[20].mxu1 }
0x154c   :  { %v4199_v17 = vpop.f32.mrb[21].mxu1  ;;  %v2100_v14 = vadd.f32 %v3830_v13, %v5654_v36  ;;  %v3832_v36 = vld [vmem:[#allocation12] ss:$0 sm:$0xff] }
0x1553   :  { %v5656_v19 = vpop.f32.mrb[22].mxu1 }
0x1554   :  { %v4221_v21 = vpop.f32.mrb[23].mxu1  ;;  %v4619_v29 = vpop.eup %4618  ;;  %v2268_v6 = vadd.f32 %v3830_v13, %v5656_v19 }
0x1555   :  { %v1913_v39 = vadd.f32 1.0, %v4619_v29 }
0x1557   :  { %4620 = vrcp.f32 %v1913_v39 }
0x155b   :  { %v5658_v22 = vpop.f32.mrb[24].mxu1 }
0x155c   :  { %v4243_v24 = vpop.f32.mrb[25].mxu1  ;;  %v2422_v62 = vadd.f32 %v3830_v13, %v5658_v22 }
0x1561   :  { %v4621_v31 = vpop.eup %4620 }
0x1562   :  { %v1927_v52 = vsub.f32 1.0, %v4621_v31  ;;  %v1933_v55 = vmul.f32 %v4621_v31, %v5610_v7 }
0x1563   :  { %v5660_v25 = vpop.f32.mrb[26].mxu1 }
0x1564   :  { %v4265_v26 = vpop.f32.mrb[27].mxu1  ;;  %v2576_v5 = vadd.f32 %v3830_v13, %v5660_v25 }
0x15b8   :  { %v1918_v37 = vpop.permute.xlu1 %1917 }
0x15b9   :  { %v1920_v38 = vmul.f32 %v4621_v31, %v1918_v37 }
0x15bb   :  { %1922 = vrot.lane.b32.xlu0 %v1920_v38, %s5026_s30 }
0x162d   :  { %v1923_v41 = vpop.permute.xlu0 %1922 }
0x162e   :  { %v1925_v42 = vadd.f32 %v1923_v41, %v1830_v20  ;;  %v2852_v20 = vld [vmem:[#allocation14] sm:$0xf] }
0x1630   :  { %4622 = vtanh.f32 %v1925_v42 }
0x163a   :  { %v4623_v51 = vpop.eup %4622 }
0x163b   :  { %1929 = vrot.lane.b32.xlu1 %v4623_v51, %s5028_s28 }
0x16ad   :  { %v1930_v53 = vpop.permute.xlu1 %1929 }
0x16ae   :  { %v1932_v56 = vmul.f32 %v1930_v53, %v1927_v52 }
0x16b0   :  { %v5667_v57 = vadd.f32 %v1933_v55, %v1932_v56 }
0x16b2   :  { %1947 = vrot.lane.b32.xlu0 %v5667_v57, %s5028_s28 }
0x1724   :  { %v1948_v58 = vpop.permute.xlu0 %1947 }
0x1725   :  { %4187 = vmatmul.mubr.msk.f32.vlgmr.msra.gmra.mrb[18].mxu0 %vm325_vm2, %v1948_v58 }
0x1726   :  { %4448 = vmatpush3.bf16.msra.mxu0 %v5614_v11  ;;  %4208 = vmatprep.mubr.msk.f32.mxu0 %vm5023_vm0, %v5022_v1 }
0x1727   :  { %4449 = vmatprep.subr.bf16.mxu0 %v5025_v3 }
0x172a   :  { %4451 = vmatpush3.bf16.msra.mxu0 %v5618_v15 }
0x172b   :  { %4458 = vmatprep.subr.bf16.mxu0 %v5025_v3 }
0x172d   :  { %4209 = vmatmul.mubr.msk.f32.vlgmr.msra.gmra.mrb[20].mxu0 %vm325_vm2, %v5479_v34  ;;  %v2853_v34 = vld [vmem:[#allocation15] sm:$0xff] }
0x172e   :  { %4460 = vmatpush3.bf16.msra.mxu0 %v5614_v11  ;;  %4230 = vmatprep.mubr.msk.f32.mxu0 %vm5023_vm0, %v5022_v1 }
0x172f   :  { %4461 = vmatprep.subr.bf16.mxu0 %v5025_v3 }
0x1732   :  { %4463 = vmatpush3.bf16.msra.mxu0 %v5618_v15 }
0x1733   :  { %4470 = vmatprep.subr.bf16.mxu0 %v5025_v3 }
0x1735   :  { %4231 = vmatmul.mubr.msk.f32.vlgmr.msra.gmra.mrb[22].mxu0 %vm325_vm2, %v5534_v33  ;;  %v2854_v33 = vld [vmem:[#allocation15 + $0x8] sm:$0xff] }
0x1736   :  { %4472 = vmatpush3.bf16.msra.mxu0 %v5614_v11  ;;  %4252 = vmatprep.mubr.msk.f32.mxu0 %vm5023_vm0, %v5022_v1  ;;  %v4495_v60 = vpack.c.bf16 %v2854_v33, %v2853_v34 }
0x1737   :  { %4473 = vmatprep.subr.bf16.mxu0 %v5025_v3 }
0x173a   :  { %4475 = vmatpush3.bf16.msra.mxu0 %v5618_v15 }
0x173b   :  { %4482 = vmatprep.subr.bf16.mxu0 %v5025_v3 }
0x173d   :  { %4253 = vmatmul.mubr.msk.f32.vlgmr.msra.gmra.mrb[24].mxu0 %vm325_vm2, %v5588_v40  ;;  %v4498_v40 = vpack.c.bf16 %v2856_v12, %v2855_v2 }
0x173e   :  { %4484 = vmatpush3.bf16.msra.mxu0 %v5614_v11  ;;  %4274 = vmatprep.mubr.msk.f32.mxu0 %vm5023_vm0, %v5022_v1  ;;  %v5711_v11 = vpack.c.bf16 %v2933_v10, %v2932_v9 }
0x173f   :  { %4485 = vmatprep.subr.bf16.mxu0 %v5025_v3 }
0x1742   :  { %4487 = vmatpush3.bf16.msra.mxu0 %v5618_v15 }
0x1743   :  { %4494 = vmatprep.subr.bf16.mxu0 %v5025_v3 }
0x1745   :  { %4275 = vmatmul.mubr.msk.f32.vlgmr.msra.gmra.mrb[26].mxu0 %vm325_vm2, %v1948_v58 }
0x1746   :  { %4496 = vmatpush3.bf16.msra.mxu0 %v4495_v60  ;;  %4296 = vmatprep.mubr.msk.f32.mxu0 %vm5023_vm0, %v5022_v1 }
0x1747   :  { %4497 = vmatprep.subr.bf16.mxu0 %v5025_v3 }
0x174a   :  { %4499 = vmatpush3.bf16.msra.mxu0 %v4498_v40 }
0x174b   :  { %4500 = vmatprep.subr.bf16.mxu0 %v5025_v3 }
0x174d   :  { %4297 = vmatmul.mubr.msk.f32.vlgmr.msra.gmra.mrb[28].mxu0 %vm325_vm2, %v2852_v20 }
0x174e   :  { %4502 = vmatpush3.bf16.msra.mxu0 %v5706_v8  ;;  %4312 = vmatprep.mubr.msk.f32.mxu0 %vm5023_vm0, %v5022_v1 }
0x174f   :  { %4503 = vmatprep.subr.bf16.mxu0 %v5025_v3 }
0x1752   :  { %4505 = vmatpush3.bf16.msra.mxu0 %v5711_v11 }
0x1753   :  { %4331 = vmatprep.subr.mxu0 %v5022_v1 }
0x1755   :  { %4313 = vmatmul.mubr.msk.f32.vlgmr.msra.gmra.mrb[30].mxu0 %vm325_vm2, %v1948_v58 }
0x1756   :  { %4333 = vmatprep.mubr.msk.f32.mxu0 %vm5023_vm0, %v5022_v1 }
0x17f8   :  { %v2017_v15 = vpop.f32.mrb[18].mxu0 }
0x17f9   :  { %v2018_v16 = vadd.f32 %v3828_v23, %v2017_v15  ;;  %v4188_v17 = vpop.f32.mrb[19].mxu0 }
0x17fb   :  { %v2103_v21 = vadd.f32 %v2100_v14, %v2018_v16  ;;  %v2271_v24 = vadd.f32 %v2268_v6, %v2018_v16  ;;  %v2425_v26 = vadd.f32 %v2422_v62, %v2018_v16  ;;  %v2579_v27 = vadd.f32 %v2576_v5, %v2018_v16 }
0x17fd   :  { %4624 = vtanh.f32 %v2103_v21 }
0x17fe   :  { %4626 = vtanh.f32 %v2271_v24 }
0x1800   :  { %v2190_v29 = vpop.f32.mrb[20].mxu0 }
0x1801   :  { %v2191_v39 = vadd.f32 %v3830_v13, %v2190_v29  ;;  %v4210_v31 = vpop.f32.mrb[21].mxu0  ;;  %v3833_v29 = vld [vmem:[#allocation2] ss:$0 sm:$0xff] }
0x1803   :  { %v2194_v37 = vadd.f32 %v2191_v39, %v2018_v16 }
0x1805   :  { %4628 = vtanh.f32 %v2194_v37 }
0x1806   :  { %4630 = vtanh.f32 %v2425_v26 }
0x1807   :  { %v4625_v38 = vpop.eup %4624  ;;  %4632 = vtanh.f32 %v2579_v27 }
0x1808   :  { %v2344_v19 = vpop.f32.mrb[22].mxu0  ;;  %v2111_v22 = vmul.f32 %v4625_v38, %v3832_v36  ;;  %v4627_v45 = vpop.eup %4626 }
0x1809   :  { %v2345_v41 = vadd.f32 %v3830_v13, %v2344_v19  ;;  %v4232_v25 = vpop.f32.mrb[23].mxu0  ;;  %v2273_v53 = vmul.f32 %v4627_v45, %v3832_v36 }
0x180a   :  { %v2113_v42 = vsel %vm2112_vm11, %v2111_v22, 0.0 }
0x180b   :  { %v2348_v44 = vadd.f32 %v2345_v41, %v2018_v16  ;;  %2114 = vadd.xlane.f32.xlu1 %v2113_v42  ;;  %v2274_v34 = vsel %vm2112_vm11, %v2273_v53, 0.0 }
0x180d   :  { %4634 = vtanh.f32 %v2348_v44 }
0x180f   :  { %v4629_v46 = vpop.eup %4628 }
0x1810   :  { %v2498_v47 = vpop.f32.mrb[24].mxu0  ;;  %v2196_v49 = vmul.f32 %v4629_v46, %v3832_v36  ;;  %v4631_v55 = vpop.eup %4630 }
0x1811   :  { %v2499_v50 = vadd.f32 %v3830_v13, %v2498_v47  ;;  %v4254_v51 = vpop.f32.mrb[25].mxu0  ;;  %v4633_v58 = vpop.eup %4632  ;;  %v2427_v33 = vmul.f32 %v4631_v55, %v3832_v36 }
0x1812   :  { %v2197_v52 = vsel %vm2112_vm11, %v2196_v49, 0.0  ;;  %v2581_v9 = vmul.f32 %v4633_v58, %v3832_v36 }
0x1813   :  { %v2502_v56 = vadd.f32 %v2499_v50, %v2018_v16  ;;  %2198 = vadd.xlane.f32.xlu0 %v2197_v52  ;;  %v2428_v20 = vsel %vm2112_vm11, %v2427_v33, 0.0 }
0x1814   :  { %v2582_v23 = vsel %vm2112_vm11, %v2581_v9, 0.0 }
0x1815   :  { %4636 = vtanh.f32 %v2502_v56 }
0x1817   :  { %v4635_v60 = vpop.eup %4634  ;;  %2275 = vadd.xlane.f32.xlu0 %v2274_v34 }
0x1818   :  { %v2652_v2 = vpop.f32.mrb[26].mxu0  ;;  %v2350_v12 = vmul.f32 %v4635_v60, %v3832_v36 }
0x1819   :  { %v2653_v40 = vadd.f32 %v3830_v13, %v2652_v2  ;;  %v4276_v63 = vpop.f32.mrb[27].mxu0 }
0x181a   :  { %v2351_v4 = vsel %vm2112_vm11, %v2350_v12, 0.0 }
0x181b   :  { %v2656_v10 = vadd.f32 %v2653_v40, %v2018_v16  ;;  %2352 = vadd.xlane.f32.xlu1 %v2351_v4  ;;  %2429 = vadd.xlane.f32.xlu0 %v2428_v20 }
0x181d   :  { %4638 = vtanh.f32 %v2656_v10 }
0x181f   :  { %v4637_v14 = vpop.eup %4636  ;;  %2583 = vadd.xlane.f32.xlu0 %v2582_v23 }
0x1820   :  { %v2504_v15 = vmul.f32 %v4637_v14, %v3832_v36  ;;  %v5731_v6 = vpop.f32.mrb[28].mxu0 }
0x1821   :  { %v4298_v62 = vpop.f32.mrb[29].mxu0  ;;  %4332 = vmatpush3.msk.msra.mxu0 %vm2945_vm12, %v5731_v6 }
0x1822   :  { %v2505_v13 = vsel %vm2112_vm11, %v2504_v15, 0.0  ;;  %4512 = vmatprep.subr.bf16.mxu0 %v5025_v3 }
0x1823   :  { %2506 = vadd.xlane.f32.xlu1 %v2505_v13 }
0x1827   :  { %v4639_v5 = vpop.eup %4638 }
0x1828   :  { %v5734_v17 = vpop.f32.mrb[30].mxu0  ;;  %v2658_v21 = vmul.f32 %v4639_v5, %v3832_v36 }
0x1829   :  { %v4314_v24 = vpop.f32.mrb[31].mxu0 }
0x182a   :  { %v2659_v16 = vsel %vm2112_vm11, %v2658_v21, 0.0 }
0x182b   :  { %2660 = vadd.xlane.f32.xlu1 %v2659_v16 }
0x1898   :  { %v2115_v27 = vpop.xlane.xlu1 %2114 }
0x1899   :  { %v2123_v38 = vadd.f32 %v3833_v29, %v2115_v27 }
0x18a0   :  { %v2199_v26 = vpop.xlane.xlu0 %2198 }
0x18a1   :  { %v2200_v31 = vadd.f32 %v3833_v29, %v2199_v26 }
0x18a3   :  { %v2663_v22 = vmax.f32 %v2123_v38, %v2200_v31 }
0x18a4   :  { %v2276_v39 = vpop.xlane.xlu0 %2275 }
0x18a5   :  { %v2277_v19 = vadd.f32 %v3833_v29, %v2276_v39 }
0x18a7   :  { %v2664_v25 = vmax.f32 %v2663_v22, %v2277_v19 }
0x18a8   :  { %v2353_v37 = vpop.xlane.xlu1 %2352  ;;  %v2430_v42 = vpop.xlane.xlu0 %2429 }
0x18a9   :  { %v2354_v41 = vadd.f32 %v3833_v29, %v2353_v37  ;;  %v2431_v46 = vadd.f32 %v3833_v29, %v2430_v42 }
0x18ab   :  { %v2665_v44 = vmax.f32 %v2664_v25, %v2354_v41 }
0x18ac   :  { %v2584_v49 = vpop.xlane.xlu0 %2583 }
0x18ad   :  { %v2666_v47 = vmax.f32 %v2665_v44, %v2431_v46  ;;  %v2585_v51 = vadd.f32 %v3833_v29, %v2584_v49  ;;  %v3792_v49 = vld [vmem:[%s5944_s0] ss:$0 sm:$0xff] }
0x18b0   :  { %v2507_v45 = vpop.xlane.xlu1 %2506 }
0x18b1   :  { %v2508_v36 = vadd.f32 %v3833_v29, %v2507_v45 }
0x18b3   :  { %v2667_v50 = vmax.f32 %v2666_v47, %v2508_v36 }
0x18b5   :  { %v2668_v55 = vmax.f32 %v2667_v50, %v2585_v51  ;;  %v396_v50 = vadd.f32 %v3792_v49, %v5432_v43  ;;  %v2767_v43 = vld [vmem:[%s5912_s17 + $0x8] sm:$0xff] }
0x18b8   :  { %v2661_v52 = vpop.xlane.xlu1 %2660 }
0x18b9   :  { %v2662_v53 = vadd.f32 %v3833_v29, %v2661_v52  ;;  %v4532_v52 = vtrunc.f32 %v396_v50 }
0x18bb   :  { %v2669_v56 = vmax.f32 %v2668_v55, %v2662_v53  ;;  %v5742_v55 = vcvt.f32.s32 %v4532_v52 }
0x18bd   :  { %v2670_v58 = vsub.f32 %v2123_v38, %v2669_v56  ;;  %v2673_v34 = vsub.f32 %v2200_v31, %v2669_v56  ;;  %v2676_v33 = vsub.f32 %v2277_v19, %v2669_v56  ;;  %v2679_v60 = vsub.f32 %v2354_v41, %v2669_v56 }
0x18be   :  { %v2682_v63 = vsub.f32 %v2431_v46, %v2669_v56  ;;  %v2685_v20 = vsub.f32 %v2508_v36, %v2669_v56  ;;  %v2688_v10 = vsub.f32 %v2585_v51, %v2669_v56  ;;  %v2691_v14 = vsub.f32 %v2662_v53, %v2669_v56 }
0x18bf   :  { %v2671_v2 = vmul.f32 1.442695, %v2670_v58  ;;  %v2674_v12 = vmul.f32 1.442695, %v2673_v34  ;;  %v2677_v40 = vmul.f32 1.442695, %v2676_v33 }
0x18c0   :  { %v2680_v4 = vmul.f32 1.442695, %v2679_v60  ;;  %v2683_v9 = vmul.f32 1.442695, %v2682_v63  ;;  %v2686_v23 = vmul.f32 1.442695, %v2685_v20 }
0x18c1   :  { %4640 = vpow2.f32 %v2671_v2  ;;  %v2689_v15 = vmul.f32 1.442695, %v2688_v10  ;;  %v2692_v62 = vmul.f32 1.442695, %v2691_v14  ;;  %v2766_v58 = vld [vmem:[%s5912_s17] sm:$0xff]  ;;  %v2768_v34 = vld [vmem:[%s5912_s17 + $0x10] sm:$0xff] }
0x18c2   :  { %4642 = vpow2.f32 %v2674_v12  ;;  %v4489_v33 = vpack.c.bf16 %v2767_v43, %v2766_v58  ;;  %v2769_v60 = vld [vmem:[%s5912_s17 + $0x18] sm:$0xff] }
0x18c3   :  { %4644 = vpow2.f32 %v2677_v40 }
0x18c4   :  { %4646 = vpow2.f32 %v2680_v4  ;;  %4490 = vmatpush3.bf16.msra.mxu1 %v4489_v33 }
0x18c5   :  { %4648 = vpow2.f32 %v2683_v9  ;;  %4491 = vmatprep.subr.bf16.mxu1 %v5025_v3 }
0x18c6   :  { %4650 = vpow2.f32 %v2686_v23 }
0x18c7   :  { %4652 = vpow2.f32 %v2689_v15 }
0x18c8   :  { %4654 = vpow2.f32 %v2692_v62 }
0x18cb   :  { %v4641_v13 = vpop.eup %4640 }
0x18cc   :  { %v4643_v5 = vpop.eup %4642 }
0x18cd   :  { %v2694_v21 = vadd.f32 %v4643_v5, %v4641_v13  ;;  %v4645_v24 = vpop.eup %4644 }
0x18ce   :  { %v4647_v26 = vpop.eup %4646 }
0x18cf   :  { %v2695_v16 = vadd.f32 %v4645_v24, %v2694_v21  ;;  %v4649_v29 = vpop.eup %4648 }
0x18d0   :  { %v4651_v31 = vpop.eup %4650 }
0x18d1   :  { %v2696_v27 = vadd.f32 %v4647_v26, %v2695_v16  ;;  %v4653_v38 = vpop.eup %4652 }
0x18d2   :  { %v4655_v22 = vpop.eup %4654 }
0x18d3   :  { %v2697_v39 = vadd.f32 %v4649_v29, %v2696_v27 }
0x18d5   :  { %v2698_v37 = vadd.f32 %v4651_v31, %v2697_v39 }
0x18d7   :  { %v2699_v19 = vadd.f32 %v4653_v38, %v2698_v37 }
0x18d9   :  { %v2700_v41 = vadd.f32 %v4655_v22, %v2699_v19 }
0x18db   :  { %4656 = vrcp.f32 %v2700_v41 }
0x18e5   :  { %v4657_v25 = vpop.eup %4656 }
0x18e6   :  { %v2709_v42 = vmul.f32 %v4657_v25, %v4643_v5  ;;  %v2702_v44 = vmul.f32 %v4657_v25, %v4641_v13  ;;  %v2717_v45 = vmul.f32 %v4657_v25, %v4645_v24  ;;  %v2725_v46 = vmul.f32 %v4657_v25, %v4647_v26 }
0x18e7   :  { %v2733_v36 = vmul.f32 %v4657_v25, %v4649_v29  ;;  %v2741_v47 = vmul.f32 %v4657_v25, %v4651_v31  ;;  %v2749_v51 = vmul.f32 %v4657_v25, %v4653_v38  ;;  %v2757_v53 = vmul.f32 %v4657_v25, %v4655_v22 }
0x18e8   :  { %2712 = vperm.xlu1 %4572, %v2709_v42   ;;  %2705 = vperm.xlu0 %4571, %v2702_v44  }
0x18ec   :  { %2720 = vperm.xlu1 %4572, %v2717_v45   ;;  %4573 = vset.pattern.permute.xlu0 %v5027_v54  ;;  %v5744_v54 = vld [vmem:[#allocation20] ss:$0 sm:$0xff] }
0x18ed   :  { %v3093_v56 = vadd.f32 %v5744_v54, %v5734_v17  ;;  %v4492_v17 = vpack.c.bf16 %v2769_v60, %v2768_v34 }
0x18ef   :  { %4493 = vmatpush3.bf16.msra.mxu1 %v4492_v17 }
0x18f0   :  { %2728 = vperm.xlu1 %4572, %v2725_v46   ;;  %4299 = vmatprep.subr.mxu1 %v5022_v1 }
0x18f4   :  { %2736 = vperm.xlu1 %4572, %v2733_v36  }
0x18f8   :  { %2744 = vperm.xlu1 %4572, %v2741_v47  }
0x18fc   :  { %2752 = vperm.xlu1 %4572, %v2749_v51  }
0x1900   :  { %2760 = vperm.xlu1 %4572, %v2757_v53  }
0x1904   :  { %2936 = vperm.xlu1 %4572, %v5742_v55  }
0x1908   :  { %3104 = vrot.lane.b32.xlu1 %v3093_v56, %s5026_s30 }
0x1967   :  { %v2713_v2 = vpop.permute.xlu1 %2712  ;;  %v2706_v40 = vpop.permute.xlu0 %2705 }
0x1968   :  { %v2715_v4 = vmul.f32 %v2713_v2, %v5475_v30  ;;  %v2708_v20 = vmul.f32 %v2706_v40, %v5447_v0 }
0x196a   :  { %v2716_v23 = vadd.f32 %v2715_v4, %v2708_v20 }
0x196b   :  { %v2721_v12 = vpop.permute.xlu1 %2720 }
0x196c   :  { %v2723_v10 = vmul.f32 %v2721_v12, %v5503_v59 }
0x196e   :  { %v2724_v62 = vadd.f32 %v2723_v10, %v2716_v23 }
0x196f   :  { %v2729_v63 = vpop.permute.xlu1 %2728 }
0x1970   :  { %v2731_v14 = vmul.f32 %v2729_v63, %v5530_v28 }
0x1972   :  { %v2732_v5 = vadd.f32 %v2731_v14, %v2724_v62 }
0x1973   :  { %v2737_v9 = vpop.permute.xlu1 %2736 }
0x1974   :  { %v2739_v13 = vmul.f32 %v2737_v9, %v5557_v61 }
0x1976   :  { %v2740_v21 = vadd.f32 %v2739_v13, %v2732_v5 }
0x1977   :  { %v2745_v15 = vpop.permute.xlu1 %2744 }
0x1978   :  { %v2747_v30 = vmul.f32 %v2745_v15, %v5584_v35 }
0x197a   :  { %v2748_v24 = vadd.f32 %v2747_v30, %v2740_v21 }
0x197b   :  { %v2753_v0 = vpop.permute.xlu1 %2752 }
0x197c   :  { %v2755_v59 = vmul.f32 %v2753_v0, %v5610_v7  ;;  %v3841_v7 = vld [vmem:[#allocation17] ss:$0 sm:$0xff] }
0x197e   :  { %v2756_v28 = vadd.f32 %v2755_v59, %v2748_v24 }
0x197f   :  { %v2761_v16 = vpop.permute.xlu1 %2760 }
0x1980   :  { %v2763_v26 = vmul.f32 %v2761_v16, %v5667_v57 }
0x1982   :  { %v2764_v27 = vadd.f32 %v2763_v26, %v2756_v28 }
0x1983   :  { %v2937_v61 = vpop.permute.xlu1 %2936 }
0x1984   :  { %2778 = vrot.lane.b32.xlu0 %v2764_v27, %s5028_s28  ;;  %vm2938_vm13 = vcmp.eq.s32.totalorder %v2937_v61, %v5405_v32 }
0x1985   :  { %v3844_v35 = vsel %vm2938_vm13, 1.0, %v5022_v1 }
0x1987   :  { %v3105_v46 = vpop.permute.xlu1 %3104 }
0x19f6   :  { %v2779_v29 = vpop.permute.xlu0 %2778 }
0x19f7   :  { %4286 = vmatmul.mubr.msk.f32.vlgmr.msra.gmra.mrb[28].mxu1 %vm325_vm2, %v2779_v29 }
0x19f8   :  { %4300 = vmatpush3.msk.msra.mxu1 %vm2945_vm12, %v5731_v6  ;;  %4301 = vmatprep.mubr.msk.f32.mxu1 %vm5023_vm0, %v5022_v1 }
0x19f9   :  { %4315 = vmatprep.subr.mxu1 %v5022_v1 }
0x19fb   :  { %4302 = vmatmul.mubr.msk.f32.vlgmr.msra.gmra.mrb[30].mxu1 %vm2941_vm14, %v3844_v35 }
0x19fc   :  { %4316 = vmatpush3.msk.msra.mxu1 %vm2945_vm12, %v5731_v6  ;;  %4317 = vmatprep.mubr.msk.f32.mxu1 %vm5023_vm0, %v5022_v1 }
0x19fd   :  { %4506 = vmatprep.subr.bf16.mxu1 %v5025_v3 }
0x1aca   :  { %v2848_v39 = vpop.f32.mrb[28].mxu1 }
0x1acb   :  { %v4287_v31 = vpop.f32.mrb[29].mxu1  ;;  %v5790_v37 = vadd.f32 %v3841_v7, %v2848_v39 }
0x1ace   :  { %v3015_v38 = vpop.f32.mrb[30].mxu1 }
0x1acf   :  { %v3019_v19 = vadd.f32 %v3015_v38, %v5790_v37  ;;  %v4303_v22 = vpop.f32.mrb[31].mxu1 }
0x1ad1   :  { %v3096_v41 = vadd.f32 %v3093_v56, %v3019_v19 }
0x1ad3   :  { %v3849_v25 = vmul.f32 -1.442695, %v3096_v41 }
0x1ad5   :  { %4658 = vpow2.f32 %v3849_v25 }
0x1adf   :  { %v4659_v42 = vpop.eup %4658 }
0x1ae0   :  { %v3100_v44 = vadd.f32 1.0, %v4659_v42 }
0x1ae2   :  { %4660 = vrcp.f32 %v3100_v44 }
0x1aec   :  { %v4661_v45 = vpop.eup %4660 }
0x1aed   :  { %v3107_v36 = vmul.f32 %v4661_v45, %v3105_v46  ;;  %v3120_v56 = vmul.f32 %v4661_v45, %v5667_v57 }
0x1aef   :  { %3109 = vrot.lane.b32.xlu0 %v3107_v36, %s5026_s30 }
0x1af3   :  { %3123 = vperm.xlu0 %4573, %v5742_v55  }
0x1af7   :  { %4574 = vset.pattern.permute.xlu0 %v5029_v18  ;;  %v3114_v18 = vsub.f32 1.0, %v4661_v45 }
0x1b61   :  { %v3110_v47 = vpop.permute.xlu0 %3109 }
0x1b62   :  { %v3112_v49 = vadd.f32 %v3110_v47, %v3019_v19 }
0x1b64   :  { %4662 = vtanh.f32 %v3112_v49 }
0x1b6e   :  { %v4663_v50 = vpop.eup %4662 }
0x1b6f   :  { %3116 = vrot.lane.b32.xlu1 %v4663_v50, %s5028_s28 }
0x1b72   :  { %v3124_v51 = vpop.permute.xlu0 %3123 }
0x1b73   :  { %vm3125_vm15 = vcmp.eq.s32.totalorder %v3124_v51, %v5405_v32 }
0x1b74   :  { %v3850_v52 = vsel %vm3125_vm15, 1.0, %v5022_v1 }
0x1b75   :  { %4318 = vmatmul.mubr.msk.f32.vlgmr.msra.gmra.mrb[32].mxu1 %vm2941_vm14, %v3850_v52 }
0x1b76   :  { %4508 = vmatpush3.bf16.msra.mxu1 %v5706_v8  ;;  %4328 = vmatprep.mubr.msk.f32.mxu1 %vm5023_vm0, %v5022_v1 }
0x1b77   :  { %4509 = vmatprep.subr.bf16.mxu1 %v5025_v3 }
0x1b7a   :  { %4511 = vmatpush3.bf16.msra.mxu1 %v5711_v11 }
0x1b7b   :  { %4347 = vmatprep.subr.mxu1 %v5022_v1 }
0x1be1   :  { %v3117_v53 = vpop.permute.xlu1 %3116 }
0x1be2   :  { %v3119_v58 = vmul.f32 %v3117_v53, %v3114_v18 }
0x1be4   :  { %v3121_v43 = vadd.f32 %v3120_v56, %v3119_v58 }
0x1be6   :  { %3203 = vrot.lane.b32.xlu1 %v3121_v43, %s5028_s28 }
0x1c48   :  { %v3197_v34 = vpop.f32.mrb[32].mxu1 }
0x1c49   :  { %v4319_v33 = vpop.f32.mrb[33].mxu1  ;;  %v3201_v12 = vadd.f32 %v3197_v34, %v5790_v37 }
0x1c58   :  { %v3204_v60 = vpop.permute.xlu1 %3203 }
0x1c59   :  { %4329 = vmatmul.mubr.msk.f32.vlgmr.msra.gmra.mrb[34].mxu1 %vm325_vm2, %v3204_v60 }
0x1c5a   :  { %4348 = vmatpush3.msk.msra.mxu1 %vm2945_vm12, %v5731_v6  ;;  %4349 = vmatprep.mubr.msk.f32.mxu1 %vm5023_vm0, %v5022_v1 }
0x1c5b   :  { %4518 = vmatprep.subr.bf16.mxu1 %v5025_v3 }
0x1d2c   :  { %v3273_v17 = vpop.f32.mrb[34].mxu1 }
0x1d2d   :  { %v3274_v57 = vadd.f32 %v5744_v54, %v3273_v17  ;;  %v4330_v2 = vpop.f32.mrb[35].mxu1  ;;  %v3672_v17 = vld [vmem:[%s5917_s22 + $0x10] sm:$0xff] }
0x1d2e   :  { %v3673_v2 = vld [vmem:[%s5917_s22 + $0x18] sm:$0xff] }
0x1d2f   :  { %3285 = vrot.lane.b32.xlu1 %v3274_v57, %s5026_s30  ;;  %v3277_v40 = vadd.f32 %v3274_v57, %v3201_v12 }
0x1d31   :  { %v3854_v63 = vmul.f32 -1.442695, %v3277_v40 }
0x1d33   :  { %4664 = vpow2.f32 %v3854_v63 }
0x1d3d   :  { %v4665_v4 = vpop.eup %4664 }
0x1d3e   :  { %v3281_v20 = vadd.f32 1.0, %v4665_v4 }
0x1d40   :  { %4666 = vrcp.f32 %v3281_v20 }
0x1d4a   :  { %v4667_v6 = vpop.eup %4666 }
0x1d4b   :  { %v3301_v30 = vmul.f32 %v4667_v6, %v3121_v43 }
0x1da1   :  { %v3286_v9 = vpop.permute.xlu1 %3285 }
0x1da2   :  { %v3288_v10 = vmul.f32 %v4667_v6, %v3286_v9 }
0x1da4   :  { %3290 = vrot.lane.b32.xlu0 %v3288_v10, %s5026_s30 }
0x1da8   :  { %3304 = vperm.xlu0 %4574, %v5742_v55  }
0x1dac   :  { %4575 = vset.pattern.permute.xlu0 %v5030_v48  ;;  %v3295_v48 = vsub.f32 1.0, %v4667_v6 }
0x1e16   :  { %v3291_v23 = vpop.permute.xlu0 %3290 }
0x1e17   :  { %v3293_v14 = vadd.f32 %v3291_v23, %v3201_v12  ;;  %v4528_v12 = vpack.c.bf16 %v3673_v2, %v3672_v17 }
0x1e19   :  { %4668 = vtanh.f32 %v3293_v14 }
0x1e23   :  { %v4669_v15 = vpop.eup %4668 }
0x1e24   :  { %3297 = vrot.lane.b32.xlu1 %v4669_v15, %s5028_s28 }
0x1e27   :  { %v3305_v62 = vpop.permute.xlu0 %3304 }
0x1e28   :  { %vm3306_vm1 = vcmp.eq.s32.totalorder %v3305_v62, %v5405_v32 }
0x1e29   :  { %v3855_v13 = vsel %vm3306_vm1, 1.0, %v5022_v1 }
0x1e2a   :  { %4334 = vmatmul.mubr.msk.f32.vlgmr.msra.gmra.mrb[32].mxu0 %vm2941_vm14, %v3855_v13 }
0x1e2b   :  { %4514 = vmatpush3.bf16.msra.mxu0 %v5706_v8  ;;  %4344 = vmatprep.mubr.msk.f32.mxu0 %vm5023_vm0, %v5022_v1 }
0x1e2c   :  { %4515 = vmatprep.subr.bf16.mxu0 %v5025_v3 }
0x1e2f   :  { %4517 = vmatpush3.bf16.msra.mxu0 %v5711_v11 }
0x1e30   :  { %4524 = vmatprep.subr.bf16.mxu0 %v5025_v3 }
0x1e96   :  { %v3298_v5 = vpop.permute.xlu1 %3297 }
0x1e97   :  { %v3300_v0 = vmul.f32 %v3298_v5, %v3295_v48 }
0x1e99   :  { %v3302_v21 = vadd.f32 %v3301_v30, %v3300_v0 }
0x1e9b   :  { %3384 = vrot.lane.b32.xlu1 %v3302_v21, %s5028_s28 }
0x1efd   :  { %v3378_v59 = vpop.f32.mrb[32].mxu0 }
0x1efe   :  { %v4335_v24 = vpop.f32.mrb[33].mxu0  ;;  %v3382_v61 = vadd.f32 %v3378_v59, %v5790_v37 }
0x1f0d   :  { %v3385_v16 = vpop.permute.xlu1 %3384 }
0x1f0e   :  { %4345 = vmatmul.mubr.msk.f32.vlgmr.msra.gmra.mrb[34].mxu0 %vm325_vm2, %v3385_v16 }
0x1f0f   :  { %4371 = vmatprep.mubr.msk.f32.mxu0 %vm5023_vm0, %v5022_v1 }
0x1fe1   :  { %v3454_v28 = vpop.f32.mrb[34].mxu0 }
0x1fe2   :  { %v3455_v26 = vadd.f32 %v5744_v54, %v3454_v28  ;;  %v4346_v27 = vpop.f32.mrb[35].mxu0 }
0x1fe4   :  { %3466 = vrot.lane.b32.xlu1 %v3455_v26, %s5026_s30  ;;  %v3458_v29 = vadd.f32 %v3455_v26, %v3382_v61 }
0x1fe6   :  { %v3859_v35 = vmul.f32 -1.442695, %v3458_v29 }
0x1fe8   :  { %4670 = vpow2.f32 %v3859_v35 }
0x1ff2   :  { %v4671_v7 = vpop.eup %4670 }
0x1ff3   :  { %v3462_v39 = vadd.f32 1.0, %v4671_v7 }
0x1ff5   :  { %4672 = vrcp.f32 %v3462_v39 }
0x1fff   :  { %v4673_v31 = vpop.eup %4672 }
0x2000   :  { %v3482_v46 = vmul.f32 %v4673_v31, %v3302_v21 }
0x2056   :  { %v3467_v38 = vpop.permute.xlu1 %3466 }
0x2057   :  { %v3469_v19 = vmul.f32 %v4673_v31, %v3467_v38 }
0x2059   :  { %3471 = vrot.lane.b32.xlu0 %v3469_v19, %s5026_s30 }
0x205d   :  { %3485 = vperm.xlu0 %4575, %v5742_v55   ;;  %v3476_v55 = vsub.f32 1.0, %v4673_v31 }
0x20cb   :  { %v3472_v22 = vpop.permute.xlu0 %3471 }
0x20cc   :  { %v3474_v41 = vadd.f32 %v3472_v22, %v3382_v61 }
0x20ce   :  { %4674 = vtanh.f32 %v3474_v41 }
0x20d8   :  { %v4675_v25 = vpop.eup %4674 }
0x20d9   :  { %3478 = vrot.lane.b32.xlu1 %v4675_v25, %s5028_s28 }
0x20dc   :  { %v3486_v42 = vpop.permute.xlu0 %3485 }
0x20dd   :  { %vm3487_vm3 = vcmp.eq.s32.totalorder %v3486_v42, %v5405_v32 }
0x20de   :  { %v3860_v44 = vsel %vm3487_vm3, 1.0, %v5022_v1 }
0x20df   :  { %4350 = vmatmul.mubr.msk.f32.vlgmr.msra.gmra.mrb[36].mxu1 %vm2941_vm14, %v3860_v44 }
0x20e0   :  { %4520 = vmatpush3.bf16.msra.mxu1 %v5706_v8  ;;  %4360 = vmatprep.mubr.msk.f32.mxu1 %vm5023_vm0, %v5022_v1 }
0x20e1   :  { %4521 = vmatprep.subr.bf16.mxu1 %v5025_v3 }
0x20e4   :  { %4523 = vmatpush3.bf16.msra.mxu1 %v5711_v11 }
0x214b   :  { %v3479_v45 = vpop.permute.xlu1 %3478 }
0x214c   :  { %v3481_v36 = vmul.f32 %v3479_v45, %v3476_v55 }
0x214e   :  { %v3483_v47 = vadd.f32 %v3482_v46, %v3481_v36 }
0x2150   :  { %3565 = vrot.lane.b32.xlu1 %v3483_v47, %s5028_s28 }
0x21b2   :  { %v3559_v32 = vpop.f32.mrb[36].mxu1 }
0x21b3   :  { %v4351_v49 = vpop.f32.mrb[37].mxu1  ;;  %v3563_v11 = vadd.f32 %v3559_v32, %v5790_v37  ;;  %v3671_v37 = vld [vmem:[%s5917_s22 + $0x8] sm:$0xff] }
0x21c2   :  { %v3566_v50 = vpop.permute.xlu1 %3565 }
0x21c3   :  { %4361 = vmatmul.mubr.msk.f32.vlgmr.msra.gmra.mrb[38].mxu1 %vm325_vm2, %v3566_v50 }
0x2296   :  { %v3635_v8 = vpop.f32.mrb[38].mxu1 }
0x2297   :  { %v3636_v51 = vadd.f32 %v5744_v54, %v3635_v8  ;;  %v4362_v1 = vpop.f32.mrb[39].mxu1  ;;  %v3670_v54 = vld [vmem:[%s5917_s22] sm:$0xff]  ;;  %s5035_s22 = smov [#allocation24]  }
0x2298   :  { %v4525_v57 = vpack.c.bf16 %v3671_v37, %v3670_v54  ;;  %s3771_s7 = sshll.u32 %s5035_s22, 4  ;;  %s3772_s7 = int_to_ptr.vmem [resolvable:$true] %s3771_s7 }
0x2299   :  { %3647 = vrot.lane.b32.xlu1 %v3636_v51, %s5026_s30  ;;  %v3639_v52 = vadd.f32 %v3636_v51, %v3563_v11  ;;  %s4946_s15 = scalar_lea.vmem %s3772_s7, 64  ;;  %p4951_p13 = scmp.lt.s32.totalorder %s3772_s7, %s3772_s7 }
0x229a   :  { %4526 = vmatpush3.bf16.msra.mxu0 %v4525_v57  ;;  %p4947_p12 = scmp.ne.s32.totalorder %s3772_s7, %s4946_s15  ;;  %p4952_p0 = scmp.lt.s32.totalorder %s4946_s15, %s4946_s15 }
0x229b   :  { %v3864_v18 = vmul.f32 -1.442695, %v3639_v52  ;;  %4527 = vmatprep.subr.bf16.mxu0 %v5025_v3 }
0x229c   :  { %p4953_p1 = por %p4952_p0, %p4951_p13 }
0x229d   :  { %4676 = vpow2.f32 %v3864_v18 }
0x229e   :  { %4529 = vmatpush3.bf16.msra.mxu0 %v4528_v12  ;;  %p4954_p2 = pnand %p4953_p1, %p4947_p12 }
0x22a7   :  { %v4677_v53 = vpop.eup %4676 }
0x22a8   :  { %v3643_v56 = vadd.f32 1.0, %v4677_v53 }
0x22aa   :  { %4678 = vrcp.f32 %v3643_v56 }
0x22b4   :  { %v4679_v58 = vpop.eup %4678 }
0x22b5   :  { %v3657_v63 = vsub.f32 1.0, %v4679_v58  ;;  %v3663_v20 = vmul.f32 %v4679_v58, %v3483_v47 }
0x230b   :  { %v3648_v43 = vpop.permute.xlu1 %3647 }
0x230c   :  { %v3650_v34 = vmul.f32 %v4679_v58, %v3648_v43 }
0x230e   :  { %3652 = vrot.lane.b32.xlu0 %v3650_v34, %s5026_s30 }
0x2380   :  { %v3653_v33 = vpop.permute.xlu0 %3652 }
0x2381   :  { %v3655_v60 = vadd.f32 %v3653_v33, %v3563_v11 }
0x2383   :  { %4680 = vtanh.f32 %v3655_v60 }
0x238d   :  { %v4681_v40 = vpop.eup %4680 }
0x238e   :  { %3659 = vrot.lane.b32.xlu1 %v4681_v40, %s5028_s28 }
0x2400   :  { %v3660_v4 = vpop.permute.xlu1 %3659 }
0x2401   :  { %v3662_v6 = vmul.f32 %v3660_v4, %v3657_v63 }
0x2403   :  { %v3664_v9 = vadd.f32 %v3663_v20, %v3662_v6 }
0x2405   :  { %3666 = vrot.lane.b32.xlu0 %v3664_v9, %s5028_s28 }
0x2477   :  { %v3667_v10 = vpop.permute.xlu0 %3666 }
0x2478   :  { %3669 = vst.msk [vmem:[#allocation24] sm:$0xf] %vm2112_vm11, %v3667_v10  ;;  %4372 = vmatmul.mubr.msk.f32.vlgmr.msra.gmra.mrb[36].mxu0 %vm325_vm2, %v3667_v10 }
0x2479   :  { %4957 = shalt.err (!%p4954_p2)
}
0x247a   :  { %s4958_s19 = scalar_lea.hbm %s5920_s25, 64 }
0x247b   :  { %p4959_p3 = scmp.ne.s32.totalorder %s5920_s25, %s4958_s19  ;;  %p4962_p4 = scmp.lt.u32.totalorder %s4958_s19, %s5920_s25 }
0x247d   :  { %p4964_p5 = pnand %p4962_p4, %p4959_p3 }
0x247f   :  { %4967 = shalt.err (!%p4964_p5)
}
0x2480   :  { %3774 = dma.vmem_to_hbm [thread:$0]  %s3772_s7, 64, %s5920_s25, [#allocation25]   ;;  %v3865_v3 = vld [vmem:[#allocation21] ss:$0 sm:$0xff]  ;;  %vm3753_vm0 = vcmask 27648  }
0x2481   :  { %s5036_s0 = smov [#allocation23]  }
0x2482   :  { %s3761_s11 = sshll.u32 %s5036_s0, 4  ;;  %s3762_s11 = int_to_ptr.vmem [resolvable:$true] %s3761_s11 }
0x2483   :  { %s4968_s8 = scalar_lea.vmem %s3762_s11, 64  ;;  %p4973_p7 = scmp.lt.s32.totalorder %s3762_s11, %s3762_s11 }
0x2484   :  { %p4969_p6 = scmp.ne.s32.totalorder %s3762_s11, %s4968_s8  ;;  %p4974_p8 = scmp.lt.s32.totalorder %s4968_s8, %s4968_s8 }
0x2486   :  { %p4975_p9 = por %p4974_p8, %p4973_p7 }
0x2488   :  { %p4976_p10 = pnand %p4975_p9, %p4969_p6 }
0x254b   :  { %v3749_v23 = vpop.f32.mrb[36].mxu0 }
0x254c   :  { %v3750_v14 = vadd.f32 %v3865_v3, %v3749_v23  ;;  %v4373_v15 = vpop.f32.mrb[37].mxu0 }
0x254e   :  { %3754 = vst.msk [vmem:[#allocation23] sm:$0xf] %vm3753_vm0, %v3750_v14 }
0x254f   :  { %4979 = shalt.err (!%p4976_p10)
}
0x2550   :  { %s4980_s25 = scalar_lea.hbm %s5919_s24, 64 }
0x2551   :  { %p4981_p11 = scmp.ne.s32.totalorder %s5919_s24, %s4980_s25  ;;  %p4984_p12 = scmp.lt.u32.totalorder %s4980_s25, %s5919_s24 }
0x2553   :  { %p4986_p13 = pnand %p4984_p12, %p4981_p11 }
0x2555   :  { %4989 = shalt.err (!%p4986_p13)
}
0x2556   :  { %3764 = dma.vmem_to_hbm [thread:$0]  %s3762_s11, 64, %s5919_s24, [#allocation5]  }
0x2557   :  { %5004 = dma.done.wait [#allocation5], 64  }
0x2558   :  { %5005 = vsyncadd [#allocation5], 4294967232 }
0x2559   :  { %5006 = dma.done.wait [#allocation25], 64  }
0x255a   :  { %5007 = vsyncadd [#allocation25], 4294967232 }
0x255b   :  { %3781 = vsyncpa [#allocation4], 1 }
0x255c   :  { %3782 = vsyncpa [#allocation7], 1 }
0x255d   :  { %3783 = vsyncpa [#allocation10], 1 }
0x255e   :  { %3784 = vsyncpa [#allocation13], 1 }
0x255f   :  { %3785 = vsyncpa [#allocation16], 1 }
0x2560   :  { %3786 = vsyncpa [#allocation19], 1 }
0x2561   :  { %3787 = vsyncpa [#allocation22], 1 }
0x2562   :  { %3788 = vsyncpa [#allocation5], 1 }
0x2563   :  { %3789 = vsyncpa [#allocation25], 1 }

</bundles_post_ra>
